<compile_context>
chip_gen: v7x
topology: tpu7x:2x2x1
jax: 0.10.0
libtpu: 0.0.40
codegen_flags: <defaults>
</compile_context>

<pallas_src>
import functools

import jax
import jax.numpy as jnp
from jax.experimental import pallas as pl
from jax.experimental.pallas import tpu as pltpu

BN_EPS = 1e-5
LANE = 128
SUBLANE = 8
ROW16 = 16                           # bf16 packs 16 rows/vreg: keep row offsets multiples of 16
VMEM_LIMIT = 64 * 1024 * 1024        # safe on v5e/v6e (128 MiB) and within v7x's 64 MiB


def _round_up(x, m):
    return ((x + m - 1) // m) * m


def _cpad(n):
    """Pad a channel count up to a multiple of 128 (lane-dense outputs)."""
    return max(LANE, _round_up(n, LANE))


def _pick_tile(dim, target, align):
    """Alignment-aware tile pick: full dim if it fits; else the largest multiple of
    `align` that divides `dim` and is <= target; else the full dim (always legal)."""
    if dim <= target:
        return dim
    t = (target // align) * align
    while t >= align:
        if dim % t == 0:
            return t
        t -= align
    return dim


# ---------------------------- fused matmul kernel ----------------------------
# out = maybe_relu( maybe_relu((x @ w) * scale + bias) + residual )
# grid = (M//tm, N//tn, K//tk), f32 accumulator in VMEM scratch, K axis last.

def _mm_kernel(*refs, relu1, relu2, add_res, use_scale):
    refs = list(refs)
    x_ref = refs.pop(0)
    w_ref = refs.pop(0)
    s_ref = refs.pop(0) if use_scale else None
    b_ref = refs.pop(0)
    res_ref = refs.pop(0) if add_res else None
    o_ref = refs.pop(0)
    acc_ref = refs.pop(0)

    kk = pl.program_id(2)

    @pl.when(kk == 0)
    def _():
        acc_ref[...] = jnp.zeros_like(acc_ref)

    acc_ref[...] += jnp.dot(x_ref[...], w_ref[...],
                            preferred_element_type=jnp.float32)

    @pl.when(kk == pl.num_programs(2) - 1)
    def _():
        y = acc_ref[...]
        if use_scale:
            y = y * s_ref[...]
        y = y + b_ref[...]
        if relu1:
            y = jnp.maximum(y, 0.0)
        if add_res:
            y = y + res_ref[...].astype(jnp.float32)
            if relu2:
                y = jnp.maximum(y, 0.0)
        o_ref[...] = y.astype(o_ref.dtype)


def fused_matmul(x2d, w_kn, scale=None, bias=None, residual=None,
                 relu1=False, relu2=False, out_dtype=jnp.bfloat16,
                 tm=256, tn=2048, tk=512):
    M, K = x2d.shape
    Kw, N = w_kn.shape
    assert K == Kw
    tm = _pick_tile(M, tm, SUBLANE)     # sublane-aligned (or full-M) row tiles
    tn = _pick_tile(N, tn, LANE)        # lane-aligned output tiles -> unmasked vst
    tk = _pick_tile(K, tk, LANE)
    grid = (M // tm, N // tn, K // tk)

    use_scale = scale is not None
    add_res = residual is not None

    args = [x2d.astype(jnp.bfloat16), w_kn.astype(jnp.bfloat16)]
    in_specs = [pl.BlockSpec((tm, tk), lambda i, j, k: (i, k)),
                pl.BlockSpec((tk, tn), lambda i, j, k: (k, j))]
    if use_scale:
        args.append(scale.reshape(1, N).astype(jnp.float32))
        in_specs.append(pl.BlockSpec((1, tn), lambda i, j, k: (0, j)))
    args.append(bias.reshape(1, N).astype(jnp.float32))
    in_specs.append(pl.BlockSpec((1, tn), lambda i, j, k: (0, j)))
    if add_res:
        args.append(residual.astype(jnp.bfloat16))
        in_specs.append(pl.BlockSpec((tm, tn), lambda i, j, k: (i, j)))

    kernel = functools.partial(_mm_kernel, relu1=relu1, relu2=relu2,
                               add_res=add_res, use_scale=use_scale)

    out_bytes = M * N * jnp.dtype(out_dtype).itemsize
    bytes_accessed = 2 * (M * K + K * N + (M * N if add_res else 0)) + out_bytes

    return pl.pallas_call(
        kernel,
        out_shape=jax.ShapeDtypeStruct((M, N), out_dtype),
        grid=grid,
        in_specs=in_specs,
        out_specs=pl.BlockSpec((tm, tn), lambda i, j, k: (i, j)),
        scratch_shapes=[pltpu.VMEM((tm, tn), jnp.float32)],
        compiler_params=pltpu.CompilerParams(
            dimension_semantics=("parallel", "parallel", "arbitrary"),
            vmem_limit_bytes=VMEM_LIMIT),
        cost_estimate=pl.CostEstimate(flops=2 * M * K * N, transcendentals=0,
                                      bytes_accessed=bytes_accessed),
    )(*args)


# ---------------------------- 3x3 conv kernel (stride 1, pad 1) ----------------------------
# Width taps packed into channels (XLA side); height taps = three sublane-aligned row
# shifts inside the kernel.  Grid = (M row tiles, Cout tiles), halo pre-tiled in HBM.

def _conv3x3_kernel(x_ref, w_ref, s_ref, b_ref, o_ref, *, row_shift, tm):
    acc = jnp.dot(x_ref[pl.ds(0, tm), :], w_ref[0],
                  preferred_element_type=jnp.float32)
    acc = acc + jnp.dot(x_ref[pl.ds(row_shift, tm), :], w_ref[1],
                        preferred_element_type=jnp.float32)
    acc = acc + jnp.dot(x_ref[pl.ds(2 * row_shift, tm), :], w_ref[2],
                        preferred_element_type=jnp.float32)
    y = acc * s_ref[...] + b_ref[...]
    o_ref[...] = jnp.maximum(y, 0.0).astype(o_ref.dtype)


def conv3x3_bn_relu(x_nhwc, p, tm_target=256, tn_target=512):
    """3x3 / stride 1 / pad 1 conv + folded BN + ReLU (bf16 MXU, f32 epilogue)."""
    N, H, W, Cin = x_nhwc.shape
    Hp = H + 2
    W_pad = _round_up(W, ROW16)                  # aligned row period (extra cols discarded)
    K = 3 * Cin
    Cout = p['w'].shape[-1]
    assert p['w'].shape[1] == K

    x = x_nhwc.astype(jnp.bfloat16)
    # one spatial pad: 1 row top/bottom, 1 col left, (W_pad + 1 - W) cols right
    xp = jnp.pad(x, ((0, 0), (1, 1), (1, W_pad + 1 - W), (0, 0)))
    # pack the 3 width taps into the (lane-dense) channel dim: (N, Hp, W_pad, 3*Cin)
    xw = jnp.concatenate([xp[:, :, dj:dj + W_pad, :] for dj in range(3)], axis=-1)

    M = N * Hp * W_pad                           # Hp output rows per image; frame discarded
    tm = min(_round_up(tm_target, ROW16), _round_up(M, ROW16))
    Mt = pl.cdiv(M, tm)
    M_pad = Mt * tm
    halo = 2 * W_pad

    xw_flat = jnp.pad(xw.reshape(M, K), ((0, M_pad + halo - M), (0, 0)))
    # overlapping row tiles with halo -> clean Blocked BlockSpec, bounded VMEM, no
    # unaligned slices; the halo duplicated in HBM is only halo/tm extra bytes.
    xw_tiles = jnp.stack([xw_flat[i * tm:i * tm + tm + halo] for i in range(Mt)], axis=0)

    tn = _pick_tile(Cout, tn_target, LANE)
    Nt = Cout // tn
    s2 = p['scale'].reshape(1, Cout).astype(jnp.float32)
    b2 = p['bias'].reshape(1, Cout).astype(jnp.float32)

    kernel = functools.partial(_conv3x3_kernel, row_shift=W_pad, tm=tm)
    flops = 2 * M_pad * K * Cout
    bytes_accessed = xw_tiles.size * 2 + p['w'].size * 2 + M_pad * Cout * 2

    out = pl.pallas_call(
        kernel,
        out_shape=jax.ShapeDtypeStruct((M_pad, Cout), jnp.bfloat16),
        grid=(Mt, Nt),
        in_specs=[
            pl.BlockSpec((None, tm + halo, K), lambda i, j: (i, 0, 0)),
            pl.BlockSpec((3, K, tn), lambda i, j: (0, 0, j)),
            pl.BlockSpec((1, tn), lambda i, j: (0, j)),
            pl.BlockSpec((1, tn), lambda i, j: (0, j)),
        ],
        out_specs=pl.BlockSpec((tm, tn), lambda i, j: (i, j)),
        compiler_params=pltpu.CompilerParams(
            dimension_semantics=("parallel", "parallel"),
            vmem_limit_bytes=VMEM_LIMIT),
        cost_estimate=pl.CostEstimate(flops=flops, transcendentals=0,
                                      bytes_accessed=bytes_accessed),
    )(xw_tiles, p['w'], s2, b2)

    return out[:M].reshape(N, Hp, W_pad, Cout)[:, :H, :W, :]


# ---------------------------- global average pool kernel ----------------------------

def _avgpool_kernel(x_ref, o_ref):
    o_ref[...] = jnp.mean(x_ref[...].astype(jnp.float32), axis=1).astype(o_ref.dtype)


def global_avgpool(x_nhwc, tn_target=512):
    N, H, W, C = x_nhwc.shape
    tn = _pick_tile(C, tn_target, LANE)
    x3 = x_nhwc.reshape(N, H * W, C)
    return pl.pallas_call(
        _avgpool_kernel,
        out_shape=jax.ShapeDtypeStruct((N, C), jnp.bfloat16),
        grid=(C // tn,),
        in_specs=[pl.BlockSpec((N, H * W, tn), lambda j: (0, 0, j))],
        out_specs=pl.BlockSpec((N, tn), lambda j: (0, j)),
        compiler_params=pltpu.CompilerParams(
            dimension_semantics=("parallel",),
            vmem_limit_bytes=VMEM_LIMIT),
    )(x3)


# ---------------------------- JAX glue ----------------------------

def conv1x1_bn_act(x_nhwc, p, stride=1, relu1=True, residual=None, relu2=False,
                   out_dtype=jnp.bfloat16):
    if stride > 1:                               # a strided 1x1 conv == subsample + matmul
        x_nhwc = x_nhwc[:, ::stride, ::stride, :]
    N, H, W, C = x_nhwc.shape
    x2 = x_nhwc.reshape(N * H * W, C)
    res2 = None
    if residual is not None:
        res2 = residual.reshape(N * H * W, residual.shape[-1])
    out = fused_matmul(x2, p['w'], scale=p['scale'], bias=p['bias'], residual=res2,
                       relu1=relu1, relu2=relu2, out_dtype=out_dtype)
    return out.reshape(N, H, W, -1)


def conv_stem(x_nhwc, p, k=7, stride=2, pad=3):
    # Tiny 1-channel stem: im2col on the XLA side, K padded to a lane-dense 128.
    N, H, W, C = x_nhwc.shape
    Ho = (H + 2 * pad - k) // stride + 1
    Wo = (W + 2 * pad - k) // stride + 1
    xp = jnp.pad(x_nhwc, ((0, 0), (pad, pad), (pad, pad), (0, 0)))
    cols = []
    for i in range(k):
        for j in range(k):
            cols.append(xp[:, i:i + stride * Ho:stride, j:j + stride * Wo:stride, :])
    patches = jnp.stack(cols, axis=3).reshape(N * Ho * Wo, k * k * C)
    k_pad = p['w'].shape[0]
    patches = jnp.pad(patches, ((0, 0), (0, k_pad - k * k * C)))
    out = fused_matmul(patches, p['w'], scale=p['scale'], bias=p['bias'],
                       relu1=True, out_dtype=jnp.bfloat16)
    return out.reshape(N, Ho, Wo, -1)


def maxpool2d(x, k=3, stride=2, pad=1):
    # TODO(synk): left on XLA's reduce_window (per perf review) to avoid a 9x
    # window-stack HBM expansion in a hand-written pooling kernel.
    return jax.lax.reduce_window(
        x, jnp.array(-jnp.inf, x.dtype), jax.lax.max,
        window_dimensions=(1, k, k, 1),
        window_strides=(1, stride, stride, 1),
        padding=((0, 0), (pad, pad), (pad, pad), (0, 0)))


def block_forward(x_nhwc, bp, stride):
    # CreateBlock.forward: res = x; x = conv_layers(x); res = id(res) if id; relu(res + x)
    # The reference applies `stride` to every conv in the block; only stride=1 is
    # shape-consistent (and is what the demo config uses).
    if stride != 1:
        raise NotImplementedError("reference block is only shape-consistent for stride=1")
    res = x_nhwc
    y = conv1x1_bn_act(x_nhwc, bp['c1'], stride=stride, relu1=True)     # bf16
    y = conv3x3_bn_relu(y, bp['c2'])
    if 'id' in bp:
        res = conv1x1_bn_act(res, bp['id'], stride=stride, relu1=False)
    # conv3 + BN + ReLU (reference keeps a ReLU before the add), then residual add +
    # final ReLU — all fused in one kernel epilogue.
    y = conv1x1_bn_act(y, bp['c3'], stride=stride, relu1=True,
                       residual=res, relu2=True)
    return y


def resnet_forward(x_nchw, params, strides):
    x = jnp.transpose(x_nchw, (0, 2, 3, 1)).astype(jnp.bfloat16)   # NCHW -> NHWC
    # init_layers: Conv2d(1,64,7,s2,p3) + BN + ReLU + MaxPool(3,s2,p1)
    x = conv_stem(x, params['init'])
    x = maxpool2d(x)
    for bp, s in zip(params['blocks'], strides):
        x = block_forward(x, bp, s)
    pooled = global_avgpool(x)                                     # (N, C) bf16
    # big-N, tiny-M FC: large tn so the weight streams in 4 tiles, not 30
    out = fused_matmul(pooled, params['fc_w'], scale=None, bias=params['fc_b'],
                       relu1=False, out_dtype=jnp.float32, tn=7680)
    return out                                                     # (N, 30720)


# ---------------------------- parameter init (BN folded, channel-padded) ----------------------------

def init_conv_bn(key, cin, cout, k, cin_pad=None):
    cin_pad = _cpad(cin) if cin_pad is None else cin_pad
    cout_pad = _cpad(cout)
    kw_, kb, kg, kbe, km, kv = jax.random.split(key, 6)
    w = 0.1 * jax.random.normal(kw_, (cout, cin, k, k), jnp.float32)
    b = 0.1 * jax.random.normal(kb, (cout,), jnp.float32)
    gamma = 1.0 + 0.1 * jax.random.normal(kg, (cout,), jnp.float32)
    beta = 0.1 * jax.random.normal(kbe, (cout,), jnp.float32)
    mean = 0.1 * jax.random.normal(km, (cout,), jnp.float32)
    var = jax.random.uniform(kv, (cout,), jnp.float32, minval=0.5, maxval=1.5)
    scale = gamma * jax.lax.rsqrt(var + BN_EPS)
    bias = (b - mean) * scale + beta

    scale_p = jnp.ones((cout_pad,), jnp.float32).at[:cout].set(scale)
    bias_p = jnp.zeros((cout_pad,), jnp.float32).at[:cout].set(bias)   # pad channels stay 0

    if k == 1:
        w_p = jnp.zeros((cin_pad, cout_pad), jnp.float32)
        w_p = w_p.at[:cin, :cout].set(w[:, :, 0, 0].T)
    elif k == 3:
        taps = jnp.transpose(w, (2, 3, 1, 0)).reshape(9, cin, cout)     # (kh*kw, cin, cout)
        w9 = jnp.zeros((9, cin_pad, cout_pad), jnp.float32)
        w9 = w9.at[:, :cin, :cout].set(taps)
        # (di, dj, cin_pad, cout) -> (di, 3*cin_pad, cout): dj blocks match the XLA-side
        # width-tap channel packing in conv3x3_bn_relu.
        w_p = w9.reshape(3, 3 * cin_pad, cout_pad)
    else:  # stem 7x7, cin=1: im2col layout, K padded 49 -> 128 (lane-dense LHS)
        k_pad = _round_up(k * k * cin, LANE)
        w2 = jnp.transpose(w, (2, 3, 1, 0)).reshape(k * k * cin, cout)
        w_p = jnp.zeros((k_pad, cout_pad), jnp.float32)
        w_p = w_p.at[:k * k * cin, :cout].set(w2)
    return {'w': w_p.astype(jnp.bfloat16), 'scale': scale_p, 'bias': bias_p}


def build_resnet_params(key, blocks_reps, architecture):
    params = {}
    key, k0 = jax.random.split(key)
    params['init'] = init_conv_bn(k0, 1, 64, 7)
    in_channels = 64
    block_params, strides = [], []
    for reps, (out_channels, stride) in zip(blocks_reps, architecture):
        key, k1, k2, k3, kid = jax.random.split(key, 5)
        bp = {'c1': init_conv_bn(k1, in_channels, out_channels, 1),
              'c2': init_conv_bn(k2, out_channels, out_channels, 3),
              'c3': init_conv_bn(k3, out_channels, out_channels * 4, 1)}
        if in_channels != out_channels * 4:
            bp['id'] = init_conv_bn(kid, in_channels, out_channels * 4, 1)
        block_params.append(bp)
        strides.append(stride)
        in_channels = out_channels * 4
        for _ in range(reps - 1):
            key, k1, k2, k3 = jax.random.split(key, 4)
            bp = {'c1': init_conv_bn(k1, in_channels, out_channels, 1),
                  'c2': init_conv_bn(k2, out_channels, out_channels, 3),
                  'c3': init_conv_bn(k3, out_channels, out_channels * 4, 1)}
            block_params.append(bp)
            strides.append(1)
    params['blocks'] = block_params

    key, kfw, kfb = jax.random.split(key, 3)
    in_size = in_channels              # channels after avgpool == fc inSize
    in_pad = _cpad(in_size)
    fc_out = 30720                     # hard-coded in the PyTorch module
    fc_w = 0.05 * jax.random.normal(kfw, (fc_out, in_size), jnp.float32)
    fc_b = 0.05 * jax.random.normal(kfb, (fc_out,), jnp.float32)
    fc_w_kn = jnp.zeros((in_pad, fc_out), jnp.float32).at[:in_size].set(fc_w.T)
    params['fc_w'] = fc_w_kn.astype(jnp.bfloat16)   # (in_pad, 30720)
    params['fc_b'] = fc_b
    return params, tuple(strides), in_size


# ---------------------------- main ----------------------------

if __name__ == "__main__":
    key = jax.random.PRNGKey(0)
    key, kx = jax.random.split(key)

    # Small ResNet config: Blocks=[1,1], Architecture=[[16,1],[32,1]]
    # (stride=1 so the residual add is shape-consistent, as the PyTorch code requires;
    #  second stage exercises the 1x1 projection `id` branch).
    blocks_reps = [1, 1]
    architecture = [[16, 1], [32, 1]]
    params, strides, in_size = build_resnet_params(key, blocks_reps, architecture)

    # Input is NCHW with 1 channel (init conv is Conv2d(1, 64, 7, 2, 3)).
    x = jax.random.normal(kx, (2, 1, 16, 16), jnp.float32)

    fwd = jax.jit(resnet_forward, static_argnums=2)
    out = fwd(x, params, strides)
    out = jax.block_until_ready(out)

    assert out.shape == (2, 30720), out.shape
    assert bool(jnp.all(jnp.isfinite(out)))
    print("KERNEL_OK")
</pallas_src>

<mosaic_0001>
module attributes {stable_mosaic.version = 11 : i64} {
  func.func @_mm_kernel(%arg0: i32, %arg1: i32, %arg2: i32, %arg3: memref<32x128xbf16, #tpu.memory_space<vmem>>, %arg4: memref<128x128xbf16, #tpu.memory_space<vmem>>, %arg5: memref<1x128xf32, #tpu.memory_space<vmem>>, %arg6: memref<1x128xf32, #tpu.memory_space<vmem>>, %arg7: memref<32x128xbf16, #tpu.memory_space<vmem>>, %arg8: memref<32x128xf32, #tpu.memory_space<vmem>>) attributes {dimension_semantics = [#tpu.dimension_semantics<parallel>, #tpu.dimension_semantics<parallel>, #tpu.dimension_semantics<arbitrary>], iteration_bounds = array<i64: 1, 1, 1>, scalar_prefetch = 0 : i64, scratch_operands = 1 : i64, tpu.core_type = #tpu.core_type<tc>, window_params = [{transform_indices = @transform_0, window_bounds = array<i64: 32, 128>}, {transform_indices = @transform_1, window_bounds = array<i64: 128, 128>}, {transform_indices = @transform_2, window_bounds = array<i64: 1, 128>}, {transform_indices = @transform_3, window_bounds = array<i64: 1, 128>}, {transform_indices = @transform_4, window_bounds = array<i64: 32, 128>}]} {
    %c0_i32 = arith.constant 0 : i32
    %0 = arith.cmpi eq, %arg2, %c0_i32 : i32
    %1 = arith.extui %0 : i1 to i32
    %c0_i32_0 = arith.constant 0 : i32
    %2 = arith.cmpi ne, %1, %c0_i32_0 : i32
    scf.if %2 {
      %cst_10 = arith.constant 0.000000e+00 : f32
      %12 = vector.broadcast %cst_10 : f32 to vector<32x128xf32>
      %c0_11 = arith.constant 0 : index
      %c0_12 = arith.constant 0 : index
      %13 = vector.load %arg8[%c0_11, %c0_12] : memref<32x128xf32, #tpu.memory_space<vmem>>, vector<32x128xf32>
      tpu.vector_store %arg8[%c0_11, %c0_12], %12 {strides = array<i32>} : memref<32x128xf32, #tpu.memory_space<vmem>>, vector<32x128xf32>,
    } else {
    }
    %c0 = arith.constant 0 : index
    %c0_1 = arith.constant 0 : index
    %3 = vector.load %arg8[%c0, %c0_1] : memref<32x128xf32, #tpu.memory_space<vmem>>, vector<32x128xf32>
    %c0_2 = arith.constant 0 : index
    %c0_3 = arith.constant 0 : index
    %4 = vector.load %arg3[%c0_2, %c0_3] : memref<32x128xbf16, #tpu.memory_space<vmem>>, vector<32x128xbf16>
    %c0_4 = arith.constant 0 : index
    %c0_5 = arith.constant 0 : index
    %5 = vector.load %arg4[%c0_4, %c0_5] : memref<128x128xbf16, #tpu.memory_space<vmem>>, vector<128x128xbf16>
    %cst = arith.constant dense<0.000000e+00> : vector<32x128xf32>
    %6 = tpu.matmul %4, %5, %cst {dimension_numbers = #tpu.dot_dimension_numbers<[1], [0], [0], [1], [0, 0, 1, 1], [], []>} : vector<32x128xbf16>, vector<128x128xbf16>, vector<32x128xf32> -> vector<32x128xf32>
    %7 = arith.addf %3, %6 : vector<32x128xf32>
    %c0_6 = arith.constant 0 : index
    %c0_7 = arith.constant 0 : index
    %8 = vector.load %arg8[%c0_6, %c0_7] : memref<32x128xf32, #tpu.memory_space<vmem>>, vector<32x128xf32>
    tpu.vector_store %arg8[%c0_6, %c0_7], %7 {strides = array<i32>} : memref<32x128xf32, #tpu.memory_space<vmem>>, vector<32x128xf32>,
    %c0_i32_8 = arith.constant 0 : i32
    %9 = arith.cmpi eq, %arg2, %c0_i32_8 : i32
    %10 = arith.extui %9 : i1 to i32
    %c0_i32_9 = arith.constant 0 : i32
    %11 = arith.cmpi ne, %10, %c0_i32_9 : i32
    scf.if %11 {
      %c0_10 = arith.constant 0 : index
      %c0_11 = arith.constant 0 : index
      %12 = vector.load %arg8[%c0_10, %c0_11] : memref<32x128xf32, #tpu.memory_space<vmem>>, vector<32x128xf32>
      %c0_12 = arith.constant 0 : index
      %c0_13 = arith.constant 0 : index
      %13 = vector.load %arg5[%c0_12, %c0_13] : memref<1x128xf32, #tpu.memory_space<vmem>>, vector<1x128xf32>
      %14 = vector.broadcast %13 : vector<1x128xf32> to vector<32x128xf32>
      %15 = arith.mulf %12, %14 : vector<32x128xf32>
      %c0_14 = arith.constant 0 : index
      %c0_15 = arith.constant 0 : index
      %16 = vector.load %arg6[%c0_14, %c0_15] : memref<1x128xf32, #tpu.memory_space<vmem>>, vector<1x128xf32>
      %17 = vector.broadcast %16 : vector<1x128xf32> to vector<32x128xf32>
      %18 = arith.addf %15, %17 : vector<32x128xf32>
      %cst_16 = arith.constant 0.000000e+00 : f32
      %19 = vector.broadcast %cst_16 : f32 to vector<32x128xf32>
      %20 = arith.maximumf %18, %19 : vector<32x128xf32>
      %21 = arith.truncf %20 : vector<32x128xf32> to vector<32x128xbf16>
      %c0_17 = arith.constant 0 : index
      %c0_18 = arith.constant 0 : index
      %22 = vector.load %arg7[%c0_17, %c0_18] : memref<32x128xbf16, #tpu.memory_space<vmem>>, vector<32x128xbf16>
      tpu.vector_store %arg7[%c0_17, %c0_18], %21 {strides = array<i32>} : memref<32x128xbf16, #tpu.memory_space<vmem>>, vector<32x128xbf16>,
    } else {
    }
    return
  }
  func.func @transform_0(%arg0: i32, %arg1: i32, %arg2: i32) -> (i32, i32) {
    %c0_i32 = arith.constant 0 : i32
    return %arg0, %arg2 : i32, i32
  }
  func.func @transform_1(%arg0: i32, %arg1: i32, %arg2: i32) -> (i32, i32) {
    %c0_i32 = arith.constant 0 : i32
    return %arg2, %arg1 : i32, i32
  }
  func.func @transform_2(%arg0: i32, %arg1: i32, %arg2: i32) -> (i32, i32) {
    %c0_i32 = arith.constant 0 : i32
    %c0_i32_0 = arith.constant 0 : i32
    return %c0_i32, %arg1 : i32, i32
  }
  func.func @transform_3(%arg0: i32, %arg1: i32, %arg2: i32) -> (i32, i32) {
    %c0_i32 = arith.constant 0 : i32
    %c0_i32_0 = arith.constant 0 : i32
    return %c0_i32, %arg1 : i32, i32
  }
  func.func @transform_4(%arg0: i32, %arg1: i32, %arg2: i32) -> (i32, i32) {
    %c0_i32 = arith.constant 0 : i32
    return %arg0, %arg1 : i32, i32
  }
}

module attributes {stable_mosaic.version = 11 : i64} {
  func.func @_mm_kernel(%arg0: i32, %arg1: i32, %arg2: i32, %arg3: memref<128x128xbf16, #tpu.memory_space<vmem>>, %arg4: memref<128x128xbf16, #tpu.memory_space<vmem>>, %arg5: memref<1x128xf32, #tpu.memory_space<vmem>>, %arg6: memref<1x128xf32, #tpu.memory_space<vmem>>, %arg7: memref<128x128xbf16, #tpu.memory_space<vmem>>, %arg8: memref<128x128xf32, #tpu.memory_space<vmem>>) attributes {dimension_semantics = [#tpu.dimension_semantics<parallel>, #tpu.dimension_semantics<parallel>, #tpu.dimension_semantics<arbitrary>], iteration_bounds = array<i64: 1, 1, 1>, scalar_prefetch = 0 : i64, scratch_operands = 1 : i64, tpu.core_type = #tpu.core_type<tc>, window_params = [{transform_indices = @transform_0, window_bounds = array<i64: 128, 128>}, {transform_indices = @transform_1, window_bounds = array<i64: 128, 128>}, {transform_indices = @transform_2, window_bounds = array<i64: 1, 128>}, {transform_indices = @transform_3, window_bounds = array<i64: 1, 128>}, {transform_indices = @transform_4, window_bounds = array<i64: 128, 128>}]} {
    %c0_i32 = arith.constant 0 : i32
    %0 = arith.cmpi eq, %arg2, %c0_i32 : i32
    %1 = arith.extui %0 : i1 to i32
    %c0_i32_0 = arith.constant 0 : i32
    %2 = arith.cmpi ne, %1, %c0_i32_0 : i32
    scf.if %2 {
      %cst_10 = arith.constant 0.000000e+00 : f32
      %12 = vector.broadcast %cst_10 : f32 to vector<128x128xf32>
      %c0_11 = arith.constant 0 : index
      %c0_12 = arith.constant 0 : index
      %13 = vector.load %arg8[%c0_11, %c0_12] : memref<128x128xf32, #tpu.memory_space<vmem>>, vector<128x128xf32>
      tpu.vector_store %arg8[%c0_11, %c0_12], %12 {strides = array<i32>} : memref<128x128xf32, #tpu.memory_space<vmem>>, vector<128x128xf32>,
    } else {
    }
    %c0 = arith.constant 0 : index
    %c0_1 = arith.constant 0 : index
    %3 = vector.load %arg8[%c0, %c0_1] : memref<128x128xf32, #tpu.memory_space<vmem>>, vector<128x128xf32>
    %c0_2 = arith.constant 0 : index
    %c0_3 = arith.constant 0 : index
    %4 = vector.load %arg3[%c0_2, %c0_3] : memref<128x128xbf16, #tpu.memory_space<vmem>>, vector<128x128xbf16>
    %c0_4 = arith.constant 0 : index
    %c0_5 = arith.constant 0 : index
    %5 = vector.load %arg4[%c0_4, %c0_5] : memref<128x128xbf16, #tpu.memory_space<vmem>>, vector<128x128xbf16>
    %cst = arith.constant dense<0.000000e+00> : vector<128x128xf32>
    %6 = tpu.matmul %4, %5, %cst {dimension_numbers = #tpu.dot_dimension_numbers<[1], [0], [0], [1], [0, 0, 1, 1], [], []>} : vector<128x128xbf16>, vector<128x128xbf16>, vector<128x128xf32> -> vector<128x128xf32>
    %7 = arith.addf %3, %6 : vector<128x128xf32>
    %c0_6 = arith.constant 0 : index
    %c0_7 = arith.constant 0 : index
    %8 = vector.load %arg8[%c0_6, %c0_7] : memref<128x128xf32, #tpu.memory_space<vmem>>, vector<128x128xf32>
    tpu.vector_store %arg8[%c0_6, %c0_7], %7 {strides = array<i32>} : memref<128x128xf32, #tpu.memory_space<vmem>>, vector<128x128xf32>,
    %c0_i32_8 = arith.constant 0 : i32
    %9 = arith.cmpi eq, %arg2, %c0_i32_8 : i32
    %10 = arith.extui %9 : i1 to i32
    %c0_i32_9 = arith.constant 0 : i32
    %11 = arith.cmpi ne, %10, %c0_i32_9 : i32
    scf.if %11 {
      %c0_10 = arith.constant 0 : index
      %c0_11 = arith.constant 0 : index
      %12 = vector.load %arg8[%c0_10, %c0_11] : memref<128x128xf32, #tpu.memory_space<vmem>>, vector<128x128xf32>
      %c0_12 = arith.constant 0 : index
      %c0_13 = arith.constant 0 : index
      %13 = vector.load %arg5[%c0_12, %c0_13] : memref<1x128xf32, #tpu.memory_space<vmem>>, vector<1x128xf32>
      %14 = vector.broadcast %13 : vector<1x128xf32> to vector<128x128xf32>
      %15 = arith.mulf %12, %14 : vector<128x128xf32>
      %c0_14 = arith.constant 0 : index
      %c0_15 = arith.constant 0 : index
      %16 = vector.load %arg6[%c0_14, %c0_15] : memref<1x128xf32, #tpu.memory_space<vmem>>, vector<1x128xf32>
      %17 = vector.broadcast %16 : vector<1x128xf32> to vector<128x128xf32>
      %18 = arith.addf %15, %17 : vector<128x128xf32>
      %cst_16 = arith.constant 0.000000e+00 : f32
      %19 = vector.broadcast %cst_16 : f32 to vector<128x128xf32>
      %20 = arith.maximumf %18, %19 : vector<128x128xf32>
      %21 = arith.truncf %20 : vector<128x128xf32> to vector<128x128xbf16>
      %c0_17 = arith.constant 0 : index
      %c0_18 = arith.constant 0 : index
      %22 = vector.load %arg7[%c0_17, %c0_18] : memref<128x128xbf16, #tpu.memory_space<vmem>>, vector<128x128xbf16>
      tpu.vector_store %arg7[%c0_17, %c0_18], %21 {strides = array<i32>} : memref<128x128xbf16, #tpu.memory_space<vmem>>, vector<128x128xbf16>,
    } else {
    }
    return
  }
  func.func @transform_0(%arg0: i32, %arg1: i32, %arg2: i32) -> (i32, i32) {
    %c0_i32 = arith.constant 0 : i32
    return %arg0, %arg2 : i32, i32
  }
  func.func @transform_1(%arg0: i32, %arg1: i32, %arg2: i32) -> (i32, i32) {
    %c0_i32 = arith.constant 0 : i32
    return %arg2, %arg1 : i32, i32
  }
  func.func @transform_2(%arg0: i32, %arg1: i32, %arg2: i32) -> (i32, i32) {
    %c0_i32 = arith.constant 0 : i32
    %c0_i32_0 = arith.constant 0 : i32
    return %c0_i32, %arg1 : i32, i32
  }
  func.func @transform_3(%arg0: i32, %arg1: i32, %arg2: i32) -> (i32, i32) {
    %c0_i32 = arith.constant 0 : i32
    %c0_i32_0 = arith.constant 0 : i32
    return %c0_i32, %arg1 : i32, i32
  }
  func.func @transform_4(%arg0: i32, %arg1: i32, %arg2: i32) -> (i32, i32) {
    %c0_i32 = arith.constant 0 : i32
    return %arg0, %arg1 : i32, i32
  }
}

module attributes {stable_mosaic.version = 11 : i64} {
  func.func @_conv3x3_kernel(%arg0: i32, %arg1: i32, %arg2: memref<1x224x384xbf16, #tpu.memory_space<vmem>>, %arg3: memref<3x384x128xbf16, #tpu.memory_space<vmem>>, %arg4: memref<1x128xf32, #tpu.memory_space<vmem>>, %arg5: memref<1x128xf32, #tpu.memory_space<vmem>>, %arg6: memref<192x128xbf16, #tpu.memory_space<vmem>>) attributes {dimension_semantics = [#tpu.dimension_semantics<parallel>, #tpu.dimension_semantics<parallel>], iteration_bounds = array<i64: 1, 1>, scalar_prefetch = 0 : i64, scratch_operands = 0 : i64, tpu.core_type = #tpu.core_type<tc>, window_params = [{transform_indices = @transform_0, window_bounds = array<i64: 1, 224, 384>}, {transform_indices = @transform_1, window_bounds = array<i64: 3, 384, 128>}, {transform_indices = @transform_2, window_bounds = array<i64: 1, 128>}, {transform_indices = @transform_3, window_bounds = array<i64: 1, 128>}, {transform_indices = @transform_4, window_bounds = array<i64: 192, 128>}]} {
    %c0 = arith.constant 0 : index
    %c0_0 = arith.constant 0 : index
    %c0_1 = arith.constant 0 : index
    %0 = vector.load %arg2[%c0, %c0_0, %c0_1] : memref<1x224x384xbf16, #tpu.memory_space<vmem>>, vector<1x192x384xbf16>
    %1 = vector.shape_cast %0 : vector<1x192x384xbf16> to vector<192x384xbf16>
    %c0_2 = arith.constant 0 : index
    %c0_3 = arith.constant 0 : index
    %c0_4 = arith.constant 0 : index
    %2 = vector.load %arg3[%c0_2, %c0_3, %c0_4] : memref<3x384x128xbf16, #tpu.memory_space<vmem>>, vector<1x384x128xbf16>
    %3 = vector.shape_cast %2 : vector<1x384x128xbf16> to vector<384x128xbf16>
    %cst = arith.constant dense<0.000000e+00> : vector<192x128xf32>
    %4 = tpu.matmul %1, %3, %cst {dimension_numbers = #tpu.dot_dimension_numbers<[1], [0], [0], [1], [0, 0, 1, 1], [], []>} : vector<192x384xbf16>, vector<384x128xbf16>, vector<192x128xf32> -> vector<192x128xf32>
    %c0_5 = arith.constant 0 : index
    %c16 = arith.constant 16 : index
    %c0_6 = arith.constant 0 : index
    %5 = vector.load %arg2[%c0_5, %c16, %c0_6] : memref<1x224x384xbf16, #tpu.memory_space<vmem>>, vector<1x192x384xbf16>
    %6 = vector.shape_cast %5 : vector<1x192x384xbf16> to vector<192x384xbf16>
    %c1 = arith.constant 1 : index
    %c0_7 = arith.constant 0 : index
    %c0_8 = arith.constant 0 : index
    %7 = vector.load %arg3[%c1, %c0_7, %c0_8] : memref<3x384x128xbf16, #tpu.memory_space<vmem>>, vector<1x384x128xbf16>
    %8 = vector.shape_cast %7 : vector<1x384x128xbf16> to vector<384x128xbf16>
    %cst_9 = arith.constant dense<0.000000e+00> : vector<192x128xf32>
    %9 = tpu.matmul %6, %8, %cst_9 {dimension_numbers = #tpu.dot_dimension_numbers<[1], [0], [0], [1], [0, 0, 1, 1], [], []>} : vector<192x384xbf16>, vector<384x128xbf16>, vector<192x128xf32> -> vector<192x128xf32>
    %10 = arith.addf %4, %9 : vector<192x128xf32>
    %c0_10 = arith.constant 0 : index
    %c32 = arith.constant 32 : index
    %c0_11 = arith.constant 0 : index
    %11 = vector.load %arg2[%c0_10, %c32, %c0_11] : memref<1x224x384xbf16, #tpu.memory_space<vmem>>, vector<1x192x384xbf16>
    %12 = vector.shape_cast %11 : vector<1x192x384xbf16> to vector<192x384xbf16>
    %c2 = arith.constant 2 : index
    %c0_12 = arith.constant 0 : index
    %c0_13 = arith.constant 0 : index
    %13 = vector.load %arg3[%c2, %c0_12, %c0_13] : memref<3x384x128xbf16, #tpu.memory_space<vmem>>, vector<1x384x128xbf16>
    %14 = vector.shape_cast %13 : vector<1x384x128xbf16> to vector<384x128xbf16>
    %cst_14 = arith.constant dense<0.000000e+00> : vector<192x128xf32>
    %15 = tpu.matmul %12, %14, %cst_14 {dimension_numbers = #tpu.dot_dimension_numbers<[1], [0], [0], [1], [0, 0, 1, 1], [], []>} : vector<192x384xbf16>, vector<384x128xbf16>, vector<192x128xf32> -> vector<192x128xf32>
    %16 = arith.addf %10, %15 : vector<192x128xf32>
    %c0_15 = arith.constant 0 : index
    %c0_16 = arith.constant 0 : index
    %17 = vector.load %arg4[%c0_15, %c0_16] : memref<1x128xf32, #tpu.memory_space<vmem>>, vector<1x128xf32>
    %18 = vector.broadcast %17 : vector<1x128xf32> to vector<192x128xf32>
    %19 = arith.mulf %16, %18 : vector<192x128xf32>
    %c0_17 = arith.constant 0 : index
    %c0_18 = arith.constant 0 : index
    %20 = vector.load %arg5[%c0_17, %c0_18] : memref<1x128xf32, #tpu.memory_space<vmem>>, vector<1x128xf32>
    %21 = vector.broadcast %20 : vector<1x128xf32> to vector<192x128xf32>
    %22 = arith.addf %19, %21 : vector<192x128xf32>
    %cst_19 = arith.constant 0.000000e+00 : f32
    %23 = vector.broadcast %cst_19 : f32 to vector<192x128xf32>
    %24 = arith.maximumf %22, %23 : vector<192x128xf32>
    %25 = arith.truncf %24 : vector<192x128xf32> to vector<192x128xbf16>
    %c0_20 = arith.constant 0 : index
    %c0_21 = arith.constant 0 : index
    %26 = vector.load %arg6[%c0_20, %c0_21] : memref<192x128xbf16, #tpu.memory_space<vmem>>, vector<192x128xbf16>
    tpu.vector_store %arg6[%c0_20, %c0_21], %25 {strides = array<i32>} : memref<192x128xbf16, #tpu.memory_space<vmem>>, vector<192x128xbf16>,
    return
  }
  func.func @transform_0(%arg0: i32, %arg1: i32) -> (i32, i32, i32) {
    %c0_i32 = arith.constant 0 : i32
    %c0_i32_0 = arith.constant 0 : i32
    %c0_i32_1 = arith.constant 0 : i32
    return %arg0, %c0_i32, %c0_i32_0 : i32, i32, i32
  }
  func.func @transform_1(%arg0: i32, %arg1: i32) -> (i32, i32, i32) {
    %c0_i32 = arith.constant 0 : i32
    %c0_i32_0 = arith.constant 0 : i32
    %c0_i32_1 = arith.constant 0 : i32
    return %c0_i32, %c0_i32_0, %arg1 : i32, i32, i32
  }
  func.func @transform_2(%arg0: i32, %arg1: i32) -> (i32, i32) {
    %c0_i32 = arith.constant 0 : i32
    %c0_i32_0 = arith.constant 0 : i32
    return %c0_i32, %arg1 : i32, i32
  }
  func.func @transform_3(%arg0: i32, %arg1: i32) -> (i32, i32) {
    %c0_i32 = arith.constant 0 : i32
    %c0_i32_0 = arith.constant 0 : i32
    return %c0_i32, %arg1 : i32, i32
  }
  func.func @transform_4(%arg0: i32, %arg1: i32) -> (i32, i32) {
    %c0_i32 = arith.constant 0 : i32
    return %arg0, %arg1 : i32, i32
  }
}

module attributes {stable_mosaic.version = 11 : i64} {
  func.func @_mm_kernel(%arg0: i32, %arg1: i32, %arg2: i32, %arg3: memref<32x128xbf16, #tpu.memory_space<vmem>>, %arg4: memref<128x128xbf16, #tpu.memory_space<vmem>>, %arg5: memref<1x128xf32, #tpu.memory_space<vmem>>, %arg6: memref<1x128xf32, #tpu.memory_space<vmem>>, %arg7: memref<32x128xbf16, #tpu.memory_space<vmem>>, %arg8: memref<32x128xf32, #tpu.memory_space<vmem>>) attributes {dimension_semantics = [#tpu.dimension_semantics<parallel>, #tpu.dimension_semantics<parallel>, #tpu.dimension_semantics<arbitrary>], iteration_bounds = array<i64: 1, 1, 1>, scalar_prefetch = 0 : i64, scratch_operands = 1 : i64, tpu.core_type = #tpu.core_type<tc>, window_params = [{transform_indices = @transform_0, window_bounds = array<i64: 32, 128>}, {transform_indices = @transform_1, window_bounds = array<i64: 128, 128>}, {transform_indices = @transform_2, window_bounds = array<i64: 1, 128>}, {transform_indices = @transform_3, window_bounds = array<i64: 1, 128>}, {transform_indices = @transform_4, window_bounds = array<i64: 32, 128>}]} {
    %c0_i32 = arith.constant 0 : i32
    %0 = arith.cmpi eq, %arg2, %c0_i32 : i32
    %1 = arith.extui %0 : i1 to i32
    %c0_i32_0 = arith.constant 0 : i32
    %2 = arith.cmpi ne, %1, %c0_i32_0 : i32
    scf.if %2 {
      %cst_10 = arith.constant 0.000000e+00 : f32
      %12 = vector.broadcast %cst_10 : f32 to vector<32x128xf32>
      %c0_11 = arith.constant 0 : index
      %c0_12 = arith.constant 0 : index
      %13 = vector.load %arg8[%c0_11, %c0_12] : memref<32x128xf32, #tpu.memory_space<vmem>>, vector<32x128xf32>
      tpu.vector_store %arg8[%c0_11, %c0_12], %12 {strides = array<i32>} : memref<32x128xf32, #tpu.memory_space<vmem>>, vector<32x128xf32>,
    } else {
    }
    %c0 = arith.constant 0 : index
    %c0_1 = arith.constant 0 : index
    %3 = vector.load %arg8[%c0, %c0_1] : memref<32x128xf32, #tpu.memory_space<vmem>>, vector<32x128xf32>
    %c0_2 = arith.constant 0 : index
    %c0_3 = arith.constant 0 : index
    %4 = vector.load %arg3[%c0_2, %c0_3] : memref<32x128xbf16, #tpu.memory_space<vmem>>, vector<32x128xbf16>
    %c0_4 = arith.constant 0 : index
    %c0_5 = arith.constant 0 : index
    %5 = vector.load %arg4[%c0_4, %c0_5] : memref<128x128xbf16, #tpu.memory_space<vmem>>, vector<128x128xbf16>
    %cst = arith.constant dense<0.000000e+00> : vector<32x128xf32>
    %6 = tpu.matmul %4, %5, %cst {dimension_numbers = #tpu.dot_dimension_numbers<[1], [0], [0], [1], [0, 0, 1, 1], [], []>} : vector<32x128xbf16>, vector<128x128xbf16>, vector<32x128xf32> -> vector<32x128xf32>
    %7 = arith.addf %3, %6 : vector<32x128xf32>
    %c0_6 = arith.constant 0 : index
    %c0_7 = arith.constant 0 : index
    %8 = vector.load %arg8[%c0_6, %c0_7] : memref<32x128xf32, #tpu.memory_space<vmem>>, vector<32x128xf32>
    tpu.vector_store %arg8[%c0_6, %c0_7], %7 {strides = array<i32>} : memref<32x128xf32, #tpu.memory_space<vmem>>, vector<32x128xf32>,
    %c0_i32_8 = arith.constant 0 : i32
    %9 = arith.cmpi eq, %arg2, %c0_i32_8 : i32
    %10 = arith.extui %9 : i1 to i32
    %c0_i32_9 = arith.constant 0 : i32
    %11 = arith.cmpi ne, %10, %c0_i32_9 : i32
    scf.if %11 {
      %c0_10 = arith.constant 0 : index
      %c0_11 = arith.constant 0 : index
      %12 = vector.load %arg8[%c0_10, %c0_11] : memref<32x128xf32, #tpu.memory_space<vmem>>, vector<32x128xf32>
      %c0_12 = arith.constant 0 : index
      %c0_13 = arith.constant 0 : index
      %13 = vector.load %arg5[%c0_12, %c0_13] : memref<1x128xf32, #tpu.memory_space<vmem>>, vector<1x128xf32>
      %14 = vector.broadcast %13 : vector<1x128xf32> to vector<32x128xf32>
      %15 = arith.mulf %12, %14 : vector<32x128xf32>
      %c0_14 = arith.constant 0 : index
      %c0_15 = arith.constant 0 : index
      %16 = vector.load %arg6[%c0_14, %c0_15] : memref<1x128xf32, #tpu.memory_space<vmem>>, vector<1x128xf32>
      %17 = vector.broadcast %16 : vector<1x128xf32> to vector<32x128xf32>
      %18 = arith.addf %15, %17 : vector<32x128xf32>
      %19 = arith.truncf %18 : vector<32x128xf32> to vector<32x128xbf16>
      %c0_16 = arith.constant 0 : index
      %c0_17 = arith.constant 0 : index
      %20 = vector.load %arg7[%c0_16, %c0_17] : memref<32x128xbf16, #tpu.memory_space<vmem>>, vector<32x128xbf16>
      tpu.vector_store %arg7[%c0_16, %c0_17], %19 {strides = array<i32>} : memref<32x128xbf16, #tpu.memory_space<vmem>>, vector<32x128xbf16>,
    } else {
    }
    return
  }
  func.func @transform_0(%arg0: i32, %arg1: i32, %arg2: i32) -> (i32, i32) {
    %c0_i32 = arith.constant 0 : i32
    return %arg0, %arg2 : i32, i32
  }
  func.func @transform_1(%arg0: i32, %arg1: i32, %arg2: i32) -> (i32, i32) {
    %c0_i32 = arith.constant 0 : i32
    return %arg2, %arg1 : i32, i32
  }
  func.func @transform_2(%arg0: i32, %arg1: i32, %arg2: i32) -> (i32, i32) {
    %c0_i32 = arith.constant 0 : i32
    %c0_i32_0 = arith.constant 0 : i32
    return %c0_i32, %arg1 : i32, i32
  }
  func.func @transform_3(%arg0: i32, %arg1: i32, %arg2: i32) -> (i32, i32) {
    %c0_i32 = arith.constant 0 : i32
    %c0_i32_0 = arith.constant 0 : i32
    return %c0_i32, %arg1 : i32, i32
  }
  func.func @transform_4(%arg0: i32, %arg1: i32, %arg2: i32) -> (i32, i32) {
    %c0_i32 = arith.constant 0 : i32
    return %arg0, %arg1 : i32, i32
  }
}

module attributes {stable_mosaic.version = 11 : i64} {
  func.func @_mm_kernel(%arg0: i32, %arg1: i32, %arg2: i32, %arg3: memref<32x128xbf16, #tpu.memory_space<vmem>>, %arg4: memref<128x128xbf16, #tpu.memory_space<vmem>>, %arg5: memref<1x128xf32, #tpu.memory_space<vmem>>, %arg6: memref<1x128xf32, #tpu.memory_space<vmem>>, %arg7: memref<32x128xbf16, #tpu.memory_space<vmem>>, %arg8: memref<32x128xbf16, #tpu.memory_space<vmem>>, %arg9: memref<32x128xf32, #tpu.memory_space<vmem>>) attributes {dimension_semantics = [#tpu.dimension_semantics<parallel>, #tpu.dimension_semantics<parallel>, #tpu.dimension_semantics<arbitrary>], iteration_bounds = array<i64: 1, 1, 1>, scalar_prefetch = 0 : i64, scratch_operands = 1 : i64, tpu.core_type = #tpu.core_type<tc>, window_params = [{transform_indices = @transform_0, window_bounds = array<i64: 32, 128>}, {transform_indices = @transform_1, window_bounds = array<i64: 128, 128>}, {transform_indices = @transform_2, window_bounds = array<i64: 1, 128>}, {transform_indices = @transform_3, window_bounds = array<i64: 1, 128>}, {transform_indices = @transform_4, window_bounds = array<i64: 32, 128>}, {transform_indices = @transform_5, window_bounds = array<i64: 32, 128>}]} {
    %c0_i32 = arith.constant 0 : i32
    %0 = arith.cmpi eq, %arg2, %c0_i32 : i32
    %1 = arith.extui %0 : i1 to i32
    %c0_i32_0 = arith.constant 0 : i32
    %2 = arith.cmpi ne, %1, %c0_i32_0 : i32
    scf.if %2 {
      %cst_10 = arith.constant 0.000000e+00 : f32
      %12 = vector.broadcast %cst_10 : f32 to vector<32x128xf32>
      %c0_11 = arith.constant 0 : index
      %c0_12 = arith.constant 0 : index
      %13 = vector.load %arg9[%c0_11, %c0_12] : memref<32x128xf32, #tpu.memory_space<vmem>>, vector<32x128xf32>
      tpu.vector_store %arg9[%c0_11, %c0_12], %12 {strides = array<i32>} : memref<32x128xf32, #tpu.memory_space<vmem>>, vector<32x128xf32>,
    } else {
    }
    %c0 = arith.constant 0 : index
    %c0_1 = arith.constant 0 : index
    %3 = vector.load %arg9[%c0, %c0_1] : memref<32x128xf32, #tpu.memory_space<vmem>>, vector<32x128xf32>
    %c0_2 = arith.constant 0 : index
    %c0_3 = arith.constant 0 : index
    %4 = vector.load %arg3[%c0_2, %c0_3] : memref<32x128xbf16, #tpu.memory_space<vmem>>, vector<32x128xbf16>
    %c0_4 = arith.constant 0 : index
    %c0_5 = arith.constant 0 : index
    %5 = vector.load %arg4[%c0_4, %c0_5] : memref<128x128xbf16, #tpu.memory_space<vmem>>, vector<128x128xbf16>
    %cst = arith.constant dense<0.000000e+00> : vector<32x128xf32>
    %6 = tpu.matmul %4, %5, %cst {dimension_numbers = #tpu.dot_dimension_numbers<[1], [0], [0], [1], [0, 0, 1, 1], [], []>} : vector<32x128xbf16>, vector<128x128xbf16>, vector<32x128xf32> -> vector<32x128xf32>
    %7 = arith.addf %3, %6 : vector<32x128xf32>
    %c0_6 = arith.constant 0 : index
    %c0_7 = arith.constant 0 : index
    %8 = vector.load %arg9[%c0_6, %c0_7] : memref<32x128xf32, #tpu.memory_space<vmem>>, vector<32x128xf32>
    tpu.vector_store %arg9[%c0_6, %c0_7], %7 {strides = array<i32>} : memref<32x128xf32, #tpu.memory_space<vmem>>, vector<32x128xf32>,
    %c0_i32_8 = arith.constant 0 : i32
    %9 = arith.cmpi eq, %arg2, %c0_i32_8 : i32
    %10 = arith.extui %9 : i1 to i32
    %c0_i32_9 = arith.constant 0 : i32
    %11 = arith.cmpi ne, %10, %c0_i32_9 : i32
    scf.if %11 {
      %c0_10 = arith.constant 0 : index
      %c0_11 = arith.constant 0 : index
      %12 = vector.load %arg9[%c0_10, %c0_11] : memref<32x128xf32, #tpu.memory_space<vmem>>, vector<32x128xf32>
      %c0_12 = arith.constant 0 : index
      %c0_13 = arith.constant 0 : index
      %13 = vector.load %arg5[%c0_12, %c0_13] : memref<1x128xf32, #tpu.memory_space<vmem>>, vector<1x128xf32>
      %14 = vector.broadcast %13 : vector<1x128xf32> to vector<32x128xf32>
      %15 = arith.mulf %12, %14 : vector<32x128xf32>
      %c0_14 = arith.constant 0 : index
      %c0_15 = arith.constant 0 : index
      %16 = vector.load %arg6[%c0_14, %c0_15] : memref<1x128xf32, #tpu.memory_space<vmem>>, vector<1x128xf32>
      %17 = vector.broadcast %16 : vector<1x128xf32> to vector<32x128xf32>
      %18 = arith.addf %15, %17 : vector<32x128xf32>
      %cst_16 = arith.constant 0.000000e+00 : f32
      %19 = vector.broadcast %cst_16 : f32 to vector<32x128xf32>
      %20 = arith.maximumf %18, %19 : vector<32x128xf32>
      %c0_17 = arith.constant 0 : index
      %c0_18 = arith.constant 0 : index
      %21 = vector.load %arg7[%c0_17, %c0_18] : memref<32x128xbf16, #tpu.memory_space<vmem>>, vector<32x128xbf16>
      %22 = arith.extf %21 : vector<32x128xbf16> to vector<32x128xf32>
      %23 = arith.addf %20, %22 : vector<32x128xf32>
      %cst_19 = arith.constant 0.000000e+00 : f32
      %24 = vector.broadcast %cst_19 : f32 to vector<32x128xf32>
      %25 = arith.maximumf %23, %24 : vector<32x128xf32>
      %26 = arith.truncf %25 : vector<32x128xf32> to vector<32x128xbf16>
      %c0_20 = arith.constant 0 : index
      %c0_21 = arith.constant 0 : index
      %27 = vector.load %arg8[%c0_20, %c0_21] : memref<32x128xbf16, #tpu.memory_space<vmem>>, vector<32x128xbf16>
      tpu.vector_store %arg8[%c0_20, %c0_21], %26 {strides = array<i32>} : memref<32x128xbf16, #tpu.memory_space<vmem>>, vector<32x128xbf16>,
    } else {
    }
    return
  }
  func.func @transform_0(%arg0: i32, %arg1: i32, %arg2: i32) -> (i32, i32) {
    %c0_i32 = arith.constant 0 : i32
    return %arg0, %arg2 : i32, i32
  }
  func.func @transform_1(%arg0: i32, %arg1: i32, %arg2: i32) -> (i32, i32) {
    %c0_i32 = arith.constant 0 : i32
    return %arg2, %arg1 : i32, i32
  }
  func.func @transform_2(%arg0: i32, %arg1: i32, %arg2: i32) -> (i32, i32) {
    %c0_i32 = arith.constant 0 : i32
    %c0_i32_0 = arith.constant 0 : i32
    return %c0_i32, %arg1 : i32, i32
  }
  func.func @transform_3(%arg0: i32, %arg1: i32, %arg2: i32) -> (i32, i32) {
    %c0_i32 = arith.constant 0 : i32
    %c0_i32_0 = arith.constant 0 : i32
    return %c0_i32, %arg1 : i32, i32
  }
  func.func @transform_4(%arg0: i32, %arg1: i32, %arg2: i32) -> (i32, i32) {
    %c0_i32 = arith.constant 0 : i32
    return %arg0, %arg1 : i32, i32
  }
  func.func @transform_5(%arg0: i32, %arg1: i32, %arg2: i32) -> (i32, i32) {
    %c0_i32 = arith.constant 0 : i32
    return %arg0, %arg1 : i32, i32
  }
}

module attributes {stable_mosaic.version = 11 : i64} {
  func.func @_avgpool_kernel(%arg0: i32, %arg1: memref<2x16x128xbf16, #tpu.memory_space<vmem>>, %arg2: memref<2x128xbf16, #tpu.memory_space<vmem>>) attributes {dimension_semantics = [#tpu.dimension_semantics<parallel>], iteration_bounds = array<i64: 1>, scalar_prefetch = 0 : i64, scratch_operands = 0 : i64, tpu.core_type = #tpu.core_type<tc>, window_params = [{transform_indices = @transform_0, window_bounds = array<i64: 2, 16, 128>}, {transform_indices = @transform_1, window_bounds = array<i64: 2, 128>}]} {
    %c0 = arith.constant 0 : index
    %c0_0 = arith.constant 0 : index
    %c0_1 = arith.constant 0 : index
    %0 = vector.load %arg1[%c0, %c0_0, %c0_1] : memref<2x16x128xbf16, #tpu.memory_space<vmem>>, vector<2x16x128xbf16>
    %1 = arith.extf %0 : vector<2x16x128xbf16> to vector<2x16x128xf32>
    %cst = arith.constant dense<0.000000e+00> : vector<2x128xf32>
    %2 = vector.multi_reduction <add>, %1, %cst [1] : vector<2x16x128xf32> to vector<2x128xf32>
    %cst_2 = arith.constant 1.600000e+01 : f32
    %3 = vector.broadcast %cst_2 : f32 to vector<2x128xf32>
    %4 = arith.divf %2, %3 : vector<2x128xf32>
    %5 = arith.truncf %4 : vector<2x128xf32> to vector<2x128xbf16>
    %c0_3 = arith.constant 0 : index
    %c0_4 = arith.constant 0 : index
    %6 = vector.load %arg2[%c0_3, %c0_4] : memref<2x128xbf16, #tpu.memory_space<vmem>>, vector<2x128xbf16>
    tpu.vector_store %arg2[%c0_3, %c0_4], %5 {strides = array<i32>} : memref<2x128xbf16, #tpu.memory_space<vmem>>, vector<2x128xbf16>,
    return
  }
  func.func @transform_0(%arg0: i32) -> (i32, i32, i32) {
    %c0_i32 = arith.constant 0 : i32
    %c0_i32_0 = arith.constant 0 : i32
    %c0_i32_1 = arith.constant 0 : i32
    return %c0_i32, %c0_i32_0, %arg0 : i32, i32, i32
  }
  func.func @transform_1(%arg0: i32) -> (i32, i32) {
    %c0_i32 = arith.constant 0 : i32
    %c0_i32_0 = arith.constant 0 : i32
    return %c0_i32, %arg0 : i32, i32
  }
}

module attributes {stable_mosaic.version = 11 : i64} {
  func.func @_mm_kernel(%arg0: i32, %arg1: i32, %arg2: i32, %arg3: memref<2x128xbf16, #tpu.memory_space<vmem>>, %arg4: memref<128x7680xbf16, #tpu.memory_space<vmem>>, %arg5: memref<1x7680xf32, #tpu.memory_space<vmem>>, %arg6: memref<2x7680xf32, #tpu.memory_space<vmem>>, %arg7: memref<2x7680xf32, #tpu.memory_space<vmem>>) attributes {dimension_semantics = [#tpu.dimension_semantics<parallel>, #tpu.dimension_semantics<parallel>, #tpu.dimension_semantics<arbitrary>], iteration_bounds = array<i64: 1, 4, 1>, scalar_prefetch = 0 : i64, scratch_operands = 1 : i64, tpu.core_type = #tpu.core_type<tc>, window_params = [{transform_indices = @transform_0, window_bounds = array<i64: 2, 128>}, {transform_indices = @transform_1, window_bounds = array<i64: 128, 7680>}, {transform_indices = @transform_2, window_bounds = array<i64: 1, 7680>}, {transform_indices = @transform_3, window_bounds = array<i64: 2, 7680>}]} {
    %c0_i32 = arith.constant 0 : i32
    %0 = arith.cmpi eq, %arg2, %c0_i32 : i32
    %1 = arith.extui %0 : i1 to i32
    %c0_i32_0 = arith.constant 0 : i32
    %2 = arith.cmpi ne, %1, %c0_i32_0 : i32
    scf.if %2 {
      %cst_10 = arith.constant 0.000000e+00 : f32
      %12 = vector.broadcast %cst_10 : f32 to vector<2x7680xf32>
      %c0_11 = arith.constant 0 : index
      %c0_12 = arith.constant 0 : index
      %13 = vector.load %arg7[%c0_11, %c0_12] : memref<2x7680xf32, #tpu.memory_space<vmem>>, vector<2x7680xf32>
      tpu.vector_store %arg7[%c0_11, %c0_12], %12 {strides = array<i32>} : memref<2x7680xf32, #tpu.memory_space<vmem>>, vector<2x7680xf32>,
    } else {
    }
    %c0 = arith.constant 0 : index
    %c0_1 = arith.constant 0 : index
    %3 = vector.load %arg7[%c0, %c0_1] : memref<2x7680xf32, #tpu.memory_space<vmem>>, vector<2x7680xf32>
    %c0_2 = arith.constant 0 : index
    %c0_3 = arith.constant 0 : index
    %4 = vector.load %arg3[%c0_2, %c0_3] : memref<2x128xbf16, #tpu.memory_space<vmem>>, vector<2x128xbf16>
    %c0_4 = arith.constant 0 : index
    %c0_5 = arith.constant 0 : index
    %5 = vector.load %arg4[%c0_4, %c0_5] : memref<128x7680xbf16, #tpu.memory_space<vmem>>, vector<128x7680xbf16>
    %cst = arith.constant dense<0.000000e+00> : vector<2x7680xf32>
    %6 = tpu.matmul %4, %5, %cst {dimension_numbers = #tpu.dot_dimension_numbers<[1], [0], [0], [1], [0, 0, 1, 1], [], []>} : vector<2x128xbf16>, vector<128x7680xbf16>, vector<2x7680xf32> -> vector<2x7680xf32>
    %7 = arith.addf %3, %6 : vector<2x7680xf32>
    %c0_6 = arith.constant 0 : index
    %c0_7 = arith.constant 0 : index
    %8 = vector.load %arg7[%c0_6, %c0_7] : memref<2x7680xf32, #tpu.memory_space<vmem>>, vector<2x7680xf32>
    tpu.vector_store %arg7[%c0_6, %c0_7], %7 {strides = array<i32>} : memref<2x7680xf32, #tpu.memory_space<vmem>>, vector<2x7680xf32>,
    %c0_i32_8 = arith.constant 0 : i32
    %9 = arith.cmpi eq, %arg2, %c0_i32_8 : i32
    %10 = arith.extui %9 : i1 to i32
    %c0_i32_9 = arith.constant 0 : i32
    %11 = arith.cmpi ne, %10, %c0_i32_9 : i32
    scf.if %11 {
      %c0_10 = arith.constant 0 : index
      %c0_11 = arith.constant 0 : index
      %12 = vector.load %arg7[%c0_10, %c0_11] : memref<2x7680xf32, #tpu.memory_space<vmem>>, vector<2x7680xf32>
      %c0_12 = arith.constant 0 : index
      %c0_13 = arith.constant 0 : index
      %13 = vector.load %arg5[%c0_12, %c0_13] : memref<1x7680xf32, #tpu.memory_space<vmem>>, vector<1x7680xf32>
      %14 = vector.broadcast %13 : vector<1x7680xf32> to vector<2x7680xf32>
      %15 = arith.addf %12, %14 : vector<2x7680xf32>
      %c0_14 = arith.constant 0 : index
      %c0_15 = arith.constant 0 : index
      %16 = vector.load %arg6[%c0_14, %c0_15] : memref<2x7680xf32, #tpu.memory_space<vmem>>, vector<2x7680xf32>
      tpu.vector_store %arg6[%c0_14, %c0_15], %15 {strides = array<i32>} : memref<2x7680xf32, #tpu.memory_space<vmem>>, vector<2x7680xf32>,
    } else {
    }
    return
  }
  func.func @transform_0(%arg0: i32, %arg1: i32, %arg2: i32) -> (i32, i32) {
    %c0_i32 = arith.constant 0 : i32
    return %arg0, %arg2 : i32, i32
  }
  func.func @transform_1(%arg0: i32, %arg1: i32, %arg2: i32) -> (i32, i32) {
    %c0_i32 = arith.constant 0 : i32
    return %arg2, %arg1 : i32, i32
  }
  func.func @transform_2(%arg0: i32, %arg1: i32, %arg2: i32) -> (i32, i32) {
    %c0_i32 = arith.constant 0 : i32
    %c0_i32_0 = arith.constant 0 : i32
    return %c0_i32, %arg1 : i32, i32
  }
  func.func @transform_3(%arg0: i32, %arg1: i32, %arg2: i32) -> (i32, i32) {
    %c0_i32 = arith.constant 0 : i32
    return %arg0, %arg1 : i32, i32
  }
}

</mosaic_0001>

<bundles_post_ra>
// kernel: resnet_forward.11
= control target key start
LH: loop header
LB: loop body
LE: loop exit
PB: predicated region body
PF: predicated region fallthrough
CT: control target
= control target key end

     0   :  { %9 = vsyncpa [#allocation4], 0  ;;  %s595_s0 = inlined_call_operand.hbm [shape: bf16[32,128], index: 0, kind: input, shape index: {}]   ;;  %s596_s1 = inlined_call_operand.hbm [shape: bf16[128,128], index: 1, kind: input, shape index: {}]   ;;  %s597_s2 = inlined_call_operand.hbm [shape: f32[1,128], index: 2, kind: input, shape index: {}]   ;;  %s598_s3 = inlined_call_operand.hbm [shape: f32[1,128], index: 3, kind: input, shape index: {}]   ;;  %s599_s4 = inlined_call_operand.hbm [shape: bf16[32,128], index: 4, kind: output, shape index: {}]  }
   0x1   :  { %10 = vsyncpa [#allocation7], 0 }
   0x2   :  { %11 = vsyncpa [#allocation10], 0 }
   0x3   :  { %12 = vsyncpa [#allocation5], 0  ;;  %s487_s15 = smov [#allocation6]   ;;  %s488_s17 = smov [#allocation3]  }
   0x4   :  { %s30_s16 = sshll.u32 %s487_s15, 4  ;;  %s18_s18 = sshll.u32 %s488_s17, 4  ;;  %s31_s16 = int_to_ptr.vmem [resolvable:$true] %s30_s16  ;;  %s519_s18 = int_to_ptr.vmem [resolvable:$true] %s18_s18 }
   0x5   :  { %s369_s21 = scalar_lea.hbm %s596_s1, 1024 }
   0x6   :  { %p370_p0 = scmp.ne.s32.totalorder %s596_s1, %s369_s21  ;;  %p373_p1 = scmp.lt.u32.totalorder %s369_s21, %s596_s1 }
   0x8   :  { %p375_p2 = pnand %p373_p1, %p370_p0 }
   0xa   :  { %378 = shalt.err (!%p375_p2)
}
   0xb   :  { %s379_s26 = scalar_lea.vmem %s31_s16, 1024  ;;  %p384_p4 = scmp.lt.s32.totalorder %s31_s16, %s31_s16 }
   0xc   :  { %p380_p3 = scmp.ne.s32.totalorder %s31_s16, %s379_s26  ;;  %p385_p5 = scmp.lt.s32.totalorder %s379_s26, %s379_s26 }
   0xe   :  { %p386_p6 = por %p385_p5, %p384_p4 }
  0x10   :  { %p387_p7 = pnand %p386_p6, %p380_p3 }
  0x12   :  { %390 = shalt.err (!%p387_p7)
}
  0x13   :  { %s489_s27 = smov 64   ;;  %s490_s28 = smov 4  }
  0x14   :  { %36 = dma.hbm_to_vmem [thread:$0]  %s596_s1, 1024, %s31_s16, [#allocation7], %s489_s27, %s489_s27, %s490_s28  }
  0x15   :  { %s391_s7 = scalar_lea.hbm %s595_s0, 256 }
  0x16   :  { %p392_p8 = scmp.ne.s32.totalorder %s595_s0, %s391_s7  ;;  %p395_p9 = scmp.lt.u32.totalorder %s391_s7, %s595_s0 }
  0x18   :  { %p397_p10 = pnand %p395_p9, %p392_p8 }
  0x1a   :  { %400 = shalt.err (!%p397_p10)
}
  0x1b   :  { %s401_s12 = scalar_lea.vmem %s519_s18, 256  ;;  %p406_p12 = scmp.lt.s32.totalorder %s519_s18, %s519_s18 }
  0x1c   :  { %p402_p11 = scmp.ne.s32.totalorder %s519_s18, %s401_s12  ;;  %p407_p13 = scmp.lt.s32.totalorder %s401_s12, %s401_s12 }
  0x1e   :  { %p408_p0 = por %p407_p13, %p406_p12 }
  0x20   :  { %p409_p1 = pnand %p408_p0, %p402_p11 }
  0x22   :  { %412 = shalt.err (!%p409_p1)
}
  0x23   :  { %24 = dma.hbm_to_vmem [thread:$0]  %s595_s0, 256, %s519_s18, [#allocation4], %s489_s27, %s489_s27, %s490_s28  }
  0x24   :  { %s491_s14 = smov [#allocation8]   ;;  %s492_s16 = smov [#allocation9]  }
  0x25   :  { %s43_s15 = sshll.u32 %s491_s14, 4  ;;  %s53_s17 = sshll.u32 %s492_s16, 4  ;;  %s44_s15 = int_to_ptr.vmem [resolvable:$true] %s43_s15  ;;  %s54_s17 = int_to_ptr.vmem [resolvable:$true] %s53_s17 }
  0x26   :  { %s413_s21 = scalar_lea.hbm %s597_s2, 16 }
  0x27   :  { %p414_p2 = scmp.ne.s32.totalorder %s597_s2, %s413_s21  ;;  %p417_p3 = scmp.lt.u32.totalorder %s413_s21, %s597_s2 }
  0x29   :  { %p419_p4 = pnand %p417_p3, %p414_p2 }
  0x2b   :  { %422 = shalt.err (!%p419_p4)
}
  0x2c   :  { %s423_s0 = scalar_lea.vmem %s44_s15, 16  ;;  %s427_s18 = scalar_lea.vmem %s44_s15, 32 }
  0x2d   :  { %p424_p5 = scmp.ne.s32.totalorder %s44_s15, %s423_s0  ;;  %p428_p6 = scmp.lt.s32.totalorder %s44_s15, %s44_s15 }
  0x2e   :  { %p429_p7 = scmp.lt.s32.totalorder %s427_s18, %s423_s0 }
  0x30   :  { %p430_p8 = por %p429_p7, %p428_p6 }
  0x32   :  { %p431_p9 = pnand %p430_p8, %p424_p5 }
  0x34   :  { %434 = shalt.err (!%p431_p9)
}
  0x35   :  { %46 = dma.hbm_to_vmem [thread:$0]  %s597_s2, 16, %s44_s15, [#allocation7]  }
  0x36   :  { %s435_s6 = scalar_lea.hbm %s598_s3, 16 }
  0x37   :  { %p436_p10 = scmp.ne.s32.totalorder %s598_s3, %s435_s6  ;;  %p439_p11 = scmp.lt.u32.totalorder %s435_s6, %s598_s3 }
  0x39   :  { %p441_p12 = pnand %p439_p11, %p436_p10 }
  0x3b   :  { %444 = shalt.err (!%p441_p12)
}
  0x3c   :  { %s445_s11 = scalar_lea.vmem %s54_s17, 16  ;;  %s449_s12 = scalar_lea.vmem %s54_s17, 32 }
  0x3d   :  { %p446_p13 = scmp.ne.s32.totalorder %s54_s17, %s445_s11  ;;  %p450_p0 = scmp.lt.s32.totalorder %s54_s17, %s54_s17 }
  0x3e   :  { %p451_p1 = scmp.lt.s32.totalorder %s449_s12, %s445_s11 }
  0x40   :  { %p452_p2 = por %p451_p1, %p450_p0 }
  0x42   :  { %p453_p3 = pnand %p452_p2, %p446_p13 }
  0x44   :  { %456 = shalt.err (!%p453_p3)
}
  0x45   :  { %56 = dma.hbm_to_vmem [thread:$0]  %s598_s3, 16, %s54_s17, [#allocation10]  }
  0x46   :  { %479 = dma.done.wait [#allocation4], 256  }
  0x47   :  { %480 = vsyncadd [#allocation4], 4294967040 }
  0x48   :  { %481 = dma.done.wait [#allocation7], 1040  }
  0x49   :  { %482 = vsyncadd [#allocation7], 4294966256 }
  0x4a   :  { %483 = dma.done.wait [#allocation10], 16  }
  0x4b   :  { %484 = vsyncadd [#allocation10], 4294967280  ;;  %v359_v0 = vld [vmem:[#allocation6] sm:$0xff]   ;;  %v360_v1 = vld [vmem:[#allocation6 + $0x8] sm:$0xff]   ;;  %s493_s3 = smov [#allocation11]  }
  0x4c   :  { %332 = vmatprep.subr.bf16.mxu0 %v359_v0  ;;  %v361_v2 = vld [vmem:[#allocation6 + $0x10] sm:$0xff]   ;;  %v362_v3 = vld [vmem:[#allocation6 + $0x18] sm:$0xff]   ;;  %v363_v5 = vld [vmem:[#allocation6 + $0x20] sm:$0xff]   ;;  %s277_s13 = sshll.u32 %s493_s3, 4  ;;  %s278_s13 = int_to_ptr.vmem [resolvable:$true] %s277_s13 }
  0x4d   :  { %333 = vmatpush3.bf16.msra.mxu0 %v359_v0  ;;  %v367_v4 = vld [vmem:[#allocation3] sm:$0xff]   ;;  %v364_v6 = vld [vmem:[#allocation6 + $0x28] sm:$0xff]   ;;  %v366_v8 = vld [vmem:[#allocation6 + $0x38] sm:$0xff]   ;;  %s457_s14 = scalar_lea.vmem %s278_s13, 256  ;;  %p462_p5 = scmp.lt.s32.totalorder %s278_s13, %s278_s13 }
  0x4e   :  { %334 = vmatprep.subr.bf16.mxu0 %v360_v1  ;;  %348 = vmatprep.mubr.bf16.mxu0 %v367_v4  ;;  %v365_v7 = vld [vmem:[#allocation6 + $0x30] sm:$0xff]   ;;  %v368_v9 = vld [vmem:[#allocation3 + $0x8] sm:$0xff]   ;;  %v301_v10 = vld [vmem:[#allocation8] ss:$0 sm:$0xff]  ;;  %p458_p4 = scmp.ne.s32.totalorder %s278_s13, %s457_s14  ;;  %p463_p6 = scmp.lt.s32.totalorder %s457_s14, %s457_s14 }
  0x4f   :  { %v302_v12 = vld [vmem:[#allocation9] ss:$0 sm:$0xff] }
  0x50   :  { %p464_p7 = por %p463_p6, %p462_p5 }
  0x51   :  { %335 = vmatpush3.bf16.msra.mxu0 %v360_v1 }
  0x52   :  { %336 = vmatprep.subr.bf16.mxu0 %v361_v2  ;;  %p465_p8 = pnand %p464_p7, %p458_p4 }
  0x55   :  { %337 = vmatpush3.bf16.msra.mxu0 %v361_v2 }
  0x56   :  { %338 = vmatprep.subr.bf16.mxu0 %v362_v3 }
  0x59   :  { %339 = vmatpush3.bf16.msra.mxu0 %v362_v3 }
  0x5a   :  { %340 = vmatprep.subr.bf16.mxu0 %v363_v5 }
  0x5d   :  { %341 = vmatpush3.bf16.msra.mxu0 %v363_v5 }
  0x5e   :  { %342 = vmatprep.subr.bf16.mxu0 %v364_v6 }
  0x61   :  { %343 = vmatpush3.bf16.msra.mxu0 %v364_v6 }
  0x62   :  { %344 = vmatprep.subr.bf16.mxu0 %v365_v7 }
  0x65   :  { %345 = vmatpush3.bf16.msra.mxu0 %v365_v7 }
  0x66   :  { %346 = vmatprep.subr.bf16.mxu0 %v366_v8 }
  0x69   :  { %347 = vmatpush3.bf16.msra.mxu0 %v366_v8 }
  0x6c   :  { %349 = vmatmul.mubr.bf16.vlgmr.msra.gmra.mrb[0].mxu0 %v368_v9 }
 0x13f   :  { %v350_v11 = vpop.f32.mrb[0].mxu0 }
 0x140   :  { %v235_v13 = vmul.f32 %v350_v11, %v301_v10  ;;  %v196_v14 = vpop.f32.mrb[1].mxu0 }
 0x141   :  { %v233_v15 = vmul.f32 %v301_v10, %v196_v14  ;;  %v351_v16 = vpop.f32.mrb[2].mxu0 }
 0x142   :  { %v246_v17 = vadd.f32 %v302_v12, %v235_v13  ;;  %v236_v18 = vmul.f32 %v351_v16, %v301_v10  ;;  %v199_v19 = vpop.f32.mrb[3].mxu0 }
 0x143   :  { %v244_v20 = vadd.f32 %v302_v12, %v233_v15  ;;  %v234_v21 = vmul.f32 %v301_v10, %v199_v19 }
 0x144   :  { %v247_v22 = vadd.f32 %v302_v12, %v236_v18  ;;  %v250_v24 = vmax.f32 %v246_v17, 0.0 }
 0x145   :  { %v245_v23 = vadd.f32 %v302_v12, %v234_v21  ;;  %v248_v26 = vmax.f32 %v244_v20, 0.0 }
 0x146   :  { %v251_v25 = vmax.f32 %v247_v22, 0.0 }
 0x147   :  { %v249_v27 = vmax.f32 %v245_v23, 0.0 }
 0x148   :  { %v319_v28 = vpack.c.bf16 %v251_v25, %v250_v24 }
 0x149   :  { %v314_v29 = vpack.c.bf16 %v249_v27, %v248_v26 }
 0x14a   :  { %321 = vst [vmem:[#allocation11 + $0x8] sm:$0xff] %v319_v28  }
 0x14b   :  { %315 = vst [vmem:[#allocation11] sm:$0xff] %v314_v29  }
 0x14c   :  { %468 = shalt.err (!%p465_p8)
}
 0x14d   :  { %s469_s17 = scalar_lea.hbm %s599_s4, 256 }
 0x14e   :  { %p470_p9 = scmp.ne.s32.totalorder %s599_s4, %s469_s17  ;;  %p473_p10 = scmp.lt.u32.totalorder %s469_s17, %s599_s4 }
 0x150   :  { %p475_p11 = pnand %p473_p10, %p470_p9 }
 0x152   :  { %478 = shalt.err (!%p475_p11)
}
 0x153   :  { %283 = dma.vmem_to_hbm [thread:$0]  %s278_s13, 256, %s599_s4, [#allocation5], %s489_s27, %s489_s27, %s490_s28  }
 0x154   :  { %485 = dma.done.wait [#allocation5], 256  }
 0x155   :  { %486 = vsyncadd [#allocation5], 4294967040 }
 0x156   :  { %287 = vsyncpa [#allocation4], 1 }
 0x157   :  { %288 = vsyncpa [#allocation7], 1 }
 0x158   :  { %289 = vsyncpa [#allocation10], 1 }
 0x159   :  { %290 = vsyncpa [#allocation5], 1 }

// kernel: resnet_forward.10
= control target key start
LH: loop header
LB: loop body
LE: loop exit
PB: predicated region body
PF: predicated region fallthrough
CT: control target
= control target key end

     0   :  { %9 = vsyncpa [#allocation4], 0  ;;  %s971_s0 = inlined_call_operand.hbm [shape: bf16[128,128], index: 0, kind: input, shape index: {}]   ;;  %s972_s1 = inlined_call_operand.hbm [shape: bf16[128,128], index: 1, kind: input, shape index: {}]   ;;  %s973_s2 = inlined_call_operand.hbm [shape: f32[1,128], index: 2, kind: input, shape index: {}]   ;;  %s974_s3 = inlined_call_operand.hbm [shape: f32[1,128], index: 3, kind: input, shape index: {}]   ;;  %s975_s4 = inlined_call_operand.hbm [shape: bf16[128,128], index: 4, kind: output, shape index: {}]  }
   0x1   :  { %10 = vsyncpa [#allocation7], 0 }
   0x2   :  { %11 = vsyncpa [#allocation10], 0 }
   0x3   :  { %12 = vsyncpa [#allocation5], 0  ;;  %s845_s15 = smov [#allocation6]   ;;  %s846_s17 = smov [#allocation3]  }
   0x4   :  { %s30_s16 = sshll.u32 %s845_s15, 4  ;;  %s18_s18 = sshll.u32 %s846_s17, 4  ;;  %s31_s16 = int_to_ptr.vmem [resolvable:$true] %s30_s16  ;;  %s877_s18 = int_to_ptr.vmem [resolvable:$true] %s18_s18 }
   0x5   :  { %s727_s21 = scalar_lea.hbm %s972_s1, 1024 }
   0x6   :  { %p728_p0 = scmp.ne.s32.totalorder %s972_s1, %s727_s21  ;;  %p731_p1 = scmp.lt.u32.totalorder %s727_s21, %s972_s1 }
   0x8   :  { %p733_p2 = pnand %p731_p1, %p728_p0 }
   0xa   :  { %736 = shalt.err (!%p733_p2)
}
   0xb   :  { %s737_s26 = scalar_lea.vmem %s31_s16, 1024  ;;  %p742_p4 = scmp.lt.s32.totalorder %s31_s16, %s31_s16 }
   0xc   :  { %p738_p3 = scmp.ne.s32.totalorder %s31_s16, %s737_s26  ;;  %p743_p5 = scmp.lt.s32.totalorder %s737_s26, %s737_s26 }
   0xe   :  { %p744_p6 = por %p743_p5, %p742_p4 }
  0x10   :  { %p745_p7 = pnand %p744_p6, %p738_p3 }
  0x12   :  { %748 = shalt.err (!%p745_p7)
}
  0x13   :  { %s847_s27 = smov 64   ;;  %s848_s28 = smov 4  }
  0x14   :  { %36 = dma.hbm_to_vmem [thread:$0]  %s972_s1, 1024, %s31_s16, [#allocation7], %s847_s27, %s847_s27, %s848_s28  }
  0x15   :  { %s749_s7 = scalar_lea.hbm %s971_s0, 1024 }
  0x16   :  { %p750_p8 = scmp.ne.s32.totalorder %s971_s0, %s749_s7  ;;  %p753_p9 = scmp.lt.u32.totalorder %s749_s7, %s971_s0 }
  0x18   :  { %p755_p10 = pnand %p753_p9, %p750_p8 }
  0x1a   :  { %758 = shalt.err (!%p755_p10)
}
  0x1b   :  { %s759_s12 = scalar_lea.vmem %s877_s18, 1024  ;;  %p764_p12 = scmp.lt.s32.totalorder %s877_s18, %s877_s18 }
  0x1c   :  { %p760_p11 = scmp.ne.s32.totalorder %s877_s18, %s759_s12  ;;  %p765_p13 = scmp.lt.s32.totalorder %s759_s12, %s759_s12 }
  0x1e   :  { %p766_p0 = por %p765_p13, %p764_p12 }
  0x20   :  { %p767_p1 = pnand %p766_p0, %p760_p11 }
  0x22   :  { %770 = shalt.err (!%p767_p1)
}
  0x23   :  { %24 = dma.hbm_to_vmem [thread:$0]  %s971_s0, 1024, %s877_s18, [#allocation4], %s847_s27, %s847_s27, %s848_s28  }
  0x24   :  { %s849_s14 = smov [#allocation8]   ;;  %s850_s16 = smov [#allocation9]  }
  0x25   :  { %s43_s15 = sshll.u32 %s849_s14, 4  ;;  %s53_s17 = sshll.u32 %s850_s16, 4  ;;  %s44_s15 = int_to_ptr.vmem [resolvable:$true] %s43_s15  ;;  %s54_s17 = int_to_ptr.vmem [resolvable:$true] %s53_s17 }
  0x26   :  { %s771_s21 = scalar_lea.hbm %s973_s2, 16 }
  0x27   :  { %p772_p2 = scmp.ne.s32.totalorder %s973_s2, %s771_s21  ;;  %p775_p3 = scmp.lt.u32.totalorder %s771_s21, %s973_s2 }
  0x29   :  { %p777_p4 = pnand %p775_p3, %p772_p2 }
  0x2b   :  { %780 = shalt.err (!%p777_p4)
}
  0x2c   :  { %s781_s0 = scalar_lea.vmem %s44_s15, 16  ;;  %s785_s18 = scalar_lea.vmem %s44_s15, 32 }
  0x2d   :  { %p782_p5 = scmp.ne.s32.totalorder %s44_s15, %s781_s0  ;;  %p786_p6 = scmp.lt.s32.totalorder %s44_s15, %s44_s15 }
  0x2e   :  { %p787_p7 = scmp.lt.s32.totalorder %s785_s18, %s781_s0 }
  0x30   :  { %p788_p8 = por %p787_p7, %p786_p6 }
  0x32   :  { %p789_p9 = pnand %p788_p8, %p782_p5 }
  0x34   :  { %792 = shalt.err (!%p789_p9)
}
  0x35   :  { %46 = dma.hbm_to_vmem [thread:$0]  %s973_s2, 16, %s44_s15, [#allocation7]  }
  0x36   :  { %s793_s6 = scalar_lea.hbm %s974_s3, 16 }
  0x37   :  { %p794_p10 = scmp.ne.s32.totalorder %s974_s3, %s793_s6  ;;  %p797_p11 = scmp.lt.u32.totalorder %s793_s6, %s974_s3 }
  0x39   :  { %p799_p12 = pnand %p797_p11, %p794_p10 }
  0x3b   :  { %802 = shalt.err (!%p799_p12)
}
  0x3c   :  { %s803_s11 = scalar_lea.vmem %s54_s17, 16  ;;  %s807_s12 = scalar_lea.vmem %s54_s17, 32 }
  0x3d   :  { %p804_p13 = scmp.ne.s32.totalorder %s54_s17, %s803_s11  ;;  %p808_p0 = scmp.lt.s32.totalorder %s54_s17, %s54_s17 }
  0x3e   :  { %p809_p1 = scmp.lt.s32.totalorder %s807_s12, %s803_s11 }
  0x40   :  { %p810_p2 = por %p809_p1, %p808_p0 }
  0x42   :  { %p811_p3 = pnand %p810_p2, %p804_p13 }
  0x44   :  { %814 = shalt.err (!%p811_p3)
}
  0x45   :  { %56 = dma.hbm_to_vmem [thread:$0]  %s974_s3, 16, %s54_s17, [#allocation10]  }
  0x46   :  { %837 = dma.done.wait [#allocation4], 1024  }
  0x47   :  { %838 = vsyncadd [#allocation4], 4294966272 }
  0x48   :  { %839 = dma.done.wait [#allocation7], 1040  }
  0x49   :  { %840 = vsyncadd [#allocation7], 4294966256 }
  0x4a   :  { %841 = dma.done.wait [#allocation10], 16  }
  0x4b   :  { %842 = vsyncadd [#allocation10], 4294967280  ;;  %v711_v0 = vld [vmem:[#allocation6] sm:$0xff]   ;;  %v712_v1 = vld [vmem:[#allocation6 + $0x8] sm:$0xff]   ;;  %s851_s3 = smov [#allocation11]  }
  0x4c   :  { %656 = vmatprep.subr.bf16.mxu0 %v711_v0  ;;  %688 = vmatprep.subr.bf16.mxu1 %v711_v0  ;;  %v713_v2 = vld [vmem:[#allocation6 + $0x10] sm:$0xff]   ;;  %v714_v3 = vld [vmem:[#allocation6 + $0x18] sm:$0xff]   ;;  %v719_v4 = vld [vmem:[#allocation3] sm:$0xff]   ;;  %s529_s13 = sshll.u32 %s851_s3, 4  ;;  %s530_s13 = int_to_ptr.vmem [resolvable:$true] %s529_s13 }
  0x4d   :  { %657 = vmatpush3.bf16.msra.mxu0 %v711_v0  ;;  %696 = vmatpush3.bf16.msra.mxu1 %v711_v0  ;;  %v720_v5 = vld [vmem:[#allocation3 + $0x20] sm:$0xff]   ;;  %v716_v7 = vld [vmem:[#allocation6 + $0x28] sm:$0xff]   ;;  %v717_v8 = vld [vmem:[#allocation6 + $0x30] sm:$0xff]   ;;  %s815_s14 = scalar_lea.vmem %s530_s13, 1024  ;;  %p820_p5 = scmp.lt.s32.totalorder %s530_s13, %s530_s13 }
  0x4e   :  { %658 = vmatprep.subr.bf16.mxu0 %v712_v1  ;;  %689 = vmatprep.subr.bf16.mxu1 %v712_v1  ;;  %v715_v6 = vld [vmem:[#allocation6 + $0x20] sm:$0xff]   ;;  %v718_v9 = vld [vmem:[#allocation6 + $0x38] sm:$0xff]   ;;  %v721_v10 = vld [vmem:[#allocation3 + $0x8] sm:$0xff]   ;;  %p816_p4 = scmp.ne.s32.totalorder %s530_s13, %s815_s14  ;;  %p821_p6 = scmp.lt.s32.totalorder %s815_s14, %s815_s14 }
  0x4f   :  { %672 = vmatprep.mubr.bf16.mxu0 %v719_v4  ;;  %680 = vmatprep.mubr.bf16.mxu1 %v720_v5  ;;  %v722_v11 = vld [vmem:[#allocation3 + $0x28] sm:$0xff]   ;;  %v723_v12 = vld [vmem:[#allocation3 + $0x10] sm:$0xff]   ;;  %v725_v14 = vld [vmem:[#allocation3 + $0x18] sm:$0xff]  }
  0x50   :  { %v724_v13 = vld [vmem:[#allocation3 + $0x30] sm:$0xff]   ;;  %v726_v15 = vld [vmem:[#allocation3 + $0x38] sm:$0xff]   ;;  %v559_v16 = vld [vmem:[#allocation8] ss:$0 sm:$0xff]  ;;  %p822_p7 = por %p821_p6, %p820_p5 }
  0x51   :  { %659 = vmatpush3.bf16.msra.mxu0 %v712_v1  ;;  %697 = vmatpush3.bf16.msra.mxu1 %v712_v1  ;;  %v938_v18 = vld [vmem:[#allocation9] ss:$0 sm:$0xff] }
  0x52   :  { %660 = vmatprep.subr.bf16.mxu0 %v713_v2  ;;  %690 = vmatprep.subr.bf16.mxu1 %v713_v2  ;;  %p823_p8 = pnand %p822_p7, %p816_p4 }
  0x55   :  { %661 = vmatpush3.bf16.msra.mxu0 %v713_v2  ;;  %698 = vmatpush3.bf16.msra.mxu1 %v713_v2 }
  0x56   :  { %662 = vmatprep.subr.bf16.mxu0 %v714_v3  ;;  %691 = vmatprep.subr.bf16.mxu1 %v714_v3 }
  0x59   :  { %663 = vmatpush3.bf16.msra.mxu0 %v714_v3  ;;  %699 = vmatpush3.bf16.msra.mxu1 %v714_v3 }
  0x5a   :  { %664 = vmatprep.subr.bf16.mxu0 %v715_v6  ;;  %692 = vmatprep.subr.bf16.mxu1 %v715_v6 }
  0x5d   :  { %665 = vmatpush3.bf16.msra.mxu0 %v715_v6  ;;  %700 = vmatpush3.bf16.msra.mxu1 %v715_v6 }
  0x5e   :  { %666 = vmatprep.subr.bf16.mxu0 %v716_v7  ;;  %693 = vmatprep.subr.bf16.mxu1 %v716_v7 }
  0x61   :  { %667 = vmatpush3.bf16.msra.mxu0 %v716_v7  ;;  %701 = vmatpush3.bf16.msra.mxu1 %v716_v7 }
  0x62   :  { %668 = vmatprep.subr.bf16.mxu0 %v717_v8  ;;  %694 = vmatprep.subr.bf16.mxu1 %v717_v8 }
  0x65   :  { %669 = vmatpush3.bf16.msra.mxu0 %v717_v8  ;;  %702 = vmatpush3.bf16.msra.mxu1 %v717_v8 }
  0x66   :  { %670 = vmatprep.subr.bf16.mxu0 %v718_v9  ;;  %695 = vmatprep.subr.bf16.mxu1 %v718_v9 }
  0x69   :  { %671 = vmatpush3.bf16.msra.mxu0 %v718_v9  ;;  %703 = vmatpush3.bf16.msra.mxu1 %v718_v9 }
  0x6c   :  { %673 = vmatmul.mubr.bf16.vlgmr.msra.gmra.mrb[0].mxu0 %v721_v10  ;;  %681 = vmatmul.mubr.bf16.vlgmr.msra.gmra.mrb[0].mxu1 %v722_v11 }
  0x6d   :  { %676 = vmatprep.mubr.bf16.mxu0 %v723_v12  ;;  %684 = vmatprep.mubr.bf16.mxu1 %v724_v13 }
  0x74   :  { %677 = vmatmul.mubr.bf16.gmra.mrb[4].mxu0 %v725_v14  ;;  %685 = vmatmul.mubr.bf16.gmra.mrb[4].mxu1 %v726_v15 }
 0x13f   :  { %v674_v17 = vpop.f32.mrb[0].mxu0  ;;  %v682_v19 = vpop.f32.mrb[0].mxu1 }
 0x140   :  { %v391_v20 = vmul.f32 %v674_v17, %v559_v16  ;;  %v399_v21 = vmul.f32 %v682_v19, %v559_v16  ;;  %v268_v22 = vpop.f32.mrb[1].mxu0  ;;  %v300_v23 = vpop.f32.mrb[1].mxu1 }
 0x141   :  { %v389_v24 = vmul.f32 %v559_v16, %v268_v22  ;;  %v397_v25 = vmul.f32 %v559_v16, %v300_v23  ;;  %v675_v26 = vpop.f32.mrb[2].mxu0  ;;  %v683_v27 = vpop.f32.mrb[2].mxu1 }
 0x142   :  { %v414_v28 = vadd.f32 %v938_v18, %v391_v20  ;;  %v422_v29 = vadd.f32 %v938_v18, %v399_v21  ;;  %v392_v30 = vmul.f32 %v675_v26, %v559_v16  ;;  %v400_v31 = vmul.f32 %v683_v27, %v559_v16  ;;  %v271_v32 = vpop.f32.mrb[3].mxu0  ;;  %v303_v33 = vpop.f32.mrb[3].mxu1 }
 0x143   :  { %v412_v34 = vadd.f32 %v938_v18, %v389_v24  ;;  %v420_v35 = vadd.f32 %v938_v18, %v397_v25  ;;  %v390_v36 = vmul.f32 %v559_v16, %v271_v32  ;;  %v398_v37 = vmul.f32 %v559_v16, %v303_v33 }
 0x144   :  { %v415_v38 = vadd.f32 %v938_v18, %v392_v30  ;;  %v423_v39 = vadd.f32 %v938_v18, %v400_v31  ;;  %v430_v42 = vmax.f32 %v414_v28, 0.0  ;;  %v438_v43 = vmax.f32 %v422_v29, 0.0 }
 0x145   :  { %v413_v40 = vadd.f32 %v938_v18, %v390_v36  ;;  %v421_v41 = vadd.f32 %v938_v18, %v398_v37  ;;  %v428_v46 = vmax.f32 %v412_v34, 0.0  ;;  %v436_v47 = vmax.f32 %v420_v35, 0.0 }
 0x146   :  { %v431_v44 = vmax.f32 %v415_v38, 0.0  ;;  %v439_v45 = vmax.f32 %v423_v39, 0.0 }
 0x147   :  { %v429_v48 = vmax.f32 %v413_v40, 0.0  ;;  %v437_v49 = vmax.f32 %v421_v41, 0.0  ;;  %v678_v50 = vpop.f32.mrb[4].mxu0  ;;  %v686_v51 = vpop.f32.mrb[4].mxu1 }
 0x148   :  { %v601_v52 = vpack.c.bf16 %v431_v44, %v430_v42  ;;  %v621_v53 = vpack.c.bf16 %v439_v45, %v438_v43  ;;  %v395_v54 = vmul.f32 %v678_v50, %v559_v16  ;;  %v403_v55 = vmul.f32 %v686_v51, %v559_v16  ;;  %v284_v56 = vpop.f32.mrb[5].mxu0  ;;  %v316_v57 = vpop.f32.mrb[5].mxu1 }
 0x149   :  { %v596_v58 = vpack.c.bf16 %v429_v48, %v428_v46  ;;  %v616_v59 = vpack.c.bf16 %v437_v49, %v436_v47  ;;  %v393_v60 = vmul.f32 %v559_v16, %v284_v56  ;;  %v401_v61 = vmul.f32 %v559_v16, %v316_v57  ;;  %v679_v62 = vpop.f32.mrb[6].mxu0  ;;  %v687_v63 = vpop.f32.mrb[6].mxu1 }
 0x14a   :  { %633 = vst [vmem:[#allocation11 + $0x8] sm:$0xff] %v601_v52   ;;  %637 = vst [vmem:[#allocation11 + $0x28] sm:$0xff] %v621_v53   ;;  %v418_v0 = vadd.f32 %v938_v18, %v395_v54  ;;  %v426_v1 = vadd.f32 %v938_v18, %v403_v55  ;;  %v396_v2 = vmul.f32 %v679_v62, %v559_v16  ;;  %v287_v4 = vpop.f32.mrb[7].mxu0  ;;  %v319_v5 = vpop.f32.mrb[7].mxu1 }
 0x14b   :  { %v404_v3 = vmul.f32 %v687_v63, %v559_v16  ;;  %597 = vst [vmem:[#allocation11] sm:$0xff] %v596_v58   ;;  %636 = vst [vmem:[#allocation11 + $0x20] sm:$0xff] %v616_v59   ;;  %v416_v6 = vadd.f32 %v938_v18, %v393_v60  ;;  %v424_v7 = vadd.f32 %v938_v18, %v401_v61 }
 0x14c   :  { %v394_v8 = vmul.f32 %v559_v16, %v287_v4  ;;  %v402_v9 = vmul.f32 %v559_v16, %v319_v5  ;;  %v419_v10 = vadd.f32 %v938_v18, %v396_v2  ;;  %v434_v14 = vmax.f32 %v418_v0, 0.0 }
 0x14d   :  { %v427_v11 = vadd.f32 %v938_v18, %v404_v3  ;;  %v442_v15 = vmax.f32 %v426_v1, 0.0  ;;  %v432_v20 = vmax.f32 %v416_v6, 0.0  ;;  %v440_v21 = vmax.f32 %v424_v7, 0.0 }
 0x14e   :  { %v417_v12 = vadd.f32 %v938_v18, %v394_v8  ;;  %v425_v13 = vadd.f32 %v938_v18, %v402_v9  ;;  %v435_v17 = vmax.f32 %v419_v10, 0.0 }
 0x14f   :  { %v443_v19 = vmax.f32 %v427_v11, 0.0 }
 0x150   :  { %v433_v22 = vmax.f32 %v417_v12, 0.0  ;;  %v441_v23 = vmax.f32 %v425_v13, 0.0  ;;  %v611_v24 = vpack.c.bf16 %v435_v17, %v434_v14 }
 0x151   :  { %v631_v16 = vpack.c.bf16 %v443_v19, %v442_v15 }
 0x152   :  { %v606_v25 = vpack.c.bf16 %v433_v22, %v432_v20  ;;  %v626_v26 = vpack.c.bf16 %v441_v23, %v440_v21  ;;  %635 = vst [vmem:[#allocation11 + $0x18] sm:$0xff] %v611_v24  }
 0x153   :  { %639 = vst [vmem:[#allocation11 + $0x38] sm:$0xff] %v631_v16  }
 0x154   :  { %634 = vst [vmem:[#allocation11 + $0x10] sm:$0xff] %v606_v25   ;;  %638 = vst [vmem:[#allocation11 + $0x30] sm:$0xff] %v626_v26  }
 0x155   :  { %826 = shalt.err (!%p823_p8)
}
 0x156   :  { %s827_s17 = scalar_lea.hbm %s975_s4, 1024 }
 0x157   :  { %p828_p9 = scmp.ne.s32.totalorder %s975_s4, %s827_s17  ;;  %p831_p10 = scmp.lt.u32.totalorder %s827_s17, %s975_s4 }
 0x159   :  { %p833_p11 = pnand %p831_p10, %p828_p9 }
 0x15b   :  { %836 = shalt.err (!%p833_p11)
}
 0x15c   :  { %535 = dma.vmem_to_hbm [thread:$0]  %s530_s13, 1024, %s975_s4, [#allocation5], %s847_s27, %s847_s27, %s848_s28  }
 0x15d   :  { %843 = dma.done.wait [#allocation5], 1024  }
 0x15e   :  { %844 = vsyncadd [#allocation5], 4294966272 }
 0x15f   :  { %539 = vsyncpa [#allocation4], 1 }
 0x160   :  { %540 = vsyncpa [#allocation7], 1 }
 0x161   :  { %541 = vsyncpa [#allocation10], 1 }
 0x162   :  { %542 = vsyncpa [#allocation5], 1 }

// kernel: resnet_forward.16
= control target key start
LH: loop header
LB: loop body
LE: loop exit
PB: predicated region body
PF: predicated region fallthrough
CT: control target
= control target key end

     0   :  { %9 = vsyncpa [#allocation4], 0  ;;  %s591_s0 = inlined_call_operand.hbm [shape: bf16[32,128], index: 0, kind: input, shape index: {}]   ;;  %s592_s1 = inlined_call_operand.hbm [shape: bf16[128,128], index: 1, kind: input, shape index: {}]   ;;  %s593_s2 = inlined_call_operand.hbm [shape: f32[1,128], index: 2, kind: input, shape index: {}]   ;;  %s594_s3 = inlined_call_operand.hbm [shape: f32[1,128], index: 3, kind: input, shape index: {}]   ;;  %s595_s4 = inlined_call_operand.hbm [shape: bf16[32,128], index: 4, kind: output, shape index: {}]  }
   0x1   :  { %10 = vsyncpa [#allocation7], 0 }
   0x2   :  { %11 = vsyncpa [#allocation10], 0 }
   0x3   :  { %12 = vsyncpa [#allocation5], 0  ;;  %s483_s15 = smov [#allocation6]   ;;  %s484_s17 = smov [#allocation3]  }
   0x4   :  { %s30_s16 = sshll.u32 %s483_s15, 4  ;;  %s18_s18 = sshll.u32 %s484_s17, 4  ;;  %s31_s16 = int_to_ptr.vmem [resolvable:$true] %s30_s16  ;;  %s515_s18 = int_to_ptr.vmem [resolvable:$true] %s18_s18 }
   0x5   :  { %s365_s21 = scalar_lea.hbm %s592_s1, 1024 }
   0x6   :  { %p366_p0 = scmp.ne.s32.totalorder %s592_s1, %s365_s21  ;;  %p369_p1 = scmp.lt.u32.totalorder %s365_s21, %s592_s1 }
   0x8   :  { %p371_p2 = pnand %p369_p1, %p366_p0 }
   0xa   :  { %374 = shalt.err (!%p371_p2)
}
   0xb   :  { %s375_s26 = scalar_lea.vmem %s31_s16, 1024  ;;  %p380_p4 = scmp.lt.s32.totalorder %s31_s16, %s31_s16 }
   0xc   :  { %p376_p3 = scmp.ne.s32.totalorder %s31_s16, %s375_s26  ;;  %p381_p5 = scmp.lt.s32.totalorder %s375_s26, %s375_s26 }
   0xe   :  { %p382_p6 = por %p381_p5, %p380_p4 }
  0x10   :  { %p383_p7 = pnand %p382_p6, %p376_p3 }
  0x12   :  { %386 = shalt.err (!%p383_p7)
}
  0x13   :  { %s485_s27 = smov 64   ;;  %s486_s28 = smov 4  }
  0x14   :  { %36 = dma.hbm_to_vmem [thread:$0]  %s592_s1, 1024, %s31_s16, [#allocation7], %s485_s27, %s485_s27, %s486_s28  }
  0x15   :  { %s387_s7 = scalar_lea.hbm %s591_s0, 256 }
  0x16   :  { %p388_p8 = scmp.ne.s32.totalorder %s591_s0, %s387_s7  ;;  %p391_p9 = scmp.lt.u32.totalorder %s387_s7, %s591_s0 }
  0x18   :  { %p393_p10 = pnand %p391_p9, %p388_p8 }
  0x1a   :  { %396 = shalt.err (!%p393_p10)
}
  0x1b   :  { %s397_s12 = scalar_lea.vmem %s515_s18, 256  ;;  %p402_p12 = scmp.lt.s32.totalorder %s515_s18, %s515_s18 }
  0x1c   :  { %p398_p11 = scmp.ne.s32.totalorder %s515_s18, %s397_s12  ;;  %p403_p13 = scmp.lt.s32.totalorder %s397_s12, %s397_s12 }
  0x1e   :  { %p404_p0 = por %p403_p13, %p402_p12 }
  0x20   :  { %p405_p1 = pnand %p404_p0, %p398_p11 }
  0x22   :  { %408 = shalt.err (!%p405_p1)
}
  0x23   :  { %24 = dma.hbm_to_vmem [thread:$0]  %s591_s0, 256, %s515_s18, [#allocation4], %s485_s27, %s485_s27, %s486_s28  }
  0x24   :  { %s487_s14 = smov [#allocation8]   ;;  %s488_s16 = smov [#allocation9]  }
  0x25   :  { %s43_s15 = sshll.u32 %s487_s14, 4  ;;  %s53_s17 = sshll.u32 %s488_s16, 4  ;;  %s44_s15 = int_to_ptr.vmem [resolvable:$true] %s43_s15  ;;  %s54_s17 = int_to_ptr.vmem [resolvable:$true] %s53_s17 }
  0x26   :  { %s409_s21 = scalar_lea.hbm %s593_s2, 16 }
  0x27   :  { %p410_p2 = scmp.ne.s32.totalorder %s593_s2, %s409_s21  ;;  %p413_p3 = scmp.lt.u32.totalorder %s409_s21, %s593_s2 }
  0x29   :  { %p415_p4 = pnand %p413_p3, %p410_p2 }
  0x2b   :  { %418 = shalt.err (!%p415_p4)
}
  0x2c   :  { %s419_s0 = scalar_lea.vmem %s44_s15, 16  ;;  %s423_s18 = scalar_lea.vmem %s44_s15, 32 }
  0x2d   :  { %p420_p5 = scmp.ne.s32.totalorder %s44_s15, %s419_s0  ;;  %p424_p6 = scmp.lt.s32.totalorder %s44_s15, %s44_s15 }
  0x2e   :  { %p425_p7 = scmp.lt.s32.totalorder %s423_s18, %s419_s0 }
  0x30   :  { %p426_p8 = por %p425_p7, %p424_p6 }
  0x32   :  { %p427_p9 = pnand %p426_p8, %p420_p5 }
  0x34   :  { %430 = shalt.err (!%p427_p9)
}
  0x35   :  { %46 = dma.hbm_to_vmem [thread:$0]  %s593_s2, 16, %s44_s15, [#allocation7]  }
  0x36   :  { %s431_s6 = scalar_lea.hbm %s594_s3, 16 }
  0x37   :  { %p432_p10 = scmp.ne.s32.totalorder %s594_s3, %s431_s6  ;;  %p435_p11 = scmp.lt.u32.totalorder %s431_s6, %s594_s3 }
  0x39   :  { %p437_p12 = pnand %p435_p11, %p432_p10 }
  0x3b   :  { %440 = shalt.err (!%p437_p12)
}
  0x3c   :  { %s441_s11 = scalar_lea.vmem %s54_s17, 16  ;;  %s445_s12 = scalar_lea.vmem %s54_s17, 32 }
  0x3d   :  { %p442_p13 = scmp.ne.s32.totalorder %s54_s17, %s441_s11  ;;  %p446_p0 = scmp.lt.s32.totalorder %s54_s17, %s54_s17 }
  0x3e   :  { %p447_p1 = scmp.lt.s32.totalorder %s445_s12, %s441_s11 }
  0x40   :  { %p448_p2 = por %p447_p1, %p446_p0 }
  0x42   :  { %p449_p3 = pnand %p448_p2, %p442_p13 }
  0x44   :  { %452 = shalt.err (!%p449_p3)
}
  0x45   :  { %56 = dma.hbm_to_vmem [thread:$0]  %s594_s3, 16, %s54_s17, [#allocation10]  }
  0x46   :  { %475 = dma.done.wait [#allocation4], 256  }
  0x47   :  { %476 = vsyncadd [#allocation4], 4294967040 }
  0x48   :  { %477 = dma.done.wait [#allocation7], 1040  }
  0x49   :  { %478 = vsyncadd [#allocation7], 4294966256 }
  0x4a   :  { %479 = dma.done.wait [#allocation10], 16  }
  0x4b   :  { %480 = vsyncadd [#allocation10], 4294967280  ;;  %v355_v0 = vld [vmem:[#allocation6] sm:$0xff]   ;;  %v356_v1 = vld [vmem:[#allocation6 + $0x8] sm:$0xff]   ;;  %s489_s3 = smov [#allocation11]  }
  0x4c   :  { %328 = vmatprep.subr.bf16.mxu0 %v355_v0  ;;  %v357_v2 = vld [vmem:[#allocation6 + $0x10] sm:$0xff]   ;;  %v358_v3 = vld [vmem:[#allocation6 + $0x18] sm:$0xff]   ;;  %v359_v5 = vld [vmem:[#allocation6 + $0x20] sm:$0xff]   ;;  %s273_s13 = sshll.u32 %s489_s3, 4  ;;  %s274_s13 = int_to_ptr.vmem [resolvable:$true] %s273_s13 }
  0x4d   :  { %329 = vmatpush3.bf16.msra.mxu0 %v355_v0  ;;  %v363_v4 = vld [vmem:[#allocation3] sm:$0xff]   ;;  %v360_v6 = vld [vmem:[#allocation6 + $0x28] sm:$0xff]   ;;  %v362_v8 = vld [vmem:[#allocation6 + $0x38] sm:$0xff]   ;;  %s453_s14 = scalar_lea.vmem %s274_s13, 256  ;;  %p458_p5 = scmp.lt.s32.totalorder %s274_s13, %s274_s13 }
  0x4e   :  { %330 = vmatprep.subr.bf16.mxu0 %v356_v1  ;;  %344 = vmatprep.mubr.bf16.mxu0 %v363_v4  ;;  %v361_v7 = vld [vmem:[#allocation6 + $0x30] sm:$0xff]   ;;  %v364_v9 = vld [vmem:[#allocation3 + $0x8] sm:$0xff]   ;;  %v297_v10 = vld [vmem:[#allocation8] ss:$0 sm:$0xff]  ;;  %p454_p4 = scmp.ne.s32.totalorder %s274_s13, %s453_s14  ;;  %p459_p6 = scmp.lt.s32.totalorder %s453_s14, %s453_s14 }
  0x4f   :  { %v298_v14 = vld [vmem:[#allocation9] ss:$0 sm:$0xff] }
  0x50   :  { %p460_p7 = por %p459_p6, %p458_p5 }
  0x51   :  { %331 = vmatpush3.bf16.msra.mxu0 %v356_v1 }
  0x52   :  { %332 = vmatprep.subr.bf16.mxu0 %v357_v2  ;;  %p461_p8 = pnand %p460_p7, %p454_p4 }
  0x55   :  { %333 = vmatpush3.bf16.msra.mxu0 %v357_v2 }
  0x56   :  { %334 = vmatprep.subr.bf16.mxu0 %v358_v3 }
  0x59   :  { %335 = vmatpush3.bf16.msra.mxu0 %v358_v3 }
  0x5a   :  { %336 = vmatprep.subr.bf16.mxu0 %v359_v5 }
  0x5d   :  { %337 = vmatpush3.bf16.msra.mxu0 %v359_v5 }
  0x5e   :  { %338 = vmatprep.subr.bf16.mxu0 %v360_v6 }
  0x61   :  { %339 = vmatpush3.bf16.msra.mxu0 %v360_v6 }
  0x62   :  { %340 = vmatprep.subr.bf16.mxu0 %v361_v7 }
  0x65   :  { %341 = vmatpush3.bf16.msra.mxu0 %v361_v7 }
  0x66   :  { %342 = vmatprep.subr.bf16.mxu0 %v362_v8 }
  0x69   :  { %343 = vmatpush3.bf16.msra.mxu0 %v362_v8 }
  0x6c   :  { %345 = vmatmul.mubr.bf16.vlgmr.msra.gmra.mrb[0].mxu0 %v364_v9 }
 0x13f   :  { %v346_v11 = vpop.f32.mrb[0].mxu0 }
 0x140   :  { %v235_v12 = vmul.f32 %v346_v11, %v297_v10  ;;  %v196_v13 = vpop.f32.mrb[1].mxu0 }
 0x141   :  { %v233_v15 = vmul.f32 %v297_v10, %v196_v13  ;;  %v347_v16 = vpop.f32.mrb[2].mxu0 }
 0x142   :  { %v236_v17 = vmul.f32 %v347_v16, %v297_v10  ;;  %v199_v18 = vpop.f32.mrb[3].mxu0  ;;  %v246_v20 = vadd.f32 %v298_v14, %v235_v12 }
 0x143   :  { %v234_v19 = vmul.f32 %v297_v10, %v199_v18  ;;  %v244_v22 = vadd.f32 %v298_v14, %v233_v15 }
 0x144   :  { %v247_v21 = vadd.f32 %v298_v14, %v236_v17 }
 0x145   :  { %v245_v23 = vadd.f32 %v298_v14, %v234_v19 }
 0x146   :  { %v315_v24 = vpack.c.bf16 %v247_v21, %v246_v20 }
 0x147   :  { %v310_v25 = vpack.c.bf16 %v245_v23, %v244_v22 }
 0x148   :  { %317 = vst [vmem:[#allocation11 + $0x8] sm:$0xff] %v315_v24  }
 0x149   :  { %311 = vst [vmem:[#allocation11] sm:$0xff] %v310_v25  }
 0x14a   :  { %464 = shalt.err (!%p461_p8)
}
 0x14b   :  { %s465_s17 = scalar_lea.hbm %s595_s4, 256 }
 0x14c   :  { %p466_p9 = scmp.ne.s32.totalorder %s595_s4, %s465_s17  ;;  %p469_p10 = scmp.lt.u32.totalorder %s465_s17, %s595_s4 }
 0x14e   :  { %p471_p11 = pnand %p469_p10, %p466_p9 }
 0x150   :  { %474 = shalt.err (!%p471_p11)
}
 0x151   :  { %279 = dma.vmem_to_hbm [thread:$0]  %s274_s13, 256, %s595_s4, [#allocation5], %s485_s27, %s485_s27, %s486_s28  }
 0x152   :  { %481 = dma.done.wait [#allocation5], 256  }
 0x153   :  { %482 = vsyncadd [#allocation5], 4294967040 }
 0x154   :  { %283 = vsyncpa [#allocation4], 1 }
 0x155   :  { %284 = vsyncpa [#allocation7], 1 }
 0x156   :  { %285 = vsyncpa [#allocation10], 1 }
 0x157   :  { %286 = vsyncpa [#allocation5], 1 }

// kernel: resnet_forward.18
= control target key start
LH: loop header
LB: loop body
LE: loop exit
PB: predicated region body
PF: predicated region fallthrough
CT: control target
= control target key end

     0   :  { %6 = vsyncpa [#allocation3], 0  ;;  %s249_s0 = inlined_call_operand.hbm [shape: bf16[2,16,128], index: 0, kind: input, shape index: {}]   ;;  %s250_s1 = inlined_call_operand.hbm [shape: bf16[2,128], index: 1, kind: output, shape index: {}]  }
   0x1   :  { %7 = vsyncpa [#allocation4], 0  ;;  %s209_s6 = smov [#allocation2]   ;;  %s161_s10 = scalar_lea.hbm %s249_s0, 256 }
   0x2   :  { %s13_s7 = sshll.u32 %s209_s6, 4  ;;  %p162_p0 = scmp.ne.s32.totalorder %s249_s0, %s161_s10  ;;  %s14_s7 = int_to_ptr.vmem [resolvable:$true] %s13_s7 }
   0x3   :  { %p165_p1 = scmp.lt.u32.totalorder %s161_s10, %s249_s0 }
   0x5   :  { %p167_p2 = pnand %p165_p1, %p162_p0 }
   0x7   :  { %170 = shalt.err (!%p167_p2)
}
   0x8   :  { %s171_s15 = scalar_lea.vmem %s14_s7, 256  ;;  %p176_p4 = scmp.lt.s32.totalorder %s14_s7, %s14_s7 }
   0x9   :  { %p172_p3 = scmp.ne.s32.totalorder %s14_s7, %s171_s15  ;;  %p177_p5 = scmp.lt.s32.totalorder %s171_s15, %s171_s15 }
   0xb   :  { %p178_p6 = por %p177_p5, %p176_p4 }
   0xd   :  { %p179_p7 = pnand %p178_p6, %p172_p3 }
   0xf   :  { %182 = shalt.err (!%p179_p7)
}
  0x10   :  { %s210_s16 = smov 64   ;;  %s211_s17 = smov 4  }
  0x11   :  { %19 = dma.hbm_to_vmem [thread:$0]  %s249_s0, 256, %s14_s7, [#allocation3], %s210_s16, %s210_s16, %s211_s17  }
  0x12   :  { %205 = dma.done.wait [#allocation3], 256  }
  0x13   :  { %206 = vsyncadd [#allocation3], 4294967040  ;;  %v147_v0 = vld [vmem:[#allocation2] sm:$0xff]   ;;  %v154_v1 = vld [vmem:[#allocation2 + $0x8] sm:$0xff]   ;;  %v55_v12 = vlaneseq  ;;  %v212_v15 = vmov 1966171168  }
  0x14   :  { %v148_v2 = vunpack.c.l.bf16 %v147_v0  ;;  %v149_v3 = vunpack.c.h.bf16 %v147_v0  ;;  %v152_v4 = vunpack.c.l.bf16 %v154_v1  ;;  %v153_v5 = vunpack.c.h.bf16 %v154_v1  ;;  %s214_s0 = smov [#allocation5]  }
  0x15   :  { %v53_v16 = vunpack.c.l.s4 %v212_v15  ;;  %v213_v19 = vmov 1935823168   ;;  %v56_v24 = vshrl.u32 %v55_v12, 7  ;;  %vm111_vm0 = vcmask 1041409   ;;  %s136_s20 = sshll.u32 %s214_s0, 4  ;;  %s137_s20 = int_to_ptr.vmem [resolvable:$true] %s136_s20 }
  0x16   :  { %v31_v6 = vadd.f32 %v149_v3, %v148_v2  ;;  %v38_v7 = vadd.f32 %v153_v5, %v152_v4  ;;  %v81_v20 = vunpack.c.l.s4 %v213_v19  ;;  %s183_s21 = scalar_lea.vmem %s137_s20, 16  ;;  %s187_s22 = scalar_lea.vmem %s137_s20, 32 }
  0x17   :  { %v54_v23 = vunpack.c.0.s8 %v53_v16  ;;  %p184_p8 = scmp.ne.s32.totalorder %s137_s20, %s183_s21  ;;  %p188_p9 = scmp.lt.s32.totalorder %s137_s20, %s137_s20 }
  0x18   :  { %v32_v8 = vrot.slane %v31_v6, 4  ;;  %v39_v9 = vrot.slane %v38_v7, 4  ;;  %v82_v30 = vunpack.c.0.s8 %v81_v20  ;;  %p189_p10 = scmp.lt.s32.totalorder %s187_s22, %s183_s21 }
  0x19   :  { %v57_v29 = vsub.s32 %v54_v23, %v56_v24 }
  0x1a   :  { %v33_v10 = vadd.f32 %v32_v8, %v31_v6  ;;  %v40_v11 = vadd.f32 %v39_v9, %v38_v7  ;;  %v85_v35 = vsub.s32 %v82_v30, %v56_v24  ;;  %p190_p11 = por %p189_p10, %p188_p9 }
  0x1c   :  { %v34_v13 = vrot.slane %v33_v10, 2  ;;  %v41_v14 = vrot.slane %v40_v11, 2  ;;  %p191_p12 = pnand %p190_p11, %p184_p8 }
  0x1e   :  { %v35_v17 = vadd.f32 %v34_v13, %v33_v10  ;;  %v42_v18 = vadd.f32 %v41_v14, %v40_v11 }
  0x20   :  { %v36_v21 = vrot.slane %v35_v17, 1  ;;  %v43_v22 = vrot.slane %v42_v18, 1 }
  0x22   :  { %v37_v25 = vadd.f32 %v36_v21, %v35_v17  ;;  %v44_v26 = vadd.f32 %v43_v22, %v42_v18 }
  0x24   :  { %v46_v27 = vmul.f32 0.0625, %v37_v25  ;;  %v47_v28 = vmul.f32 0.0625, %v44_v26 }
  0x26   :  { %v48_v31 = vpack.c.bf16 %v46_v27, %v46_v27  ;;  %v49_v32 = vpack.c.bf16 %v47_v28, %v47_v28 }
  0x28   :  { %v58_v33 = vrot.slane %v48_v31, %v57_v29  ;;  %v72_v34 = vrot.slane %v49_v32, %v57_v29 }
  0x2a   :  { %v65_v36 = vrot.slane %v58_v33, %v57_v29  ;;  %v79_v37 = vrot.slane %v72_v34, %v57_v29 }
  0x2c   :  { %v86_v38 = vrot.slane %v65_v36, %v85_v35  ;;  %v100_v39 = vrot.slane %v79_v37, %v85_v35 }
  0x2e   :  { %v93_v40 = vrot.slane %v86_v38, %v85_v35  ;;  %v107_v41 = vrot.slane %v100_v39, %v85_v35 }
  0x30   :  { %v108_v42 = vunpack.c.l.b16 %v93_v40  ;;  %v109_v43 = vunpack.c.l.b16 %v107_v41 }
  0x32   :  { %v110_v44 = vrot.slane %v109_v43, 7 }
  0x34   :  { %v112_v45 = vsel %vm111_vm0, %v110_v44, %v108_v42 }
  0x35   :  { %v113_v46 = vpack.c.b16 %v112_v45, %v112_v45 }
  0x37   :  { %v120_v47 = vrot.slane %v113_v46, %v57_v29 }
  0x39   :  { %145 = vst.sshfl [vmem:[#allocation5] sm:$0x1 pattern:$0x73625140] %v120_v47 }
  0x3a   :  { %194 = shalt.err (!%p191_p12)
}
  0x3b   :  { %s195_s25 = scalar_lea.hbm %s250_s1, 16 }
  0x3c   :  { %p196_p13 = scmp.ne.s32.totalorder %s250_s1, %s195_s25  ;;  %p199_p0 = scmp.lt.u32.totalorder %s195_s25, %s250_s1 }
  0x3e   :  { %p201_p1 = pnand %p199_p0, %p196_p13 }
  0x40   :  { %204 = shalt.err (!%p201_p1)
}
  0x41   :  { %139 = dma.vmem_to_hbm [thread:$0]  %s137_s20, 16, %s250_s1, [#allocation4]  }
  0x42   :  { %207 = dma.done.wait [#allocation4], 16  }
  0x43   :  { %208 = vsyncadd [#allocation4], 4294967280 }
  0x44   :  { %143 = vsyncpa [#allocation3], 1 }
  0x45   :  { %144 = vsyncpa [#allocation4], 1 }

// kernel: resnet_forward.13
= control target key start
LH: loop header
LB: loop body
LE: loop exit
PB: predicated region body
PF: predicated region fallthrough
CT: control target
= control target key end

     0   :  { %10 = vsyncpa [#allocation4], 0  ;;  %s681_s0 = inlined_call_operand.hbm [shape: bf16[32,128], index: 0, kind: input, shape index: {}]   ;;  %s682_s1 = inlined_call_operand.hbm [shape: bf16[128,128], index: 1, kind: input, shape index: {}]   ;;  %s683_s2 = inlined_call_operand.hbm [shape: f32[1,128], index: 2, kind: input, shape index: {}]   ;;  %s684_s3 = inlined_call_operand.hbm [shape: f32[1,128], index: 3, kind: input, shape index: {}]   ;;  %s685_s4 = inlined_call_operand.hbm [shape: bf16[32,128], index: 4, kind: input, shape index: {}]   ;;  %s686_s5 = inlined_call_operand.hbm [shape: bf16[32,128], index: 5, kind: output, shape index: {}]  }
   0x1   :  { %11 = vsyncpa [#allocation7], 0 }
   0x2   :  { %12 = vsyncpa [#allocation10], 0 }
   0x3   :  { %13 = vsyncpa [#allocation5], 0  ;;  %s551_s18 = smov [#allocation6]   ;;  %s552_s20 = smov [#allocation9]  }
   0x4   :  { %s31_s19 = sshll.u32 %s551_s18, 4  ;;  %s54_s21 = sshll.u32 %s552_s20, 4  ;;  %s32_s19 = int_to_ptr.vmem [resolvable:$true] %s31_s19  ;;  %s589_s21 = int_to_ptr.vmem [resolvable:$true] %s54_s21 }
   0x5   :  { %s411_s24 = scalar_lea.hbm %s682_s1, 1024 }
   0x6   :  { %p412_p0 = scmp.ne.s32.totalorder %s682_s1, %s411_s24  ;;  %p415_p1 = scmp.lt.u32.totalorder %s411_s24, %s682_s1 }
   0x8   :  { %p417_p2 = pnand %p415_p1, %p412_p0 }
   0xa   :  { %420 = shalt.err (!%p417_p2)
}
   0xb   :  { %s421_s29 = scalar_lea.vmem %s32_s19, 1024  ;;  %p426_p4 = scmp.lt.s32.totalorder %s32_s19, %s32_s19 }
   0xc   :  { %p422_p3 = scmp.ne.s32.totalorder %s32_s19, %s421_s29  ;;  %p427_p5 = scmp.lt.s32.totalorder %s421_s29, %s421_s29 }
   0xe   :  { %p428_p6 = por %p427_p5, %p426_p4 }
  0x10   :  { %p429_p7 = pnand %p428_p6, %p422_p3 }
  0x12   :  { %432 = shalt.err (!%p429_p7)
}
  0x13   :  { %s553_s30 = smov 64   ;;  %s554_s6 = smov 4  }
  0x14   :  { %37 = dma.hbm_to_vmem [thread:$0]  %s682_s1, 1024, %s32_s19, [#allocation7], %s553_s30, %s553_s30, %s554_s6  }
  0x15   :  { %s433_s11 = scalar_lea.hbm %s684_s3, 16 }
  0x16   :  { %p434_p8 = scmp.ne.s32.totalorder %s684_s3, %s433_s11  ;;  %p437_p9 = scmp.lt.u32.totalorder %s433_s11, %s684_s3 }
  0x18   :  { %p439_p10 = pnand %p437_p9, %p434_p8 }
  0x1a   :  { %442 = shalt.err (!%p439_p10)
}
  0x1b   :  { %s443_s16 = scalar_lea.vmem %s589_s21, 16  ;;  %s447_s1 = scalar_lea.vmem %s589_s21, 32 }
  0x1c   :  { %p444_p11 = scmp.ne.s32.totalorder %s589_s21, %s443_s16  ;;  %p448_p12 = scmp.lt.s32.totalorder %s589_s21, %s589_s21 }
  0x1d   :  { %p449_p13 = scmp.lt.s32.totalorder %s447_s1, %s443_s16 }
  0x1f   :  { %p450_p0 = por %p449_p13, %p448_p12 }
  0x21   :  { %p451_p1 = pnand %p450_p0, %p444_p11 }
  0x23   :  { %454 = shalt.err (!%p451_p1)
}
  0x24   :  { %57 = dma.hbm_to_vmem [thread:$0]  %s684_s3, 16, %s589_s21, [#allocation10]  }
  0x25   :  { %s555_s19 = smov [#allocation3]   ;;  %s556_s22 = smov [#allocation8]  }
  0x26   :  { %s19_s20 = sshll.u32 %s555_s19, 4  ;;  %s44_s23 = sshll.u32 %s556_s22, 4  ;;  %s20_s20 = int_to_ptr.vmem [resolvable:$true] %s19_s20  ;;  %s45_s23 = int_to_ptr.vmem [resolvable:$true] %s44_s23 }
  0x27   :  { %s455_s26 = scalar_lea.hbm %s681_s0, 256 }
  0x28   :  { %p456_p2 = scmp.ne.s32.totalorder %s681_s0, %s455_s26  ;;  %p459_p3 = scmp.lt.u32.totalorder %s455_s26, %s681_s0 }
  0x2a   :  { %p461_p4 = pnand %p459_p3, %p456_p2 }
  0x2c   :  { %464 = shalt.err (!%p461_p4)
}
  0x2d   :  { %s465_s3 = scalar_lea.vmem %s20_s20, 256  ;;  %p470_p6 = scmp.lt.s32.totalorder %s20_s20, %s20_s20 }
  0x2e   :  { %p466_p5 = scmp.ne.s32.totalorder %s20_s20, %s465_s3  ;;  %p471_p7 = scmp.lt.s32.totalorder %s465_s3, %s465_s3 }
  0x30   :  { %p472_p8 = por %p471_p7, %p470_p6 }
  0x32   :  { %p473_p9 = pnand %p472_p8, %p466_p5 }
  0x34   :  { %476 = shalt.err (!%p473_p9)
}
  0x35   :  { %25 = dma.hbm_to_vmem [thread:$0]  %s681_s0, 256, %s20_s20, [#allocation4], %s553_s30, %s553_s30, %s554_s6  }
  0x36   :  { %s477_s11 = scalar_lea.hbm %s683_s2, 16 }
  0x37   :  { %p478_p10 = scmp.ne.s32.totalorder %s683_s2, %s477_s11  ;;  %p481_p11 = scmp.lt.u32.totalorder %s477_s11, %s683_s2 }
  0x39   :  { %p483_p12 = pnand %p481_p11, %p478_p10 }
  0x3b   :  { %486 = shalt.err (!%p483_p12)
}
  0x3c   :  { %s487_s16 = scalar_lea.vmem %s45_s23, 16  ;;  %s491_s1 = scalar_lea.vmem %s45_s23, 32 }
  0x3d   :  { %p488_p13 = scmp.ne.s32.totalorder %s45_s23, %s487_s16  ;;  %p492_p0 = scmp.lt.s32.totalorder %s45_s23, %s45_s23 }
  0x3e   :  { %p493_p1 = scmp.lt.s32.totalorder %s491_s1, %s487_s16 }
  0x40   :  { %p494_p2 = por %p493_p1, %p492_p0 }
  0x42   :  { %p495_p3 = pnand %p494_p2, %p488_p13 }
  0x44   :  { %498 = shalt.err (!%p495_p3)
}
  0x45   :  { %47 = dma.hbm_to_vmem [thread:$0]  %s683_s2, 16, %s45_s23, [#allocation7]  }
  0x46   :  { %s557_s18 = smov [#allocation11]   ;;  %s499_s24 = scalar_lea.hbm %s685_s4, 256 }
  0x47   :  { %s63_s19 = sshll.u32 %s557_s18, 4  ;;  %p500_p4 = scmp.ne.s32.totalorder %s685_s4, %s499_s24  ;;  %s64_s19 = int_to_ptr.vmem [resolvable:$true] %s63_s19 }
  0x48   :  { %p503_p5 = scmp.lt.u32.totalorder %s499_s24, %s685_s4 }
  0x4a   :  { %p505_p6 = pnand %p503_p5, %p500_p4 }
  0x4c   :  { %508 = shalt.err (!%p505_p6)
}
  0x4d   :  { %s509_s29 = scalar_lea.vmem %s64_s19, 256  ;;  %p514_p8 = scmp.lt.s32.totalorder %s64_s19, %s64_s19 }
  0x4e   :  { %p510_p7 = scmp.ne.s32.totalorder %s64_s19, %s509_s29  ;;  %p515_p9 = scmp.lt.s32.totalorder %s509_s29, %s509_s29 }
  0x50   :  { %p516_p10 = por %p515_p9, %p514_p8 }
  0x52   :  { %p517_p11 = pnand %p516_p10, %p510_p7 }
  0x54   :  { %520 = shalt.err (!%p517_p11)
}
  0x55   :  { %69 = dma.hbm_to_vmem [thread:$0]  %s685_s4, 256, %s64_s19, [#allocation10], %s553_s30, %s553_s30, %s554_s6  }
  0x56   :  { %543 = dma.done.wait [#allocation4], 256  }
  0x57   :  { %544 = vsyncadd [#allocation4], 4294967040 }
  0x58   :  { %545 = dma.done.wait [#allocation7], 1040  }
  0x59   :  { %546 = vsyncadd [#allocation7], 4294966256 }
  0x5a   :  { %547 = dma.done.wait [#allocation10], 272  }
  0x5b   :  { %548 = vsyncadd [#allocation10], 4294967024  ;;  %v401_v0 = vld [vmem:[#allocation6] sm:$0xff]   ;;  %v402_v1 = vld [vmem:[#allocation6 + $0x8] sm:$0xff]   ;;  %s558_s4 = smov [#allocation12]  }
  0x5c   :  { %373 = vmatprep.subr.bf16.mxu0 %v401_v0  ;;  %v403_v2 = vld [vmem:[#allocation6 + $0x10] sm:$0xff]   ;;  %v404_v3 = vld [vmem:[#allocation6 + $0x18] sm:$0xff]   ;;  %v405_v5 = vld [vmem:[#allocation6 + $0x20] sm:$0xff]   ;;  %s309_s7 = sshll.u32 %s558_s4, 4  ;;  %s310_s7 = int_to_ptr.vmem [resolvable:$true] %s309_s7 }
  0x5d   :  { %374 = vmatpush3.bf16.msra.mxu0 %v401_v0  ;;  %v409_v4 = vld [vmem:[#allocation3] sm:$0xff]   ;;  %v406_v6 = vld [vmem:[#allocation6 + $0x28] sm:$0xff]   ;;  %v408_v8 = vld [vmem:[#allocation6 + $0x38] sm:$0xff]   ;;  %s521_s3 = scalar_lea.vmem %s310_s7, 256  ;;  %p526_p13 = scmp.lt.s32.totalorder %s310_s7, %s310_s7 }
  0x5e   :  { %375 = vmatprep.subr.bf16.mxu0 %v402_v1  ;;  %389 = vmatprep.mubr.bf16.mxu0 %v409_v4  ;;  %v407_v7 = vld [vmem:[#allocation6 + $0x30] sm:$0xff]   ;;  %v410_v9 = vld [vmem:[#allocation3 + $0x8] sm:$0xff]   ;;  %v333_v10 = vld [vmem:[#allocation8] ss:$0 sm:$0xff]  ;;  %p522_p12 = scmp.ne.s32.totalorder %s310_s7, %s521_s3  ;;  %p527_p0 = scmp.lt.s32.totalorder %s521_s3, %s521_s3 }
  0x5f   :  { %v334_v12 = vld [vmem:[#allocation9] ss:$0 sm:$0xff]  ;;  %v361_v13 = vld [vmem:[#allocation11 + $0x8] sm:$0xff]   ;;  %v344_v16 = vld [vmem:[#allocation11] sm:$0xff]  }
  0x60   :  { %v349_v20 = vunpack.c.l.bf16 %v361_v13  ;;  %v345_v24 = vunpack.c.l.bf16 %v344_v16  ;;  %v350_v28 = vunpack.c.h.bf16 %v361_v13  ;;  %v346_v31 = vunpack.c.h.bf16 %v344_v16  ;;  %p528_p1 = por %p527_p0, %p526_p13 }
  0x61   :  { %376 = vmatpush3.bf16.msra.mxu0 %v402_v1 }
  0x62   :  { %377 = vmatprep.subr.bf16.mxu0 %v403_v2  ;;  %p529_p2 = pnand %p528_p1, %p522_p12 }
  0x65   :  { %378 = vmatpush3.bf16.msra.mxu0 %v403_v2 }
  0x66   :  { %379 = vmatprep.subr.bf16.mxu0 %v404_v3 }
  0x69   :  { %380 = vmatpush3.bf16.msra.mxu0 %v404_v3 }
  0x6a   :  { %381 = vmatprep.subr.bf16.mxu0 %v405_v5 }
  0x6d   :  { %382 = vmatpush3.bf16.msra.mxu0 %v405_v5 }
  0x6e   :  { %383 = vmatprep.subr.bf16.mxu0 %v406_v6 }
  0x71   :  { %384 = vmatpush3.bf16.msra.mxu0 %v406_v6 }
  0x72   :  { %385 = vmatprep.subr.bf16.mxu0 %v407_v7 }
  0x75   :  { %386 = vmatpush3.bf16.msra.mxu0 %v407_v7 }
  0x76   :  { %387 = vmatprep.subr.bf16.mxu0 %v408_v8 }
  0x79   :  { %388 = vmatpush3.bf16.msra.mxu0 %v408_v8 }
  0x7c   :  { %390 = vmatmul.mubr.bf16.vlgmr.msra.gmra.mrb[0].mxu0 %v410_v9 }
 0x14f   :  { %v391_v11 = vpop.f32.mrb[0].mxu0 }
 0x150   :  { %v251_v14 = vmul.f32 %v391_v11, %v333_v10  ;;  %v212_v15 = vpop.f32.mrb[1].mxu0 }
 0x151   :  { %v249_v17 = vmul.f32 %v333_v10, %v212_v15  ;;  %v392_v18 = vpop.f32.mrb[2].mxu0 }
 0x152   :  { %v262_v19 = vadd.f32 %v334_v12, %v251_v14  ;;  %v252_v21 = vmul.f32 %v392_v18, %v333_v10  ;;  %v215_v22 = vpop.f32.mrb[3].mxu0 }
 0x153   :  { %v260_v23 = vadd.f32 %v334_v12, %v249_v17  ;;  %v250_v25 = vmul.f32 %v333_v10, %v215_v22 }
 0x154   :  { %v266_v26 = vmax.f32 %v262_v19, 0.0  ;;  %v263_v27 = vadd.f32 %v334_v12, %v252_v21 }
 0x155   :  { %v264_v29 = vmax.f32 %v260_v23, 0.0  ;;  %v261_v30 = vadd.f32 %v334_v12, %v250_v25 }
 0x156   :  { %v278_v32 = vadd.f32 %v349_v20, %v266_v26  ;;  %v267_v33 = vmax.f32 %v263_v27, 0.0 }
 0x157   :  { %v276_v34 = vadd.f32 %v345_v24, %v264_v29  ;;  %v265_v35 = vmax.f32 %v261_v30, 0.0 }
 0x158   :  { %v279_v36 = vadd.f32 %v350_v28, %v267_v33  ;;  %v282_v38 = vmax.f32 %v278_v32, 0.0 }
 0x159   :  { %v277_v37 = vadd.f32 %v346_v31, %v265_v35  ;;  %v280_v40 = vmax.f32 %v276_v34, 0.0 }
 0x15a   :  { %v283_v39 = vmax.f32 %v279_v36, 0.0 }
 0x15b   :  { %v281_v41 = vmax.f32 %v277_v37, 0.0 }
 0x15c   :  { %v359_v42 = vpack.c.bf16 %v283_v39, %v282_v38 }
 0x15d   :  { %v354_v43 = vpack.c.bf16 %v281_v41, %v280_v40 }
 0x15e   :  { %362 = vst [vmem:[#allocation12 + $0x8] sm:$0xff] %v359_v42  }
 0x15f   :  { %355 = vst [vmem:[#allocation12] sm:$0xff] %v354_v43  }
 0x160   :  { %532 = shalt.err (!%p529_p2)
}
 0x161   :  { %s533_s9 = scalar_lea.hbm %s686_s5, 256 }
 0x162   :  { %p534_p3 = scmp.ne.s32.totalorder %s686_s5, %s533_s9  ;;  %p537_p4 = scmp.lt.u32.totalorder %s533_s9, %s686_s5 }
 0x164   :  { %p539_p5 = pnand %p537_p4, %p534_p3 }
 0x166   :  { %542 = shalt.err (!%p539_p5)
}
 0x167   :  { %315 = dma.vmem_to_hbm [thread:$0]  %s310_s7, 256, %s686_s5, [#allocation5], %s553_s30, %s553_s30, %s554_s6  }
 0x168   :  { %549 = dma.done.wait [#allocation5], 256  }
 0x169   :  { %550 = vsyncadd [#allocation5], 4294967040 }
 0x16a   :  { %319 = vsyncpa [#allocation4], 1 }
 0x16b   :  { %320 = vsyncpa [#allocation7], 1 }
 0x16c   :  { %321 = vsyncpa [#allocation10], 1 }
 0x16d   :  { %322 = vsyncpa [#allocation5], 1 }

// kernel: resnet_forward.12
= control target key start
LH: loop header
LB: loop body
LE: loop exit
PB: predicated region body
PF: predicated region fallthrough
CT: control target
= control target key end

     0   :  { %9 = vsyncpa [#allocation3], 0  ;;  %s3822_s0 = inlined_call_operand.hbm [shape: bf16[1,224,384], index: 0, kind: input, shape index: {}]   ;;  %s3823_s1 = inlined_call_operand.hbm [shape: bf16[3,384,128], index: 1, kind: input, shape index: {}]   ;;  %s3824_s2 = inlined_call_operand.hbm [shape: f32[1,128], index: 2, kind: input, shape index: {}]   ;;  %s3825_s3 = inlined_call_operand.hbm [shape: f32[1,128], index: 3, kind: input, shape index: {}]   ;;  %s3826_s4 = inlined_call_operand.hbm [shape: bf16[192,128], index: 4, kind: output, shape index: {}]  }
   0x1   :  { %10 = vsyncpa [#allocation6], 0 }
   0x2   :  { %11 = vsyncpa [#allocation9], 0 }
   0x3   :  { %12 = vsyncpa [#allocation4], 0  ;;  %s3285_s15 = smov [#allocation5]   ;;  %s3167_s19 = scalar_lea.hbm %s3823_s1, 9216 }
   0x4   :  { %s30_s16 = sshll.u32 %s3285_s15, 4  ;;  %p3168_p0 = scmp.ne.s32.totalorder %s3823_s1, %s3167_s19  ;;  %s31_s16 = int_to_ptr.vmem [resolvable:$true] %s30_s16 }
   0x5   :  { %p3171_p1 = scmp.lt.u32.totalorder %s3167_s19, %s3823_s1 }
   0x7   :  { %p3173_p2 = pnand %p3171_p1, %p3168_p0 }
   0x9   :  { %3176 = shalt.err (!%p3173_p2)
}
   0xa   :  { %s3177_s24 = scalar_lea.vmem %s31_s16, 9216  ;;  %p3182_p4 = scmp.lt.s32.totalorder %s31_s16, %s31_s16 }
   0xb   :  { %p3178_p3 = scmp.ne.s32.totalorder %s31_s16, %s3177_s24  ;;  %p3183_p5 = scmp.lt.s32.totalorder %s3177_s24, %s3177_s24 }
   0xd   :  { %p3184_p6 = por %p3183_p5, %p3182_p4 }
   0xf   :  { %p3185_p7 = pnand %p3184_p6, %p3178_p3 }
  0x11   :  { %3188 = shalt.err (!%p3185_p7)
}
  0x12   :  { %s3286_s25 = smov 64   ;;  %s3287_s26 = smov 4  }
  0x13   :  { %36 = dma.hbm_to_vmem [thread:$0]  %s3823_s1, 9216, %s31_s16, [#allocation6], %s3286_s25, %s3286_s25, %s3287_s26  }
  0x14   :  { %s3288_s29 = smov [#allocation2]   ;;  %s3189_s7 = scalar_lea.hbm %s3822_s0, 5376 }
  0x15   :  { %s18_s30 = sshll.u32 %s3288_s29, 4  ;;  %p3190_p8 = scmp.ne.s32.totalorder %s3822_s0, %s3189_s7  ;;  %s19_s30 = int_to_ptr.vmem [resolvable:$true] %s18_s30 }
  0x16   :  { %p3193_p9 = scmp.lt.u32.totalorder %s3189_s7, %s3822_s0 }
  0x18   :  { %p3195_p10 = pnand %p3193_p9, %p3190_p8 }
  0x1a   :  { %3198 = shalt.err (!%p3195_p10)
}
  0x1b   :  { %s3199_s12 = scalar_lea.vmem %s19_s30, 5376  ;;  %p3204_p12 = scmp.lt.s32.totalorder %s19_s30, %s19_s30 }
  0x1c   :  { %p3200_p11 = scmp.ne.s32.totalorder %s19_s30, %s3199_s12  ;;  %p3205_p13 = scmp.lt.s32.totalorder %s3199_s12, %s3199_s12 }
  0x1e   :  { %p3206_p0 = por %p3205_p13, %p3204_p12 }
  0x20   :  { %p3207_p1 = pnand %p3206_p0, %p3200_p11 }
  0x22   :  { %3210 = shalt.err (!%p3207_p1)
}
  0x23   :  { %s3289_s1 = smov 192   ;;  %s3290_s13 = smov 12  }
  0x24   :  { %24 = dma.hbm_to_vmem [thread:$0]  %s3822_s0, 5376, %s19_s30, [#allocation3], %s3289_s1, %s3289_s1, %s3290_s13  }
  0x25   :  { %s3291_s16 = smov [#allocation7]   ;;  %s3292_s18 = smov [#allocation8]  }
  0x26   :  { %s43_s17 = sshll.u32 %s3291_s16, 4  ;;  %s53_s19 = sshll.u32 %s3292_s18, 4  ;;  %s44_s17 = int_to_ptr.vmem [resolvable:$true] %s43_s17  ;;  %s54_s19 = int_to_ptr.vmem [resolvable:$true] %s53_s19 }
  0x27   :  { %s3211_s22 = scalar_lea.hbm %s3824_s2, 16 }
  0x28   :  { %p3212_p2 = scmp.ne.s32.totalorder %s3824_s2, %s3211_s22  ;;  %p3215_p3 = scmp.lt.u32.totalorder %s3211_s22, %s3824_s2 }
  0x2a   :  { %p3217_p4 = pnand %p3215_p3, %p3212_p2 }
  0x2c   :  { %3220 = shalt.err (!%p3217_p4)
}
  0x2d   :  { %s3221_s0 = scalar_lea.vmem %s44_s17, 16  ;;  %s3225_s29 = scalar_lea.vmem %s44_s17, 32 }
  0x2e   :  { %p3222_p5 = scmp.ne.s32.totalorder %s44_s17, %s3221_s0  ;;  %p3226_p6 = scmp.lt.s32.totalorder %s44_s17, %s44_s17 }
  0x2f   :  { %p3227_p7 = scmp.lt.s32.totalorder %s3225_s29, %s3221_s0 }
  0x31   :  { %p3228_p8 = por %p3227_p7, %p3226_p6 }
  0x33   :  { %p3229_p9 = pnand %p3228_p8, %p3222_p5 }
  0x35   :  { %3232 = shalt.err (!%p3229_p9)
}
  0x36   :  { %46 = dma.hbm_to_vmem [thread:$0]  %s3824_s2, 16, %s44_s17, [#allocation6]  }
  0x37   :  { %s3233_s8 = scalar_lea.hbm %s3825_s3, 16 }
  0x38   :  { %p3234_p10 = scmp.ne.s32.totalorder %s3825_s3, %s3233_s8  ;;  %p3237_p11 = scmp.lt.u32.totalorder %s3233_s8, %s3825_s3 }
  0x3a   :  { %p3239_p12 = pnand %p3237_p11, %p3234_p10 }
  0x3c   :  { %3242 = shalt.err (!%p3239_p12)
}
  0x3d   :  { %s3243_s1 = scalar_lea.vmem %s54_s19, 16  ;;  %s3247_s13 = scalar_lea.vmem %s54_s19, 32 }
  0x3e   :  { %p3244_p13 = scmp.ne.s32.totalorder %s54_s19, %s3243_s1  ;;  %p3248_p0 = scmp.lt.s32.totalorder %s54_s19, %s54_s19 }
  0x3f   :  { %p3249_p1 = scmp.lt.s32.totalorder %s3247_s13, %s3243_s1 }
  0x41   :  { %p3250_p2 = por %p3249_p1, %p3248_p0 }
  0x43   :  { %p3251_p3 = pnand %p3250_p2, %p3244_p13 }
  0x45   :  { %3254 = shalt.err (!%p3251_p3)
}
  0x46   :  { %56 = dma.hbm_to_vmem [thread:$0]  %s3825_s3, 16, %s54_s19, [#allocation9]  }
  0x47   :  { %3277 = dma.done.wait [#allocation3], 5376  }
  0x48   :  { %3278 = vsyncadd [#allocation3], 4294961920 }
  0x49   :  { %3279 = dma.done.wait [#allocation6], 9232  }
  0x4a   :  { %3280 = vsyncadd [#allocation6], 4294958064 }
  0x4b   :  { %3281 = dma.done.wait [#allocation9], 16  }
  0x4c   :  { %3282 = vsyncadd [#allocation9], 4294967280  ;;  %v3028_v0 = vld [vmem:[#allocation5 + $0x100] sm:$0xff]   ;;  %v3031_v3 = vld [vmem:[#allocation5 + $0x108] sm:$0xff]   ;;  %s3293_s3 = smov [#allocation10]  }
  0x4d   :  { %v3029_v1 = vld [vmem:[#allocation5 + $0x140] sm:$0xff]   ;;  %2439 = vmatprep.subr.bf16.mxu0 %v3028_v0  ;;  %v3032_v4 = vld [vmem:[#allocation5 + $0x148] sm:$0xff]   ;;  %v3034_v6 = vld [vmem:[#allocation5 + $0x110] sm:$0xff]   ;;  %s2157_s15 = sshll.u32 %s3293_s3, 4  ;;  %s2158_s15 = int_to_ptr.vmem [resolvable:$true] %s2157_s15 }
  0x4e   :  { %v3030_v2 = vld [vmem:[#allocation5 + $0xc0] sm:$0xff]   ;;  %2763 = vmatprep.subr.bf16.mxu1 %v3029_v1  ;;  %v3033_v5 = vld [vmem:[#allocation5 + $0xc8] sm:$0xff]   ;;  %v3035_v7 = vld [vmem:[#allocation5 + $0x150] sm:$0xff]   ;;  %s3255_s16 = scalar_lea.vmem %s2158_s15, 1536  ;;  %p3260_p5 = scmp.lt.s32.totalorder %s2158_s15, %s2158_s15 }
  0x4f   :  { %2440 = vmatpush3.bf16.msra.mxu0 %v3030_v2  ;;  %2764 = vmatpush3.bf16.msra.mxu1 %v3029_v1  ;;  %v3036_v8 = vld [vmem:[#allocation5 + $0xd0] sm:$0xff]   ;;  %v3037_v9 = vld [vmem:[#allocation5 + $0x118] sm:$0xff]   ;;  %v3040_v12 = vld [vmem:[#allocation5 + $0x120] sm:$0xff]   ;;  %p3256_p4 = scmp.ne.s32.totalorder %s2158_s15, %s3255_s16  ;;  %p3261_p6 = scmp.lt.s32.totalorder %s3255_s16, %s3255_s16 }
  0x50   :  { %2441 = vmatprep.subr.bf16.mxu0 %v3031_v3  ;;  %2765 = vmatprep.subr.bf16.mxu1 %v3032_v4  ;;  %v3038_v10 = vld [vmem:[#allocation5 + $0x158] sm:$0xff]   ;;  %v3041_v13 = vld [vmem:[#allocation5 + $0x160] sm:$0xff]   ;;  %v3043_v15 = vld [vmem:[#allocation5 + $0x128] sm:$0xff]  }
  0x51   :  { %v3039_v11 = vld [vmem:[#allocation5 + $0xd8] sm:$0xff]   ;;  %v3042_v14 = vld [vmem:[#allocation5 + $0xe0] sm:$0xff]   ;;  %v3044_v16 = vld [vmem:[#allocation5 + $0x168] sm:$0xff]   ;;  %p3262_p7 = por %p3261_p6, %p3260_p5 }
  0x52   :  { %v3045_v17 = vld [vmem:[#allocation5 + $0xe8] sm:$0xff]   ;;  %v3046_v18 = vld [vmem:[#allocation5 + $0x130] sm:$0xff]   ;;  %v3049_v21 = vld [vmem:[#allocation5 + $0x138] sm:$0xff]  }
  0x53   :  { %2442 = vmatpush3.bf16.msra.mxu0 %v3033_v5  ;;  %2766 = vmatpush3.bf16.msra.mxu1 %v3032_v4  ;;  %v3047_v19 = vld [vmem:[#allocation5 + $0x170] sm:$0xff]   ;;  %v3050_v22 = vld [vmem:[#allocation5 + $0x178] sm:$0xff]   ;;  %v3057_v26 = vld [vmem:[#allocation5 + $0x40] sm:$0xff]   ;;  %p3263_p8 = pnand %p3262_p7, %p3256_p4 }
  0x54   :  { %2443 = vmatprep.subr.bf16.mxu0 %v3034_v6  ;;  %2767 = vmatprep.subr.bf16.mxu1 %v3035_v7  ;;  %v3048_v20 = vld [vmem:[#allocation5 + $0xf0] sm:$0xff]   ;;  %v3370_v23 = vld [vmem:[#allocation2 + $0x1c] ss:$12 sps:$4 sm:$0xff]   ;;  %v3058_v29 = vld [vmem:[#allocation5 + $0x1c0] sm:$0xff]  }
  0x55   :  { %v3372_v24 = vld [vmem:[#allocation2 + $0x20] ss:$12 sps:$4 sm:$0xff]   ;;  %587 = vmatprep.mubr.bf16.mxu0 %v3370_v23  ;;  %v3375_v27 = vld [vmem:[#allocation2 + $0x18] ss:$12 sps:$4 sm:$0xff]   ;;  %v3059_v30 = vld [vmem:[#allocation5] sm:$0xff]  }
  0x56   :  { %v3051_v25 = vld [vmem:[#allocation5 + $0xf8] sm:$0xff]   ;;  %v3377_v28 = vld [vmem:[#allocation2 + $0x38] ss:$12 sps:$4 sm:$0xff]   ;;  %2779 = vmatprep.mubr.bf16.mxu1 %v3372_v24  ;;  %v3060_v31 = vld [vmem:[#allocation5 + $0x180] sm:$0xff]  }
  0x57   :  { %2444 = vmatpush3.bf16.msra.mxu0 %v3036_v8  ;;  %2768 = vmatpush3.bf16.msra.mxu1 %v3035_v7  ;;  %v3061_v32 = vld [vmem:[#allocation5 + $0x48] sm:$0xff]   ;;  %v3380_v33 = vld [vmem:[#allocation2 + $0x34] ss:$12 sps:$4 sm:$0xff]   ;;  %v3077_v44 = vld [vmem:[#allocation5 + $0x58] sm:$0xff]  }
  0x58   :  { %2445 = vmatprep.subr.bf16.mxu0 %v3037_v9  ;;  %2769 = vmatprep.subr.bf16.mxu1 %v3038_v10  ;;  %v3382_v34 = vld [vmem:[#allocation2 + $0x50] ss:$12 sps:$4 sm:$0xff]   ;;  %v3389_v37 = vld [vmem:[#allocation2 + $0x68] ss:$12 sps:$4 sm:$0xff]   ;;  %v3068_v38 = vld [vmem:[#allocation5 + $0x50] sm:$0xff]  }
  0x59   :  { %v3065_v35 = vld [vmem:[#allocation5 + $0x8] sm:$0xff]   ;;  %v3070_v40 = vld [vmem:[#allocation5 + $0x10] sm:$0xff]   ;;  %v3400_v45 = vld [vmem:[#allocation2 + $0x48] ss:$12 sps:$4 sm:$0xff]  }
  0x5a   :  { %v3387_v36 = vld [vmem:[#allocation2 + $0x30] ss:$12 sps:$4 sm:$0xff]   ;;  %v3392_v42 = vld [vmem:[#allocation2 + $0x4c] ss:$12 sps:$4 sm:$0xff]   ;;  %v3085_v51 = vld [vmem:[#allocation5 + $0x1d0] sm:$0xff]  }
  0x5b   :  { %2446 = vmatpush3.bf16.msra.mxu0 %v3039_v11  ;;  %2770 = vmatpush3.bf16.msra.mxu1 %v3038_v10  ;;  %v3069_v39 = vld [vmem:[#allocation5 + $0x1c8] sm:$0xff]   ;;  %v3394_v43 = vld [vmem:[#allocation2 + $0x80] ss:$12 sps:$4 sm:$0xff]   ;;  %v3404_v48 = vld [vmem:[#allocation2 + $0x64] ss:$12 sps:$4 sm:$0xff]  }
  0x5c   :  { %2447 = vmatprep.subr.bf16.mxu0 %v3040_v12  ;;  %2771 = vmatprep.subr.bf16.mxu1 %v3041_v13  ;;  %v3071_v41 = vld [vmem:[#allocation5 + $0x188] sm:$0xff]   ;;  %v3078_v46 = vld [vmem:[#allocation5 + $0x18] sm:$0xff]   ;;  %v3084_v50 = vld [vmem:[#allocation5 + $0x60] sm:$0xff]  }
  0x5d   :  { %v3402_v47 = vld [vmem:[#allocation2 + $0x98] ss:$12 sps:$4 sm:$0xff]   ;;  %v3406_v49 = vld [vmem:[#allocation2 + $0xb0] ss:$12 sps:$4 sm:$0xff]   ;;  %v3412_v53 = vld [vmem:[#allocation2 + $0x60] ss:$12 sps:$4 sm:$0xff]  }
  0x5e   :  { %v3086_v52 = vld [vmem:[#allocation5 + $0x20] sm:$0xff]   ;;  %v3087_v55 = vld [vmem:[#allocation5 + $0x190] sm:$0xff]   ;;  %v3088_v56 = vld [vmem:[#allocation5 + $0x68] sm:$0xff]  }
  0x5f   :  { %2448 = vmatpush3.bf16.msra.mxu0 %v3042_v14  ;;  %2772 = vmatpush3.bf16.msra.mxu1 %v3041_v13  ;;  %v3414_v54 = vld [vmem:[#allocation2 + $0xc8] ss:$12 sps:$4 sm:$0xff]   ;;  %v3418_v58 = vld [vmem:[#allocation2 + $0xe0] ss:$12 sps:$4 sm:$0xff]   ;;  %v3092_v59 = vld [vmem:[#allocation5 + $0x28] sm:$0xff]  }
  0x60   :  { %2449 = vmatprep.subr.bf16.mxu0 %v3043_v15  ;;  %2773 = vmatprep.subr.bf16.mxu1 %v3044_v16  ;;  %v3416_v57 = vld [vmem:[#allocation2 + $0x7c] ss:$12 sps:$4 sm:$0xff]   ;;  %v3095_v60 = vld [vmem:[#allocation5 + $0x70] sm:$0xff]   ;;  %v3438_v8 = vld [vmem:[#allocation2 + $0xac] ss:$12 sps:$4 sm:$0xff]  }
  0x61   :  { %v3096_v61 = vld [vmem:[#allocation5 + $0x1d8] sm:$0xff]   ;;  %v3424_v62 = vld [vmem:[#allocation2 + $0x78] ss:$12 sps:$4 sm:$0xff]   ;;  %v3428_v2 = vld [vmem:[#allocation2 + $0x94] ss:$12 sps:$4 sm:$0xff]  }
  0x62   :  { %v3097_v63 = vld [vmem:[#allocation5 + $0x30] sm:$0xff]   ;;  %v3098_v0 = vld [vmem:[#allocation5 + $0x198] sm:$0xff]   ;;  %v3430_v3 = vld [vmem:[#allocation2 + $0x110] ss:$12 sps:$4 sm:$0xff]  }
  0x63   :  { %2450 = vmatpush3.bf16.msra.mxu0 %v3045_v17  ;;  %2774 = vmatpush3.bf16.msra.mxu1 %v3044_v16  ;;  %v3426_v1 = vld [vmem:[#allocation2 + $0xf8] ss:$12 sps:$4 sm:$0xff]   ;;  %v3104_v4 = vld [vmem:[#allocation5 + $0x78] sm:$0xff]   ;;  %v3436_v6 = vld [vmem:[#allocation2 + $0x90] ss:$12 sps:$4 sm:$0xff]  }
  0x64   :  { %2451 = vmatprep.subr.bf16.mxu0 %v3046_v18  ;;  %2775 = vmatprep.subr.bf16.mxu1 %v3047_v19  ;;  %v3105_v5 = vld [vmem:[#allocation5 + $0x38] sm:$0xff]   ;;  %v3110_v9 = vld [vmem:[#allocation2 + $0x4] ss:$12 sps:$4 sm:$0xff]   ;;  %v3119_v13 = vld [vmem:[#allocation5 + $0x1e8] sm:$0xff]  }
  0x65   :  { %v3103_v7 = vld [vmem:[#allocation2 + $0x128] ss:$12 sps:$4 sm:$0xff]   ;;  %v3120_v14 = vld [vmem:[#allocation5 + $0x1a8] sm:$0xff]   ;;  %v3108_v15 = vld [vmem:[#allocation2] ss:$12 sps:$4 sm:$0xff]  }
  0x66   :  { %v3112_v10 = vld [vmem:[#allocation5 + $0x80] sm:$0xff]   ;;  %v3118_v18 = vld [vmem:[#allocation5 + $0x88] sm:$0xff]  }
  0x67   :  { %2452 = vmatpush3.bf16.msra.mxu0 %v3048_v20  ;;  %2776 = vmatpush3.bf16.msra.mxu1 %v3047_v19  ;;  %v3113_v11 = vld [vmem:[#allocation5 + $0x1e0] sm:$0xff]   ;;  %v3128_v19 = vld [vmem:[#allocation5 + $0x1f0] sm:$0xff]  }
  0x68   :  { %2453 = vmatprep.subr.bf16.mxu0 %v3049_v21  ;;  %2777 = vmatprep.subr.bf16.mxu1 %v3050_v22  ;;  %v3114_v12 = vld [vmem:[#allocation5 + $0x1a0] sm:$0xff]   ;;  %v3129_v20 = vld [vmem:[#allocation5 + $0x1b0] sm:$0xff]  }
  0x69   :  { %v3442_v16 = vld [vmem:[#allocation2 + $0xa8] ss:$12 sps:$4 sm:$0xff]   ;;  %v3444_v17 = vld [vmem:[#allocation2 + $0xc4] ss:$12 sps:$4 sm:$0xff]  }
  0x6a   :  { %v3127_v21 = vld [vmem:[#allocation5 + $0x90] sm:$0xff]  }
  0x6b   :  { %2454 = vmatpush3.bf16.msra.mxu0 %v3051_v25  ;;  %2778 = vmatpush3.bf16.msra.mxu1 %v3050_v22  ;;  %v3134_v22 = vld [vmem:[#allocation5 + $0x1f8] sm:$0xff]  }
  0x6c   :  { %2547 = vmatprep.subr.bf16.mxu1 %v3057_v26  ;;  %2655 = vmatprep.subr.bf16.mxu0 %v3058_v29  ;;  %v3449_v25 = vld [vmem:[#allocation2 + $0xc0] ss:$12 sps:$4 sm:$0xff]   ;;  %v3451_v26 = vld [vmem:[#allocation2 + $0xdc] ss:$12 sps:$4 sm:$0xff]  }
  0x6d   :  { %v3135_v29 = vld [vmem:[#allocation5 + $0x1b8] sm:$0xff]  }
  0x6e   :  { %588 = vmatmul.mubr.bf16.vlgmr.msra.gmra.mrb[0].mxu0 %v3375_v27  ;;  %2780 = vmatmul.mubr.bf16.vlgmr.msra.gmra.mrb[0].mxu1 %v3377_v28 }
  0x6f   :  { %2548 = vmatpush3.bf16.msra.mxu1 %v3059_v30  ;;  %2656 = vmatpush3.bf16.msra.mxu0 %v3060_v31  ;;  %v3133_v30 = vld [vmem:[#allocation5 + $0x98] sm:$0xff]   ;;  %v3455_v31 = vld [vmem:[#allocation5 + $0x200] sm:$0xff]  }
  0x70   :  { %2549 = vmatprep.subr.bf16.mxu1 %v3061_v32  ;;  %595 = vmatprep.mubr.bf16.mxu0 %v3380_v33  ;;  %v3460_v32 = vld [vmem:[#allocation2 + $0xd8] ss:$12 sps:$4 sm:$0xff]  }
  0x71   :  { %2783 = vmatprep.mubr.bf16.mxu1 %v3382_v34  ;;  %2657 = vmatprep.subr.bf16.mxu0 %v3069_v39  ;;  %v3468_v39 = vld [vmem:[#allocation2 + $0xf0] ss:$12 sps:$4 sm:$0xff]  }
  0x73   :  { %2550 = vmatpush3.bf16.msra.mxu1 %v3065_v35  ;;  %2658 = vmatpush3.bf16.msra.mxu0 %v3071_v41  ;;  %v3462_v35 = vld [vmem:[#allocation2 + $0xf4] ss:$12 sps:$4 sm:$0xff]   ;;  %v3145_v41 = vld [vmem:[#allocation5 + $0xb8] sm:$0xff]  }
  0x74   :  { %2551 = vmatprep.subr.bf16.mxu1 %v3068_v38  ;;  %2659 = vmatprep.subr.bf16.mxu0 %v3085_v51  ;;  %v3141_v38 = vld [vmem:[#allocation5 + $0xa8] sm:$0xff]  }
  0x75   :  { %v3142_v51 = vld [vmem:[#allocation5 + $0x208] sm:$0xff]  }
  0x76   :  { %596 = vmatmul.mubr.bf16.gmra.mrb[4].mxu0 %v3387_v36  ;;  %2784 = vmatmul.mubr.bf16.gmra.mrb[4].mxu1 %v3389_v37 }
  0x77   :  { %2552 = vmatpush3.bf16.msra.mxu1 %v3070_v40  ;;  %603 = vmatprep.mubr.bf16.mxu0 %v3392_v42  ;;  %v3470_v40 = vld [vmem:[#allocation2 + $0x10c] ss:$12 sps:$4 sm:$0xff]  }
  0x78   :  { %2787 = vmatprep.mubr.bf16.mxu1 %v3394_v43  ;;  %2553 = vmatprep.subr.bf16.mxu1 %v3077_v44  ;;  %v3476_v44 = vld [vmem:[#allocation2 + $0x108] ss:$12 sps:$4 sm:$0xff]  }
  0x79   :  { %2660 = vmatpush3.bf16.msra.mxu0 %v3087_v55  ;;  %v3146_v55 = vld [vmem:[#allocation5 + $0x218] sm:$0xff]  }
  0x7a   :  { %2661 = vmatprep.subr.bf16.mxu0 %v3096_v61 }
  0x7b   :  { %2554 = vmatpush3.bf16.msra.mxu1 %v3078_v46  ;;  %v3478_v46 = vld [vmem:[#allocation2 + $0x124] ss:$12 sps:$4 sm:$0xff]  }
  0x7c   :  { %2555 = vmatprep.subr.bf16.mxu1 %v3084_v50  ;;  %v3485_v50 = vld [vmem:[#allocation2 + $0x120] ss:$12 sps:$4 sm:$0xff]  }
  0x7d   :  { %2662 = vmatpush3.bf16.msra.mxu0 %v3098_v0 }
  0x7e   :  { %604 = vmatmul.mubr.bf16.gmra.mrb[8].mxu0 %v3400_v45  ;;  %2788 = vmatmul.mubr.bf16.gmra.mrb[8].mxu1 %v3402_v47 }
  0x7f   :  { %611 = vmatprep.mubr.bf16.mxu0 %v3404_v48  ;;  %2791 = vmatprep.mubr.bf16.mxu1 %v3406_v49 }
  0x80   :  { %2556 = vmatpush3.bf16.msra.mxu1 %v3086_v52  ;;  %2663 = vmatprep.subr.bf16.mxu0 %v3113_v11  ;;  %v3144_v52 = vld [vmem:[#allocation5 + $0x210] sm:$0xff]  }
  0x81   :  { %2557 = vmatprep.subr.bf16.mxu1 %v3088_v56  ;;  %2664 = vmatpush3.bf16.msra.mxu0 %v3114_v12  ;;  %v3162_v56 = vld [vmem:[#allocation2 + $0x110] ss:$12 sps:$4 sm:$0xff]  }
  0x82   :  { %2665 = vmatprep.subr.bf16.mxu0 %v3119_v13 }
  0x84   :  { %2558 = vmatpush3.bf16.msra.mxu1 %v3092_v59  ;;  %v3165_v59 = vld [vmem:[#allocation2 + $0xb0] ss:$12 sps:$4 sm:$0xff]  }
  0x85   :  { %2559 = vmatprep.subr.bf16.mxu1 %v3095_v60  ;;  %2666 = vmatpush3.bf16.msra.mxu0 %v3120_v14  ;;  %v3166_v60 = vld [vmem:[#allocation2 + $0x140] ss:$12 sps:$4 sm:$0xff]  }
  0x86   :  { %612 = vmatmul.mubr.bf16.gmra.mrb[12].mxu0 %v3412_v53  ;;  %2792 = vmatmul.mubr.bf16.gmra.mrb[12].mxu1 %v3414_v54 }
  0x87   :  { %619 = vmatprep.mubr.bf16.mxu0 %v3416_v57  ;;  %2795 = vmatprep.mubr.bf16.mxu1 %v3418_v58 }
  0x88   :  { %2560 = vmatpush3.bf16.msra.mxu1 %v3097_v63  ;;  %2667 = vmatprep.subr.bf16.mxu0 %v3128_v19 }
  0x89   :  { %2561 = vmatprep.subr.bf16.mxu1 %v3104_v4  ;;  %2668 = vmatpush3.bf16.msra.mxu0 %v3129_v20 }
  0x8a   :  { %2669 = vmatprep.subr.bf16.mxu0 %v3134_v22 }
  0x8c   :  { %2562 = vmatpush3.bf16.msra.mxu1 %v3105_v5 }
  0x8d   :  { %2803 = vmatprep.subr.bf16.mxu1 %v3112_v10  ;;  %2670 = vmatpush3.bf16.msra.mxu0 %v3135_v29 }
  0x8e   :  { %620 = vmatmul.mubr.bf16.gmra.mrb[16].mxu0 %v3424_v62  ;;  %2796 = vmatmul.mubr.bf16.gmra.mrb[16].mxu1 %v3426_v1 }
  0x8f   :  { %627 = vmatprep.mubr.bf16.mxu0 %v3428_v2  ;;  %2799 = vmatprep.mubr.bf16.mxu1 %v3430_v3 }
  0x90   :  { %2843 = vmatprep.subr.bf16.mxu0 %v3455_v31 }
  0x96   :  { %628 = vmatmul.mubr.bf16.gmra.mrb[20].mxu0 %v3436_v6  ;;  %2800 = vmatmul.mubr.bf16.gmra.mrb[20].mxu1 %v3103_v7 }
  0x97   :  { %635 = vmatprep.mubr.bf16.mxu0 %v3438_v8  ;;  %1005 = vmatprep.mubr.bf16.mxu1 %v3110_v9 }
  0x9e   :  { %636 = vmatmul.mubr.bf16.gmra.mrb[24].mxu0 %v3442_v16  ;;  %1006 = vmatmul.mubr.bf16.vlgmr.msra.gmra.mrb[24].mxu1 %v3108_v15 }
  0x9f   :  { %2804 = vmatpush3.bf16.msra.mxu1 %v3112_v10  ;;  %643 = vmatprep.mubr.bf16.mxu0 %v3444_v17 }
  0xa0   :  { %1013 = vmatprep.mubr.bf16.mxu1 %v3370_v23  ;;  %2805 = vmatprep.subr.bf16.mxu1 %v3118_v18  ;;  %v3139_v23 = vld [vmem:[#allocation5 + $0xa0] sm:$0xff]  }
  0xa3   :  { %2806 = vmatpush3.bf16.msra.mxu1 %v3118_v18 }
  0xa4   :  { %2807 = vmatprep.subr.bf16.mxu1 %v3127_v21 }
  0xa6   :  { %644 = vmatmul.mubr.bf16.gmra.mrb[28].mxu0 %v3449_v25  ;;  %1014 = vmatmul.mubr.bf16.gmra.mrb[28].mxu1 %v3375_v27  ;;  %v3143_v27 = vld [vmem:[#allocation5 + $0xb0] sm:$0xff]  }
  0xa7   :  { %651 = vmatprep.mubr.bf16.mxu0 %v3451_v26  ;;  %1021 = vmatprep.mubr.bf16.mxu1 %v3380_v33 }
  0xa8   :  { %2808 = vmatpush3.bf16.msra.mxu1 %v3127_v21 }
  0xa9   :  { %2809 = vmatprep.subr.bf16.mxu1 %v3133_v30 }
  0xac   :  { %2810 = vmatpush3.bf16.msra.mxu1 %v3133_v30 }
  0xad   :  { %2811 = vmatprep.subr.bf16.mxu1 %v3139_v23 }
  0xae   :  { %652 = vmatmul.mubr.bf16.gmra.mrb[32].mxu0 %v3460_v32  ;;  %1022 = vmatmul.mubr.bf16.gmra.mrb[32].mxu1 %v3387_v36 }
  0xaf   :  { %659 = vmatprep.mubr.bf16.mxu0 %v3462_v35  ;;  %1029 = vmatprep.mubr.bf16.mxu1 %v3392_v42 }
  0xb0   :  { %2812 = vmatpush3.bf16.msra.mxu1 %v3139_v23 }
  0xb1   :  { %2813 = vmatprep.subr.bf16.mxu1 %v3141_v38 }
  0xb4   :  { %2814 = vmatpush3.bf16.msra.mxu1 %v3141_v38 }
  0xb5   :  { %2815 = vmatprep.subr.bf16.mxu1 %v3143_v27 }
  0xb6   :  { %660 = vmatmul.mubr.bf16.gmra.mrb[36].mxu0 %v3468_v39  ;;  %1030 = vmatmul.mubr.bf16.gmra.mrb[36].mxu1 %v3400_v45 }
  0xb7   :  { %667 = vmatprep.mubr.bf16.mxu0 %v3470_v40  ;;  %1037 = vmatprep.mubr.bf16.mxu1 %v3404_v48 }
  0xb8   :  { %2816 = vmatpush3.bf16.msra.mxu1 %v3143_v27 }
  0xb9   :  { %2817 = vmatprep.subr.bf16.mxu1 %v3145_v41 }
  0xbc   :  { %2818 = vmatpush3.bf16.msra.mxu1 %v3145_v41 }
  0xbd   :  { %2883 = vmatprep.subr.bf16.mxu1 %v3455_v31 }
  0xbe   :  { %668 = vmatmul.mubr.bf16.gmra.mrb[40].mxu0 %v3476_v44  ;;  %1038 = vmatmul.mubr.bf16.gmra.mrb[40].mxu1 %v3412_v53 }
  0xbf   :  { %675 = vmatprep.mubr.bf16.mxu0 %v3478_v46  ;;  %1045 = vmatprep.mubr.bf16.mxu1 %v3416_v57 }
  0xc6   :  { %676 = vmatmul.mubr.bf16.gmra.mrb[44].mxu0 %v3485_v50  ;;  %1046 = vmatmul.mubr.bf16.gmra.mrb[44].mxu1 %v3424_v62 }
  0xc7   :  { %1053 = vmatprep.mubr.bf16.mxu1 %v3428_v2  ;;  %1696 = vmatprep.mubr.bf16.mxu0 %v3380_v33  ;;  %v3148_v33 = vld [vmem:[#allocation5 + $0x220] sm:$0xff]  }
  0xce   :  { %1054 = vmatmul.mubr.bf16.gmra.mrb[48].mxu1 %v3436_v6  ;;  %1697 = vmatmul.mubr.bf16.vlgmr.msra.gmra.mrb[48].mxu0 %v3387_v36  ;;  %v3149_v36 = vld [vmem:[#allocation5 + $0x228] sm:$0xff]  }
  0xcf   :  { %2844 = vmatpush3.bf16.msra.mxu0 %v3455_v31  ;;  %1061 = vmatprep.mubr.bf16.mxu1 %v3438_v8 }
  0xd0   :  { %1704 = vmatprep.mubr.bf16.mxu0 %v3392_v42  ;;  %2845 = vmatprep.subr.bf16.mxu0 %v3142_v51  ;;  %v3150_v42 = vld [vmem:[#allocation5 + $0x230] sm:$0xff]  }
  0xd3   :  { %2846 = vmatpush3.bf16.msra.mxu0 %v3142_v51 }
  0xd4   :  { %2847 = vmatprep.subr.bf16.mxu0 %v3144_v52 }
  0xd6   :  { %1062 = vmatmul.mubr.bf16.gmra.mrb[52].mxu1 %v3442_v16  ;;  %1705 = vmatmul.mubr.bf16.gmra.mrb[52].mxu0 %v3400_v45  ;;  %v3151_v45 = vld [vmem:[#allocation5 + $0x238] sm:$0xff]  }
  0xd7   :  { %1069 = vmatprep.mubr.bf16.mxu1 %v3444_v17  ;;  %1712 = vmatprep.mubr.bf16.mxu0 %v3404_v48  ;;  %v3147_v48 = vld [vmem:[#allocation2 + $0x8] ss:$12 sps:$4 sm:$0xff]  }
  0xd8   :  { %2848 = vmatpush3.bf16.msra.mxu0 %v3144_v52 }
  0xd9   :  { %2849 = vmatprep.subr.bf16.mxu0 %v3146_v55 }
  0xdc   :  { %2850 = vmatpush3.bf16.msra.mxu0 %v3146_v55 }
  0xdd   :  { %2851 = vmatprep.subr.bf16.mxu0 %v3148_v33 }
  0xde   :  { %1070 = vmatmul.mubr.bf16.gmra.mrb[56].mxu1 %v3449_v25  ;;  %1713 = vmatmul.mubr.bf16.gmra.mrb[56].mxu0 %v3412_v53  ;;  %v3160_v53 = vld [vmem:[#allocation2 + $0xf8] ss:$12 sps:$4 sm:$0xff]  }
  0xdf   :  { %1077 = vmatprep.mubr.bf16.mxu1 %v3451_v26  ;;  %1720 = vmatprep.mubr.bf16.mxu0 %v3416_v57  ;;  %v3163_v57 = vld [vmem:[#allocation2 + $0x98] ss:$12 sps:$4 sm:$0xff]  }
  0xe0   :  { %2852 = vmatpush3.bf16.msra.mxu0 %v3148_v33 }
  0xe1   :  { %2853 = vmatprep.subr.bf16.mxu0 %v3149_v36 }
  0xe4   :  { %2854 = vmatpush3.bf16.msra.mxu0 %v3149_v36 }
  0xe5   :  { %2855 = vmatprep.subr.bf16.mxu0 %v3150_v42 }
  0xe6   :  { %1078 = vmatmul.mubr.bf16.gmra.mrb[60].mxu1 %v3460_v32  ;;  %1721 = vmatmul.mubr.bf16.gmra.mrb[60].mxu0 %v3424_v62 }
  0xe7   :  { %1085 = vmatprep.mubr.bf16.mxu1 %v3462_v35  ;;  %1728 = vmatprep.mubr.bf16.mxu0 %v3428_v2 }
  0xe8   :  { %2856 = vmatpush3.bf16.msra.mxu0 %v3150_v42 }
  0xe9   :  { %2857 = vmatprep.subr.bf16.mxu0 %v3151_v45 }
  0xec   :  { %2858 = vmatpush3.bf16.msra.mxu0 %v3151_v45 }
  0xee   :  { %1086 = vmatmul.mubr.bf16.gmra.mrb[64].mxu1 %v3468_v39  ;;  %1729 = vmatmul.mubr.bf16.gmra.mrb[64].mxu0 %v3436_v6 }
  0xef   :  { %1093 = vmatprep.mubr.bf16.mxu1 %v3470_v40  ;;  %1736 = vmatprep.mubr.bf16.mxu0 %v3438_v8 }
  0xf6   :  { %1094 = vmatmul.mubr.bf16.gmra.mrb[68].mxu1 %v3476_v44  ;;  %1737 = vmatmul.mubr.bf16.gmra.mrb[68].mxu0 %v3442_v16 }
  0xf7   :  { %2819 = vmatprep.mubr.bf16.mxu1 %v3147_v48  ;;  %1744 = vmatprep.mubr.bf16.mxu0 %v3444_v17 }
  0xfe   :  { %2820 = vmatmul.mubr.bf16.vlgmr.msra.gmra.mrb[0].mxu1 %v3372_v24  ;;  %1745 = vmatmul.mubr.bf16.gmra.mrb[72].mxu0 %v3449_v25  ;;  %v3152_v24 = vld [vmem:[#allocation2 + $0x13c] ss:$12 sps:$4 sm:$0xff]  }
  0xff   :  { %2891 = vmatpush3.bf16.msra.mxu1 %v3455_v31  ;;  %2823 = vmatprep.mubr.bf16.mxu1 %v3377_v28  ;;  %v3154_v28 = vld [vmem:[#allocation2 + $0x138] ss:$12 sps:$4 sm:$0xff]  }
 0x100   :  { %2884 = vmatprep.subr.bf16.mxu1 %v3142_v51  ;;  %1752 = vmatprep.mubr.bf16.mxu0 %v3451_v26 }
 0x103   :  { %2892 = vmatpush3.bf16.msra.mxu1 %v3142_v51 }
 0x104   :  { %2885 = vmatprep.subr.bf16.mxu1 %v3144_v52 }
 0x106   :  { %2824 = vmatmul.mubr.bf16.gmra.mrb[4].mxu1 %v3382_v34  ;;  %1753 = vmatmul.mubr.bf16.gmra.mrb[76].mxu0 %v3460_v32  ;;  %v3155_v34 = vld [vmem:[#allocation2 + $0x38] ss:$12 sps:$4 sm:$0xff]  }
 0x107   :  { %2893 = vmatpush3.bf16.msra.mxu1 %v3144_v52  ;;  %2827 = vmatprep.mubr.bf16.mxu1 %v3389_v37  ;;  %v3156_v37 = vld [vmem:[#allocation2 + $0xc8] ss:$12 sps:$4 sm:$0xff]  }
 0x108   :  { %1760 = vmatprep.mubr.bf16.mxu0 %v3462_v35  ;;  %2886 = vmatprep.subr.bf16.mxu1 %v3146_v55 }
 0x10b   :  { %2894 = vmatpush3.bf16.msra.mxu1 %v3146_v55 }
 0x10c   :  { %2887 = vmatprep.subr.bf16.mxu1 %v3148_v33 }
 0x10e   :  { %2828 = vmatmul.mubr.bf16.gmra.mrb[8].mxu1 %v3394_v43  ;;  %1761 = vmatmul.mubr.bf16.gmra.mrb[80].mxu0 %v3468_v39  ;;  %v3157_v43 = vld [vmem:[#allocation2 + $0x50] ss:$12 sps:$4 sm:$0xff]  }
 0x10f   :  { %2831 = vmatprep.mubr.bf16.mxu1 %v3402_v47  ;;  %1768 = vmatprep.mubr.bf16.mxu0 %v3470_v40  ;;  %v3158_v47 = vld [vmem:[#allocation2 + $0xe0] ss:$12 sps:$4 sm:$0xff]  }
 0x110   :  { %2895 = vmatpush3.bf16.msra.mxu1 %v3148_v33 }
 0x111   :  { %2888 = vmatprep.subr.bf16.mxu1 %v3149_v36 }
 0x114   :  { %2896 = vmatpush3.bf16.msra.mxu1 %v3149_v36 }
 0x115   :  { %2889 = vmatprep.subr.bf16.mxu1 %v3150_v42 }
 0x116   :  { %2832 = vmatmul.mubr.bf16.gmra.mrb[12].mxu1 %v3406_v49  ;;  %1769 = vmatmul.mubr.bf16.gmra.mrb[84].mxu0 %v3476_v44  ;;  %v3159_v49 = vld [vmem:[#allocation2 + $0x68] ss:$12 sps:$4 sm:$0xff]  }
 0x117   :  { %2835 = vmatprep.mubr.bf16.mxu1 %v3414_v54  ;;  %1776 = vmatprep.mubr.bf16.mxu0 %v3478_v46  ;;  %v3161_v54 = vld [vmem:[#allocation2 + $0x80] ss:$12 sps:$4 sm:$0xff]  }
 0x118   :  { %2897 = vmatpush3.bf16.msra.mxu1 %v3150_v42 }
 0x119   :  { %2890 = vmatprep.subr.bf16.mxu1 %v3151_v45 }
 0x11c   :  { %2898 = vmatpush3.bf16.msra.mxu1 %v3151_v45 }
 0x11e   :  { %2836 = vmatmul.mubr.bf16.gmra.mrb[16].mxu1 %v3418_v58  ;;  %1777 = vmatmul.mubr.bf16.gmra.mrb[88].mxu0 %v3485_v50  ;;  %v3164_v58 = vld [vmem:[#allocation2 + $0x128] ss:$12 sps:$4 sm:$0xff]  }
 0x11f   :  { %2839 = vmatprep.mubr.bf16.mxu1 %v3426_v1  ;;  %1784 = vmatprep.mubr.bf16.mxu0 %v3152_v24 }
 0x126   :  { %2840 = vmatmul.mubr.bf16.gmra.mrb[20].mxu1 %v3430_v3  ;;  %1785 = vmatmul.mubr.bf16.gmra.mrb[92].mxu0 %v3154_v28 }
 0x127   :  { %2859 = vmatprep.mubr.bf16.mxu0 %v3155_v34  ;;  %2871 = vmatprep.mubr.bf16.mxu1 %v3156_v37 }
 0x12e   :  { %2860 = vmatmul.mubr.bf16.vlgmr.msra.gmra.mrb[96].mxu0 %v3157_v43  ;;  %2872 = vmatmul.mubr.bf16.vlgmr.msra.gmra.mrb[12].mxu1 %v3158_v47 }
 0x12f   :  { %2863 = vmatprep.mubr.bf16.mxu0 %v3159_v49  ;;  %2875 = vmatprep.mubr.bf16.mxu1 %v3160_v53 }
 0x136   :  { %2864 = vmatmul.mubr.bf16.gmra.mrb[100].mxu0 %v3161_v54  ;;  %2876 = vmatmul.mubr.bf16.gmra.mrb[16].mxu1 %v3162_v56 }
 0x137   :  { %2867 = vmatprep.mubr.bf16.mxu0 %v3163_v57  ;;  %2879 = vmatprep.mubr.bf16.mxu1 %v3164_v58 }
 0x13e   :  { %2868 = vmatmul.mubr.bf16.gmra.mrb[104].mxu0 %v3165_v59  ;;  %2880 = vmatmul.mubr.bf16.gmra.mrb[20].mxu1 %v3166_v60 }
 0x141   :  { %v2455_v61 = vpop.f32.mrb[0].mxu0 }
 0x142   :  { %v2456_v62 = vpop.f32.mrb[1].mxu0 }
 0x143   :  { %v2457_v63 = vadd.f32 %v2456_v62, %v2455_v61  ;;  %v2458_v0 = vpop.f32.mrb[2].mxu0 }
 0x144   :  { %v2459_v1 = vpop.f32.mrb[3].mxu0 }
 0x145   :  { %v2460_v2 = vadd.f32 %v2459_v1, %v2458_v0 }
 0x149   :  { %v2461_v3 = vpop.f32.mrb[4].mxu0 }
 0x14a   :  { %v2462_v4 = vpop.f32.mrb[5].mxu0 }
 0x14b   :  { %v2463_v5 = vadd.f32 %v2462_v4, %v2461_v3  ;;  %v2464_v6 = vpop.f32.mrb[6].mxu0 }
 0x14c   :  { %v2465_v7 = vpop.f32.mrb[7].mxu0 }
 0x14d   :  { %v2466_v8 = vadd.f32 %v2465_v7, %v2464_v6 }
 0x151   :  { %v2467_v9 = vpop.f32.mrb[8].mxu0 }
 0x152   :  { %v2468_v10 = vpop.f32.mrb[9].mxu0 }
 0x153   :  { %v2469_v11 = vadd.f32 %v2468_v10, %v2467_v9  ;;  %v2470_v12 = vpop.f32.mrb[10].mxu0 }
 0x154   :  { %v2471_v13 = vpop.f32.mrb[11].mxu0 }
 0x155   :  { %v2472_v14 = vadd.f32 %v2471_v13, %v2470_v12 }
 0x159   :  { %v2473_v15 = vpop.f32.mrb[12].mxu0 }
 0x15a   :  { %v2474_v16 = vpop.f32.mrb[13].mxu0 }
 0x15b   :  { %v3536_v17 = vadd.f32 %v2474_v16, %v2473_v15  ;;  %v2476_v18 = vpop.f32.mrb[14].mxu0 }
 0x15c   :  { %v2477_v19 = vpop.f32.mrb[15].mxu0 }
 0x15d   :  { %v3538_v20 = vadd.f32 %v2477_v19, %v2476_v18 }
 0x161   :  { %v2479_v21 = vpop.f32.mrb[16].mxu0 }
 0x162   :  { %v2480_v22 = vpop.f32.mrb[17].mxu0 }
 0x163   :  { %v3540_v25 = vadd.f32 %v2480_v22, %v2479_v21  ;;  %v2482_v26 = vpop.f32.mrb[18].mxu0 }
 0x164   :  { %v2483_v29 = vpop.f32.mrb[19].mxu0 }
 0x165   :  { %v3542_v30 = vadd.f32 %v2483_v29, %v2482_v26 }
 0x169   :  { %v2485_v31 = vpop.f32.mrb[20].mxu0 }
 0x16a   :  { %v2486_v23 = vpop.f32.mrb[21].mxu0 }
 0x16b   :  { %v3544_v32 = vadd.f32 %v2486_v23, %v2485_v31  ;;  %v2488_v35 = vpop.f32.mrb[22].mxu0 }
 0x16c   :  { %v2489_v38 = vpop.f32.mrb[23].mxu0 }
 0x16d   :  { %v3546_v27 = vadd.f32 %v2489_v38, %v2488_v35 }
 0x171   :  { %v2491_v39 = vpop.f32.mrb[24].mxu0  ;;  %v2563_v40 = vpop.f32.mrb[24].mxu1 }
 0x172   :  { %v2492_v41 = vpop.f32.mrb[25].mxu0  ;;  %v2564_v44 = vpop.f32.mrb[25].mxu1 }
 0x173   :  { %v3548_v46 = vadd.f32 %v2492_v41, %v2491_v39  ;;  %v2565_v50 = vadd.f32 %v2564_v44, %v2563_v40  ;;  %v2494_v51 = vpop.f32.mrb[26].mxu0  ;;  %v2566_v52 = vpop.f32.mrb[26].mxu1 }
 0x174   :  { %v2495_v55 = vpop.f32.mrb[27].mxu0  ;;  %v2567_v33 = vpop.f32.mrb[27].mxu1 }
 0x175   :  { %v3550_v36 = vadd.f32 %v2495_v55, %v2494_v51  ;;  %v2568_v42 = vadd.f32 %v2567_v33, %v2566_v52  ;;  %v3552_v45 = vadd.f32 %v2565_v50, %v2457_v63 }
 0x177   :  { %v3554_v48 = vadd.f32 %v2568_v42, %v2460_v2 }
 0x179   :  { %v2497_v24 = vpop.f32.mrb[28].mxu0  ;;  %v2569_v28 = vpop.f32.mrb[28].mxu1 }
 0x17a   :  { %v2498_v34 = vpop.f32.mrb[29].mxu0  ;;  %v2570_v37 = vpop.f32.mrb[29].mxu1 }
 0x17b   :  { %v3556_v43 = vadd.f32 %v2498_v34, %v2497_v24  ;;  %v2571_v47 = vadd.f32 %v2570_v37, %v2569_v28  ;;  %v2500_v49 = vpop.f32.mrb[30].mxu0  ;;  %v2572_v53 = vpop.f32.mrb[30].mxu1 }
 0x17c   :  { %v2501_v54 = vpop.f32.mrb[31].mxu0  ;;  %v2573_v56 = vpop.f32.mrb[31].mxu1 }
 0x17d   :  { %v3558_v57 = vadd.f32 %v2501_v54, %v2500_v49  ;;  %v2574_v58 = vadd.f32 %v2573_v56, %v2572_v53  ;;  %v3560_v59 = vadd.f32 %v2571_v47, %v2463_v5 }
 0x17f   :  { %v3562_v60 = vadd.f32 %v2574_v58, %v2466_v8 }
 0x181   :  { %v2503_v61 = vpop.f32.mrb[32].mxu0  ;;  %v2575_v62 = vpop.f32.mrb[32].mxu1 }
 0x182   :  { %v2504_v63 = vpop.f32.mrb[33].mxu0  ;;  %v2576_v0 = vpop.f32.mrb[33].mxu1 }
 0x183   :  { %v3564_v1 = vadd.f32 %v2504_v63, %v2503_v61  ;;  %v2577_v2 = vadd.f32 %v2576_v0, %v2575_v62  ;;  %v2506_v3 = vpop.f32.mrb[34].mxu0  ;;  %v2578_v4 = vpop.f32.mrb[34].mxu1 }
 0x184   :  { %v2507_v6 = vpop.f32.mrb[35].mxu0  ;;  %v2579_v7 = vpop.f32.mrb[35].mxu1 }
 0x185   :  { %v3566_v9 = vadd.f32 %v2507_v6, %v2506_v3  ;;  %v2580_v10 = vadd.f32 %v2579_v7, %v2578_v4  ;;  %v3568_v12 = vadd.f32 %v2577_v2, %v2469_v11 }
 0x187   :  { %v3570_v5 = vadd.f32 %v2580_v10, %v2472_v14 }
 0x189   :  { %v2509_v8 = vpop.f32.mrb[36].mxu0  ;;  %v2581_v13 = vpop.f32.mrb[36].mxu1 }
 0x18a   :  { %v2510_v15 = vpop.f32.mrb[37].mxu0  ;;  %v2582_v16 = vpop.f32.mrb[37].mxu1 }
 0x18b   :  { %v3572_v18 = vadd.f32 %v2510_v15, %v2509_v8  ;;  %v2583_v19 = vadd.f32 %v2582_v16, %v2581_v13  ;;  %v2512_v21 = vpop.f32.mrb[38].mxu0  ;;  %v2584_v22 = vpop.f32.mrb[38].mxu1 }
 0x18c   :  { %v2513_v26 = vpop.f32.mrb[39].mxu0  ;;  %v2585_v29 = vpop.f32.mrb[39].mxu1 }
 0x18d   :  { %v3574_v31 = vadd.f32 %v2513_v26, %v2512_v21  ;;  %v2586_v23 = vadd.f32 %v2585_v29, %v2584_v22  ;;  %v3577_v35 = vadd.f32 %v2583_v19, %v3536_v17 }
 0x18f   :  { %v3580_v11 = vadd.f32 %v2586_v23, %v3538_v20 }
 0x191   :  { %v2515_v14 = vpop.f32.mrb[40].mxu0  ;;  %v2587_v38 = vpop.f32.mrb[40].mxu1 }
 0x192   :  { %v2516_v39 = vpop.f32.mrb[41].mxu0  ;;  %v2588_v40 = vpop.f32.mrb[41].mxu1 }
 0x193   :  { %v3582_v41 = vadd.f32 %v2516_v39, %v2515_v14  ;;  %v2589_v44 = vadd.f32 %v2588_v40, %v2587_v38  ;;  %v2518_v50 = vpop.f32.mrb[42].mxu0  ;;  %v2590_v51 = vpop.f32.mrb[42].mxu1 }
 0x194   :  { %v2519_v52 = vpop.f32.mrb[43].mxu0  ;;  %v2591_v55 = vpop.f32.mrb[43].mxu1 }
 0x195   :  { %v3584_v33 = vadd.f32 %v2519_v52, %v2518_v50  ;;  %v2592_v42 = vadd.f32 %v2591_v55, %v2590_v51  ;;  %v3587_v17 = vadd.f32 %v2589_v44, %v3540_v25 }
 0x197   :  { %v3590_v20 = vadd.f32 %v2592_v42, %v3542_v30 }
 0x199   :  { %v2521_v24 = vpop.f32.mrb[44].mxu0  ;;  %v2593_v28 = vpop.f32.mrb[44].mxu1 }
 0x19a   :  { %v2522_v34 = vpop.f32.mrb[45].mxu0  ;;  %v2594_v37 = vpop.f32.mrb[45].mxu1 }
 0x19b   :  { %v3592_v47 = vadd.f32 %v2522_v34, %v2521_v24  ;;  %v2595_v49 = vadd.f32 %v2594_v37, %v2593_v28  ;;  %v2524_v53 = vpop.f32.mrb[46].mxu0  ;;  %v2596_v54 = vpop.f32.mrb[46].mxu1 }
 0x19c   :  { %v2525_v56 = vpop.f32.mrb[47].mxu0  ;;  %v2597_v58 = vpop.f32.mrb[47].mxu1 }
 0x19d   :  { %v3594_v61 = vadd.f32 %v2525_v56, %v2524_v53  ;;  %v2598_v62 = vadd.f32 %v2597_v58, %v2596_v54  ;;  %v3597_v25 = vadd.f32 %v2595_v49, %v3544_v32 }
 0x19f   :  { %v3600_v30 = vadd.f32 %v2598_v62, %v3546_v27 }
 0x1a1   :  { %v2599_v63 = vpop.f32.mrb[48].mxu1  ;;  %v2671_v0 = vpop.f32.mrb[48].mxu0 }
 0x1a2   :  { %v2600_v2 = vpop.f32.mrb[49].mxu1  ;;  %v2672_v3 = vpop.f32.mrb[49].mxu0 }
 0x1a3   :  { %v2601_v4 = vadd.f32 %v2600_v2, %v2599_v63  ;;  %v3602_v6 = vadd.f32 %v2672_v3, %v2671_v0  ;;  %v2602_v7 = vpop.f32.mrb[50].mxu1  ;;  %v2674_v10 = vpop.f32.mrb[50].mxu0 }
 0x1a4   :  { %v2603_v8 = vpop.f32.mrb[51].mxu1  ;;  %v2675_v13 = vpop.f32.mrb[51].mxu0 }
 0x1a5   :  { %v3605_v15 = vadd.f32 %v2601_v4, %v3548_v46  ;;  %v2604_v16 = vadd.f32 %v2603_v8, %v2602_v7  ;;  %v3607_v32 = vadd.f32 %v2675_v13, %v2674_v10 }
 0x1a7   :  { %v3610_v27 = vadd.f32 %v2604_v16, %v3550_v36 }
 0x1a9   :  { %v2605_v19 = vpop.f32.mrb[52].mxu1  ;;  %v2677_v21 = vpop.f32.mrb[52].mxu0 }
 0x1aa   :  { %v2606_v22 = vpop.f32.mrb[53].mxu1  ;;  %v2678_v26 = vpop.f32.mrb[53].mxu0 }
 0x1ab   :  { %v2607_v29 = vadd.f32 %v2606_v22, %v2605_v19  ;;  %v3612_v23 = vadd.f32 %v2678_v26, %v2677_v21  ;;  %v2608_v14 = vpop.f32.mrb[54].mxu1  ;;  %v2680_v38 = vpop.f32.mrb[54].mxu0 }
 0x1ac   :  { %v2609_v39 = vpop.f32.mrb[55].mxu1  ;;  %v2681_v40 = vpop.f32.mrb[55].mxu0 }
 0x1ad   :  { %v3615_v46 = vadd.f32 %v2607_v29, %v3556_v43  ;;  %v2610_v44 = vadd.f32 %v2609_v39, %v2608_v14  ;;  %v3617_v50 = vadd.f32 %v2681_v40, %v2680_v38 }
 0x1af   :  { %v3620_v36 = vadd.f32 %v2610_v44, %v3558_v57 }
 0x1b1   :  { %v2611_v51 = vpop.f32.mrb[56].mxu1  ;;  %v2683_v52 = vpop.f32.mrb[56].mxu0 }
 0x1b2   :  { %v2612_v55 = vpop.f32.mrb[57].mxu1  ;;  %v2684_v42 = vpop.f32.mrb[57].mxu0 }
 0x1b3   :  { %v2613_v24 = vadd.f32 %v2612_v55, %v2611_v51  ;;  %v3622_v28 = vadd.f32 %v2684_v42, %v2683_v52  ;;  %v2614_v34 = vpop.f32.mrb[58].mxu1  ;;  %v2686_v37 = vpop.f32.mrb[58].mxu0 }
 0x1b4   :  { %v2615_v49 = vpop.f32.mrb[59].mxu1  ;;  %v2687_v53 = vpop.f32.mrb[59].mxu0 }
 0x1b5   :  { %v3625_v43 = vadd.f32 %v2613_v24, %v3564_v1  ;;  %v2616_v54 = vadd.f32 %v2615_v49, %v2614_v34  ;;  %v3627_v56 = vadd.f32 %v2687_v53, %v2686_v37 }
 0x1b7   :  { %v3630_v57 = vadd.f32 %v2616_v54, %v3566_v9 }
 0x1b9   :  { %v2617_v58 = vpop.f32.mrb[60].mxu1  ;;  %v2689_v62 = vpop.f32.mrb[60].mxu0 }
 0x1ba   :  { %v2618_v63 = vpop.f32.mrb[61].mxu1  ;;  %v2690_v0 = vpop.f32.mrb[61].mxu0 }
 0x1bb   :  { %v2619_v2 = vadd.f32 %v2618_v63, %v2617_v58  ;;  %v3632_v3 = vadd.f32 %v2690_v0, %v2689_v62  ;;  %v2620_v4 = vpop.f32.mrb[62].mxu1  ;;  %v2692_v7 = vpop.f32.mrb[62].mxu0 }
 0x1bc   :  { %v2621_v10 = vpop.f32.mrb[63].mxu1  ;;  %v2693_v8 = vpop.f32.mrb[63].mxu0 }
 0x1bd   :  { %v3635_v1 = vadd.f32 %v2619_v2, %v3572_v18  ;;  %v2622_v13 = vadd.f32 %v2621_v10, %v2620_v4  ;;  %v3637_v16 = vadd.f32 %v2693_v8, %v2692_v7 }
 0x1bf   :  { %v3640_v9 = vadd.f32 %v2622_v13, %v3574_v31 }
 0x1c1   :  { %v2623_v19 = vpop.f32.mrb[64].mxu1  ;;  %v2695_v21 = vpop.f32.mrb[64].mxu0 }
 0x1c2   :  { %v2624_v22 = vpop.f32.mrb[65].mxu1  ;;  %v2696_v26 = vpop.f32.mrb[65].mxu0 }
 0x1c3   :  { %v2625_v29 = vadd.f32 %v2624_v22, %v2623_v19  ;;  %v3642_v14 = vadd.f32 %v2696_v26, %v2695_v21  ;;  %v2626_v38 = vpop.f32.mrb[66].mxu1  ;;  %v2698_v39 = vpop.f32.mrb[66].mxu0 }
 0x1c4   :  { %v2627_v40 = vpop.f32.mrb[67].mxu1  ;;  %v2699_v44 = vpop.f32.mrb[67].mxu0 }
 0x1c5   :  { %v3645_v18 = vadd.f32 %v2625_v29, %v3582_v41  ;;  %v2628_v51 = vadd.f32 %v2627_v40, %v2626_v38  ;;  %v3647_v52 = vadd.f32 %v2699_v44, %v2698_v39 }
 0x1c7   :  { %v3650_v31 = vadd.f32 %v2628_v51, %v3584_v33 }
 0x1c9   :  { %v2629_v55 = vpop.f32.mrb[68].mxu1  ;;  %v2701_v42 = vpop.f32.mrb[68].mxu0 }
 0x1ca   :  { %v2630_v24 = vpop.f32.mrb[69].mxu1  ;;  %v2702_v34 = vpop.f32.mrb[69].mxu0 }
 0x1cb   :  { %v2631_v37 = vadd.f32 %v2630_v24, %v2629_v55  ;;  %v2703_v49 = vadd.f32 %v2702_v34, %v2701_v42  ;;  %v2632_v53 = vpop.f32.mrb[70].mxu1  ;;  %v2704_v54 = vpop.f32.mrb[70].mxu0 }
 0x1cc   :  { %v2633_v58 = vpop.f32.mrb[71].mxu1  ;;  %v2705_v62 = vpop.f32.mrb[71].mxu0 }
 0x1cd   :  { %v3653_v63 = vadd.f32 %v2631_v37, %v3592_v47  ;;  %v2634_v41 = vadd.f32 %v2633_v58, %v2632_v53  ;;  %v2706_v0 = vadd.f32 %v2705_v62, %v2704_v54 }
 0x1cf   :  { %v3656_v2 = vadd.f32 %v2634_v41, %v3594_v61 }
 0x1d1   :  { %v2821_v33 = vpop.f32.mrb[0].mxu1  ;;  %v2707_v4 = vpop.f32.mrb[72].mxu0 }
 0x1d2   :  { %v2900_v7 = vadd.f32 %v3560_v59, %v2821_v33  ;;  %v1136_v10 = vpop.f32.mrb[1].mxu1  ;;  %v2708_v8 = vpop.f32.mrb[73].mxu0 }
 0x1d3   :  { %v2904_v13 = vadd.f32 %v3552_v45, %v1136_v10  ;;  %v2709_v19 = vadd.f32 %v2708_v8, %v2707_v4  ;;  %v2822_v21 = vpop.f32.mrb[2].mxu1  ;;  %v2710_v22 = vpop.f32.mrb[74].mxu0 }
 0x1d4   :  { %v2908_v26 = vadd.f32 %v3562_v60, %v2822_v21  ;;  %v1139_v47 = vpop.f32.mrb[3].mxu1  ;;  %v2711_v29 = vpop.f32.mrb[75].mxu0  ;;  %v3662_v38 = vadd.f32 %v2900_v7, %v3612_v23 }
 0x1d5   :  { %v2912_v61 = vadd.f32 %v3554_v48, %v1139_v47  ;;  %v2712_v39 = vadd.f32 %v2711_v29, %v2710_v22  ;;  %v3666_v40 = vadd.f32 %v2904_v13, %v3602_v6  ;;  %v3669_v59 = vadd.f32 %v3605_v15, %v2709_v19 }
 0x1d6   :  { %v3672_v45 = vadd.f32 %v2908_v26, %v3617_v50 }
 0x1d7   :  { %v3675_v44 = vadd.f32 %v2912_v61, %v3607_v32  ;;  %v3678_v60 = vadd.f32 %v3610_v27, %v2712_v39 }
 0x1d9   :  { %v2825_v23 = vpop.f32.mrb[4].mxu1  ;;  %v2713_v51 = vpop.f32.mrb[76].mxu0 }
 0x1da   :  { %v2916_v48 = vadd.f32 %v3577_v35, %v2825_v23  ;;  %v1152_v55 = vpop.f32.mrb[5].mxu1  ;;  %v2714_v42 = vpop.f32.mrb[77].mxu0 }
 0x1db   :  { %v2920_v6 = vadd.f32 %v3568_v12, %v1152_v55  ;;  %v2715_v24 = vadd.f32 %v2714_v42, %v2713_v51  ;;  %v2826_v15 = vpop.f32.mrb[6].mxu1  ;;  %v2716_v34 = vpop.f32.mrb[78].mxu0 }
 0x1dc   :  { %v2924_v50 = vadd.f32 %v3580_v11, %v2826_v15  ;;  %v1155_v37 = vpop.f32.mrb[7].mxu1  ;;  %v2717_v53 = vpop.f32.mrb[79].mxu0  ;;  %v3684_v32 = vadd.f32 %v2916_v48, %v3632_v3 }
 0x1dd   :  { %v2928_v27 = vadd.f32 %v3570_v5, %v1155_v37  ;;  %v2718_v54 = vadd.f32 %v2717_v53, %v2716_v34  ;;  %v2948_v58 = vadd.f32 %v3615_v46, %v2715_v24  ;;  %v3689_v35 = vadd.f32 %v2920_v6, %v3622_v28  ;;  %v3734_v53 = vld [vmem:[#allocation7] ss:$0 sm:$0xff] }
 0x1de   :  { %v3692_v12 = vadd.f32 %v2924_v50, %v3637_v16 }
 0x1df   :  { %v2954_v62 = vadd.f32 %v3620_v36, %v2718_v54  ;;  %v3696_v11 = vadd.f32 %v2928_v27, %v3627_v56 }
 0x1e1   :  { %v2829_v41 = vpop.f32.mrb[8].mxu1  ;;  %v2719_v33 = vpop.f32.mrb[80].mxu0 }
 0x1e2   :  { %v2932_v3 = vadd.f32 %v3597_v25, %v2829_v41  ;;  %v1168_v4 = vpop.f32.mrb[9].mxu1  ;;  %v2720_v5 = vpop.f32.mrb[81].mxu0 }
 0x1e3   :  { %v2936_v7 = vadd.f32 %v3587_v17, %v1168_v4  ;;  %v2721_v46 = vadd.f32 %v2720_v5, %v2719_v33  ;;  %v2830_v10 = vpop.f32.mrb[10].mxu1  ;;  %v2722_v28 = vpop.f32.mrb[82].mxu0  ;;  %v3737_v33 = vld [vmem:[#allocation8] ss:$0 sm:$0xff] }
 0x1e4   :  { %v2940_v8 = vadd.f32 %v3600_v30, %v2830_v10  ;;  %v1171_v16 = vpop.f32.mrb[11].mxu1  ;;  %v2723_v13 = vpop.f32.mrb[83].mxu0  ;;  %v3701_v19 = vadd.f32 %v2932_v3, %v2703_v49 }
 0x1e5   :  { %v2944_v36 = vadd.f32 %v3590_v20, %v1171_v16  ;;  %v2724_v56 = vadd.f32 %v2723_v13, %v2722_v28  ;;  %v3705_v21 = vadd.f32 %v3625_v43, %v2721_v46  ;;  %v3708_v25 = vadd.f32 %v2936_v7, %v3642_v14 }
 0x1e6   :  { %v3710_v22 = vadd.f32 %v2940_v8, %v2706_v0 }
 0x1e7   :  { %v3713_v17 = vadd.f32 %v3630_v57, %v2724_v56  ;;  %v3716_v30 = vadd.f32 %v2944_v36, %v3647_v52 }
 0x1e9   :  { %v2725_v26 = vpop.f32.mrb[84].mxu0 }
 0x1ea   :  { %v2726_v49 = vpop.f32.mrb[85].mxu0 }
 0x1eb   :  { %v2727_v47 = vadd.f32 %v2726_v49, %v2725_v26  ;;  %v2728_v29 = vpop.f32.mrb[86].mxu0 }
 0x1ec   :  { %v2729_v20 = vpop.f32.mrb[87].mxu0 }
 0x1ed   :  { %v2730_v61 = vadd.f32 %v2729_v20, %v2728_v29  ;;  %v2960_v43 = vadd.f32 %v3635_v1, %v2727_v47 }
 0x1ef   :  { %v3720_v39 = vadd.f32 %v3640_v9, %v2730_v61 }
 0x1f1   :  { %v2731_v14 = vpop.f32.mrb[88].mxu0 }
 0x1f2   :  { %v2732_v0 = vpop.f32.mrb[89].mxu0 }
 0x1f3   :  { %v2733_v23 = vadd.f32 %v2732_v0, %v2731_v14  ;;  %v2734_v51 = vpop.f32.mrb[90].mxu0 }
 0x1f4   :  { %v2735_v57 = vpop.f32.mrb[91].mxu0 }
 0x1f5   :  { %v2736_v48 = vadd.f32 %v2735_v57, %v2734_v51  ;;  %v3723_v52 = vadd.f32 %v3645_v18, %v2733_v23 }
 0x1f7   :  { %v3726_v55 = vadd.f32 %v3650_v31, %v2736_v48 }
 0x1f9   :  { %v2737_v42 = vpop.f32.mrb[92].mxu0 }
 0x1fa   :  { %v2738_v6 = vpop.f32.mrb[93].mxu0 }
 0x1fb   :  { %v2739_v24 = vadd.f32 %v2738_v6, %v2737_v42  ;;  %v2740_v15 = vpop.f32.mrb[94].mxu0 }
 0x1fc   :  { %v2741_v1 = vpop.f32.mrb[95].mxu0 }
 0x1fd   :  { %v2742_v34 = vadd.f32 %v2741_v1, %v2740_v15  ;;  %v3729_v9 = vadd.f32 %v3653_v63, %v2739_v24 }
 0x1ff   :  { %v3732_v50 = vadd.f32 %v3656_v2, %v2742_v34 }
 0x201   :  { %v2861_v37 = vpop.f32.mrb[96].mxu0  ;;  %v2873_v18 = vpop.f32.mrb[12].mxu1 }
 0x202   :  { %v2902_v27 = vadd.f32 %v3662_v38, %v2861_v37  ;;  %v2949_v31 = vadd.f32 %v2948_v58, %v2873_v18  ;;  %v1827_v54 = vpop.f32.mrb[97].mxu0  ;;  %v1875_v41 = vpop.f32.mrb[13].mxu1 }
 0x203   :  { %v2906_v3 = vadd.f32 %v3666_v40, %v1827_v54  ;;  %v2952_v4 = vadd.f32 %v3669_v59, %v1875_v41  ;;  %v2862_v63 = vpop.f32.mrb[98].mxu0  ;;  %v2874_v5 = vpop.f32.mrb[14].mxu1 }
 0x204   :  { %v1955_v2 = vmul.f32 %v2902_v27, %v3734_v53  ;;  %v1967_v7 = vmul.f32 %v2949_v31, %v3734_v53  ;;  %v2910_v46 = vadd.f32 %v3672_v45, %v2862_v63  ;;  %v2955_v10 = vadd.f32 %v2954_v62, %v2874_v5  ;;  %v1830_v28 = vpop.f32.mrb[99].mxu0  ;;  %v1878_v38 = vpop.f32.mrb[15].mxu1 }
 0x205   :  { %v1953_v58 = vmul.f32 %v2906_v3, %v3734_v53  ;;  %v1965_v8 = vmul.f32 %v2952_v4, %v3734_v53  ;;  %v2914_v16 = vadd.f32 %v3675_v44, %v1830_v28  ;;  %v2958_v40 = vadd.f32 %v3678_v60, %v1878_v38 }
 0x206   :  { %v1986_v59 = vadd.f32 %v3737_v33, %v1955_v2  ;;  %v1998_v13 = vadd.f32 %v3737_v33, %v1967_v7  ;;  %v1956_v36 = vmul.f32 %v2910_v46, %v3734_v53  ;;  %v1968_v56 = vmul.f32 %v2955_v10, %v3734_v53 }
 0x207   :  { %v1984_v45 = vadd.f32 %v3737_v33, %v1953_v58  ;;  %v1996_v62 = vadd.f32 %v3737_v33, %v1965_v8  ;;  %v1954_v26 = vmul.f32 %v2914_v16, %v3734_v53  ;;  %v1966_v49 = vmul.f32 %v2958_v40, %v3734_v53 }
 0x208   :  { %v2010_v47 = vmax.f32 %v1986_v59, 0.0  ;;  %v2022_v44 = vmax.f32 %v1998_v13, 0.0  ;;  %v1987_v60 = vadd.f32 %v3737_v33, %v1956_v36  ;;  %v1999_v29 = vadd.f32 %v3737_v33, %v1968_v56 }
 0x209   :  { %v2008_v20 = vmax.f32 %v1984_v45, 0.0  ;;  %v2020_v61 = vmax.f32 %v1996_v62, 0.0  ;;  %v1985_v14 = vadd.f32 %v3737_v33, %v1954_v26  ;;  %v1997_v0 = vadd.f32 %v3737_v33, %v1966_v49  ;;  %v2865_v23 = vpop.f32.mrb[100].mxu0  ;;  %v2877_v51 = vpop.f32.mrb[16].mxu1 }
 0x20a   :  { %v2011_v57 = vmax.f32 %v1987_v60, 0.0  ;;  %v2023_v48 = vmax.f32 %v1999_v29, 0.0  ;;  %v2918_v42 = vadd.f32 %v3684_v32, %v2865_v23  ;;  %v2961_v6 = vadd.f32 %v2960_v43, %v2877_v51  ;;  %v1843_v24 = vpop.f32.mrb[101].mxu0  ;;  %v1891_v15 = vpop.f32.mrb[17].mxu1 }
 0x20b   :  { %v2009_v1 = vmax.f32 %v1985_v14, 0.0  ;;  %v2021_v34 = vmax.f32 %v1997_v0, 0.0  ;;  %v2922_v37 = vadd.f32 %v3689_v35, %v1843_v24  ;;  %v2964_v18 = vadd.f32 %v3705_v21, %v1891_v15  ;;  %v2866_v27 = vpop.f32.mrb[102].mxu0  ;;  %v2878_v31 = vpop.f32.mrb[18].mxu1 }
 0x20c   :  { %v2376_v54 = vpack.c.bf16 %v2011_v57, %v2010_v47  ;;  %v2406_v41 = vpack.c.bf16 %v2023_v48, %v2022_v44  ;;  %v1959_v3 = vmul.f32 %v2918_v42, %v3734_v53  ;;  %v1971_v4 = vmul.f32 %v2961_v6, %v3734_v53  ;;  %v1846_v63 = vpop.f32.mrb[103].mxu0  ;;  %v1894_v5 = vpop.f32.mrb[19].mxu1 }
 0x20d   :  { %v2371_v32 = vpack.c.bf16 %v2009_v1, %v2008_v20  ;;  %v2401_v43 = vpack.c.bf16 %v2021_v34, %v2020_v61  ;;  %v1957_v2 = vmul.f32 %v2922_v37, %v3734_v53  ;;  %v1969_v7 = vmul.f32 %v2964_v18, %v3734_v53 }
 0x20e   :  { %2428 = vst [vmem:[#allocation10 + $0x8] sm:$0xff] %v2376_v54   ;;  %2434 = vst [vmem:[#allocation10 + $0x38] sm:$0xff] %v2406_v41   ;;  %v2926_v35 = vadd.f32 %v3692_v12, %v2866_v27  ;;  %v2967_v21 = vadd.f32 %v3720_v39, %v2878_v31  ;;  %v2930_v46 = vadd.f32 %v3696_v11, %v1846_v63 }
 0x20f   :  { %2372 = vst [vmem:[#allocation10] sm:$0xff] %v2371_v32   ;;  %2433 = vst [vmem:[#allocation10 + $0x30] sm:$0xff] %v2401_v43   ;;  %v2970_v10 = vadd.f32 %v3713_v17, %v1894_v5  ;;  %v1990_v28 = vadd.f32 %v3737_v33, %v1959_v3  ;;  %v2002_v38 = vadd.f32 %v3737_v33, %v1971_v4 }
 0x210   :  { %v1960_v58 = vmul.f32 %v2926_v35, %v3734_v53  ;;  %v1972_v8 = vmul.f32 %v2967_v21, %v3734_v53  ;;  %v1988_v16 = vadd.f32 %v3737_v33, %v1957_v2  ;;  %v2000_v12 = vadd.f32 %v3737_v33, %v1969_v7 }
 0x211   :  { %v1958_v39 = vmul.f32 %v2930_v46, %v3734_v53  ;;  %v1970_v40 = vmul.f32 %v2970_v10, %v3734_v53  ;;  %v2869_v59 = vpop.f32.mrb[104].mxu0  ;;  %v2881_v11 = vpop.f32.mrb[20].mxu1  ;;  %v2014_v20 = vmax.f32 %v1990_v28, 0.0  ;;  %v2026_v61 = vmax.f32 %v2002_v38, 0.0 }
 0x212   :  { %v1991_v17 = vadd.f32 %v3737_v33, %v1960_v58  ;;  %v2003_v13 = vadd.f32 %v3737_v33, %v1972_v8  ;;  %v2934_v36 = vadd.f32 %v3701_v19, %v2869_v59  ;;  %v2973_v56 = vadd.f32 %v3729_v9, %v2881_v11  ;;  %v1859_v45 = vpop.f32.mrb[105].mxu0  ;;  %v1907_v62 = vpop.f32.mrb[21].mxu1 }
 0x213   :  { %v1989_v26 = vadd.f32 %v3737_v33, %v1958_v39  ;;  %v2001_v49 = vadd.f32 %v3737_v33, %v1970_v40  ;;  %v2938_v47 = vadd.f32 %v3708_v25, %v1859_v45  ;;  %v2976_v44 = vadd.f32 %v3723_v52, %v1907_v62  ;;  %v2870_v60 = vpop.f32.mrb[106].mxu0  ;;  %v2882_v29 = vpop.f32.mrb[22].mxu1 }
 0x214   :  { %v2015_v14 = vmax.f32 %v1991_v17, 0.0  ;;  %v2027_v0 = vmax.f32 %v2003_v13, 0.0  ;;  %v1862_v23 = vpop.f32.mrb[107].mxu0  ;;  %v1910_v19 = vpop.f32.mrb[23].mxu1  ;;  %v2012_v51 = vmax.f32 %v1988_v16, 0.0  ;;  %v2024_v9 = vmax.f32 %v2000_v12, 0.0 }
 0x215   :  { %v2013_v57 = vmax.f32 %v1989_v26, 0.0  ;;  %v2025_v48 = vmax.f32 %v2001_v49, 0.0  ;;  %v1963_v24 = vmul.f32 %v2934_v36, %v3734_v53  ;;  %v1975_v25 = vmul.f32 %v2973_v56, %v3734_v53 }
 0x216   :  { %v2386_v42 = vpack.c.bf16 %v2015_v14, %v2014_v20  ;;  %v2416_v6 = vpack.c.bf16 %v2027_v0, %v2026_v61  ;;  %v1961_v1 = vmul.f32 %v2938_v47, %v3734_v53  ;;  %v1973_v34 = vmul.f32 %v2976_v44, %v3734_v53 }
 0x217   :  { %v2381_v15 = vpack.c.bf16 %v2013_v57, %v2012_v51  ;;  %v2411_v52 = vpack.c.bf16 %v2025_v48, %v2024_v9  ;;  %v2942_v37 = vadd.f32 %v3710_v22, %v2870_v60  ;;  %v2979_v18 = vadd.f32 %v3732_v50, %v2882_v29 }
 0x218   :  { %2430 = vst [vmem:[#allocation10 + $0x18] sm:$0xff] %v2386_v42   ;;  %2436 = vst [vmem:[#allocation10 + $0x48] sm:$0xff] %v2416_v6   ;;  %v2946_v27 = vadd.f32 %v3716_v30, %v1862_v23  ;;  %v2982_v31 = vadd.f32 %v3726_v55, %v1910_v19  ;;  %v1994_v54 = vadd.f32 %v3737_v33, %v1963_v24 }
 0x219   :  { %2429 = vst [vmem:[#allocation10 + $0x10] sm:$0xff] %v2381_v15   ;;  %2435 = vst [vmem:[#allocation10 + $0x40] sm:$0xff] %v2411_v52   ;;  %v2006_v41 = vadd.f32 %v3737_v33, %v1975_v25  ;;  %v1964_v3 = vmul.f32 %v2942_v37, %v3734_v53  ;;  %v1976_v4 = vmul.f32 %v2979_v18, %v3734_v53 }
 0x21a   :  { %v1992_v63 = vadd.f32 %v3737_v33, %v1961_v1  ;;  %v2004_v22 = vadd.f32 %v3737_v33, %v1973_v34  ;;  %v1962_v50 = vmul.f32 %v2946_v27, %v3734_v53  ;;  %v1974_v5 = vmul.f32 %v2982_v31, %v3734_v53 }
 0x21b   :  { %v1995_v30 = vadd.f32 %v3737_v33, %v1964_v3  ;;  %v2007_v55 = vadd.f32 %v3737_v33, %v1976_v4  ;;  %v2018_v2 = vmax.f32 %v1994_v54, 0.0  ;;  %v2030_v7 = vmax.f32 %v2006_v41, 0.0 }
 0x21c   :  { %v1993_v32 = vadd.f32 %v3737_v33, %v1962_v50  ;;  %v2005_v43 = vadd.f32 %v3737_v33, %v1974_v5  ;;  %v2016_v46 = vmax.f32 %v1992_v63, 0.0  ;;  %v2028_v10 = vmax.f32 %v2004_v22, 0.0 }
 0x21d   :  { %v2019_v35 = vmax.f32 %v1995_v30, 0.0  ;;  %v2031_v21 = vmax.f32 %v2007_v55, 0.0 }
 0x21e   :  { %v2017_v28 = vmax.f32 %v1993_v32, 0.0  ;;  %v2029_v38 = vmax.f32 %v2005_v43, 0.0 }
 0x21f   :  { %v2396_v58 = vpack.c.bf16 %v2019_v35, %v2018_v2  ;;  %v2426_v53 = vpack.c.bf16 %v2031_v21, %v2030_v7 }
 0x220   :  { %v2391_v8 = vpack.c.bf16 %v2017_v28, %v2016_v46  ;;  %v2421_v16 = vpack.c.bf16 %v2029_v38, %v2028_v10 }
 0x221   :  { %2432 = vst [vmem:[#allocation10 + $0x28] sm:$0xff] %v2396_v58   ;;  %2438 = vst [vmem:[#allocation10 + $0x58] sm:$0xff] %v2426_v53  }
 0x222   :  { %2431 = vst [vmem:[#allocation10 + $0x20] sm:$0xff] %v2391_v8   ;;  %2437 = vst [vmem:[#allocation10 + $0x50] sm:$0xff] %v2421_v16  }
 0x223   :  { %3266 = shalt.err (!%p3263_p8)
}
 0x224   :  { %s3267_s19 = scalar_lea.hbm %s3826_s4, 1536 }
 0x225   :  { %p3268_p9 = scmp.ne.s32.totalorder %s3826_s4, %s3267_s19  ;;  %p3271_p10 = scmp.lt.u32.totalorder %s3267_s19, %s3826_s4 }
 0x227   :  { %p3273_p11 = pnand %p3271_p10, %p3268_p9 }
 0x229   :  { %3276 = shalt.err (!%p3273_p11)
}
 0x22a   :  { %2163 = dma.vmem_to_hbm [thread:$0]  %s2158_s15, 1536, %s3826_s4, [#allocation4], %s3286_s25, %s3286_s25, %s3287_s26  }
 0x22b   :  { %3283 = dma.done.wait [#allocation4], 1536  }
 0x22c   :  { %3284 = vsyncadd [#allocation4], 4294965760 }
 0x22d   :  { %2167 = vsyncpa [#allocation3], 1 }
 0x22e   :  { %2168 = vsyncpa [#allocation6], 1 }
 0x22f   :  { %2169 = vsyncpa [#allocation9], 1 }
 0x230   :  { %2170 = vsyncpa [#allocation4], 1 }

// kernel: resnet_forward.19
= control target key start
LH: loop header
LB: loop body
LE: loop exit
PB: predicated region body
PF: predicated region fallthrough
CT: control target
= control target key end

     0   :  { %s8019_s0 = inlined_call_operand.hbm [shape: bf16[2,128], index: 0, kind: input, shape index: {}]   ;;  %s8020_s1 = inlined_call_operand.hbm [shape: bf16[128,30720], index: 1, kind: input, shape index: {}]   ;;  %s8021_s2 = inlined_call_operand.hbm [shape: f32[1,30720], index: 2, kind: input, shape index: {}]   ;;  %s8022_s3 = inlined_call_operand.hbm [shape: f32[2,30720], index: 3, kind: output, shape index: {}]  }
   0x1   :  { %8031 = sst [smem:[#allocation14_spill]] %s8020_s1 }
   0x2   :  { %8 = vsyncpa [#allocation4], 0 }
   0x3   :  { %9 = vsyncpa [#allocation7], 0 }
   0x4   :  { %11 = vsyncpa [#allocation7 + $0x1], 0 }
   0x5   :  { %12 = vsyncpa [#allocation5], 0 }
   0x6   :  { %14 = vsyncpa [#allocation5 + $0x1], 0  ;;  %s7006_s12 = smov 0   ;;  %s7008_s13 = smov 0  }
   0x7   :  { %s7010_s14 = smov 0   ;;  %s7012_s15 = smov 0  }
   0x8   :  { %s7014_s16 = smov 0   ;;  %s7016_s17 = smov 0  }
   0x9 LB: > { %s35_s18 = sadd.s32 1, %s6971_s16  ;;  %s76_s19 = sadd.s32 1, %s6963_s14  ;;  %s6975_s17 = sphi %s7016_s17, %s20_s17   ;;  %s6971_s16 = sphi %s7014_s16, %s8054_s16   ;;  %s6967_s15 = sphi %s7012_s15, %s8053_s15   ;;  %s6963_s14 = sphi %s7010_s14, %s8052_s14   ;;  %s6959_s13 = sphi %s7008_s13, %s8051_s13   ;;  %s6955_s12 = sphi %s7006_s12, %s8050_s12  }
   0xa   : > { %p37_p0 = scmp.ge.s32.totalorder %s35_s18, 4  ;;  %p83_p1 = scmp.ne.s32.totalorder %s6963_s14, %s6959_s13 }
   0xb   : > { %p84_p2 = scmp.eq.s32.totalorder %s6975_s17, 0  ;;  %p6022_p4 = scmp.lt.s32.totalorder %s6975_s17, 4 }
   0xc   : > { %s8056_s18 = smov (%p37_p0, %s35_s18), 0  ;;  %s181_s21 = sand.u32 1, %s6975_s17  }
   0xd   : > { %8032 = sst [smem:[#allocation13_spill]] %s8056_s18  ;;  %p85_p3 = por %p84_p2, %p83_p1 }
   0xe   : > { %s72_s20 = ssub.s32 %s6971_s16, %s8056_s18  ;;  %s183_s22 = sand.u32 1, %s6963_s14  }
   0xf   : > { %p74_p5 = scmp.eq.s32.totalorder %s72_s20, 0  ;;  %s5988_s23 = smul.u32 3840, %s6971_s16 }
  0x10   : > { %s5991_s25 = smul.u32 3840, %s183_s22  ;;  %s8033_s1 = sld [smem:[#allocation14_spill]] }
  0x11   : > { %s7053_s24 = scalar_select %p74_p5, %s6963_s14, %s76_s19  }
  0x12   : > { %p7062_p6 = pnand %p6022_p4, %p85_p3  ;;  %s185_s30 = scalar_lea.vmem [#allocation6], %s5991_s25 }
  0x13   : > { %s195_s4 = sshll.u32 %s185_s30, 4  ;;  %s7068_s5 = scalar_lea.sflag [#allocation7], %s181_s21  ;;  %s7066_s4 = int_to_ptr.vmem [resolvable:$true] %s195_s4 }
  0x14   : > { %s8034_s29 = scalar_select %p7062_p6, 1, 0 }
  0x15   : > { %p8025_p8 = pneg %p7062_p6 }
  0x16   : > { %s7060_s28 = scalar_lea.hbm %s8033_s1, %s5988_s23  ;;  %s6806_s9 = scalar_lea.hbm %s8033_s1, 245760 }
  0x17   : > { %s6801_s6 = scalar_lea.hbm %s7060_s28, 61440  ;;  %p6807_p11 = scmp.lt.u32.totalorder %s7060_s28, %s8033_s1 }
  0x18   : > { %p6802_p7 = scmp.ne.s32.totalorder %s7060_s28, %s6801_s6  ;;  %p6808_p12 = scmp.lt.u32.totalorder %s6806_s9, %s6801_s6 }
  0x19   : > { %p6810_p0 = scmp.lt.u32.totalorder %s6801_s6, %s7060_s28 }
  0x1a   : > { %p6804_p9 = pnand %p8025_p8, %p6802_p7  ;;  %p6809_p13 = por %p6808_p12, %p6807_p11 }
  0x1c   : > { %p6805_p10 = pneg %p6804_p9  ;;  %p6811_p2 = por %p6810_p0, %p6809_p13 }
  0x1e   : > { %p6812_p3 = pnand %p6811_p2, %p6805_p10 }
  0x20   : > { %6815 = shalt.err (!%p6812_p3)
}
  0x21   : > { %s6816_s19 = scalar_lea.vmem %s7066_s4, 61440  ;;  %s6977_s20 = smov [#allocation6]  }
  0x22   : > { %p6817_p4 = scmp.ne.s32.totalorder %s7066_s4, %s6816_s19  ;;  %s6821_s21 = sshll.u32 %s6977_s20, 4  ;;  %s6822_s21 = int_to_ptr.vmem [resolvable:$false] %s6821_s21 }
  0x23   : > { %s6823_s23 = scalar_lea.vmem %s6822_s21, 122880  ;;  %p6824_p9 = scmp.lt.s32.totalorder %s7066_s4, %s6822_s21 }
  0x24   : > { %p6819_p5 = pnand %p6817_p4, %p8025_p8  ;;  %p6825_p11 = scmp.lt.s32.totalorder %s6823_s23, %s6816_s19 }
  0x26   : > { %p6820_p7 = pneg %p6819_p5  ;;  %p6826_p12 = por %p6825_p11, %p6824_p9 }
  0x28   : > { %p6827_p13 = pnand %p6826_p12, %p6820_p7 }
  0x2a   : > { %6830 = shalt.err (!%p6827_p13)
}
  0x2b   : > { %s6978_s25 = smov 15360   ;;  %s6979_s26 = smov 3840  }
  0x2c   : > { %s6980_s27 = smov 240   ;;  %s7097_s30 = sadd.s32 4294967295, %s6975_s17  }
  0x2d   : > { %6013 = dma.hbm_to_vmem [thread:$0]  (!%p7062_p6), %s7060_s28, 61440, %s7066_s4, %s7068_s5, %s6978_s25, %s6979_s26, %s6980_s27  }
  0x2e   : > { %s5497_s6 = sadd.s32 4294967294, %s6975_s17   ;;  %p89_p10 = scmp.ne.s32.totalorder %s6959_s13, %s6955_s12 }
  0x2f   : > { %p8024_p0 = scmp.eq.s32.totalorder %s7097_s30, 0  ;;  %p141_p2 = scmp.eq.s32.totalorder %s7097_s30, 3 }
  0x30   : > { %p147_p3 = scmp.eq.s32.totalorder %s5497_s6, 3  ;;  %p5498_p5 = scmp.ge.s32.totalorder %s6975_s17, 1 }
  0x31   : > { %p7106_p4 = por %p8024_p0, %p89_p10  ;;  %p7114_p7 = por %p141_p2, %p83_p1 }
  0x32   : > { %p7118_p9 = por %p147_p3, %p89_p10  ;;  %p154_p11 = scmp.lt.s32.totalorder %s6975_s17, 5 }
  0x33   : > { %s8035_s7 = scalar_select %p7106_p4, 1, 0 }
  0x34   : > { %s8036_s28 = scalar_select %p7114_p7, 1, 0 }
  0x35   : > { %s8037_s4 = scalar_select %p7118_p9, 1, 0 }
  0x36   : > { %s5992_s8 = smul.u32 60, %s183_s22  ;;  %p7125_p12 = pnand %p5498_p5, %p154_p11 }
  0x37   : > { %s6981_s10 = smov [#allocation3]   ;;  %s5989_s19 = smul.u32 960, %s6971_s16 }
  0x38   : > { %s8038_s9 = scalar_select %p7125_p12, 1, 0 }
  0x39   : > { %s170_s11 = sshll.u32 %s6981_s10, 4  ;;  %p6006_p13 = pneg %p7125_p12  ;;  %s171_s11 = int_to_ptr.vmem [resolvable:$true] %s170_s11 }
  0x3a   : > { %s209_s20 = scalar_lea.vmem [#allocation8], %s5992_s8  ;;  %s7141_s26 = scalar_lea.hbm %s8021_s2, %s5989_s19 }
  0x3b   : > { %s217_s21 = sshll.u32 %s209_s20, 4  ;;  %p7134_p1 = pnand %p6006_p13, %p8024_p0  ;;  %s7143_s21 = int_to_ptr.vmem [resolvable:$true] %s217_s21 }
  0x3c   : > { %s6831_s10 = scalar_lea.hbm %s8019_s0, 16 }
  0x3d   : > { %p6832_p10 = scmp.ne.s32.totalorder %s8019_s0, %s6831_s10  ;;  %p6833_p2 = pneg %p7134_p1 }
  0x3e   : > { %p6838_p11 = scmp.lt.u32.totalorder %s6831_s10, %s8019_s0 }
  0x3f   : > { %p6834_p3 = pnand %p6833_p2, %p6832_p10 }
  0x41   : > { %p6835_p5 = pneg %p6834_p3 }
  0x43   : > { %p6840_p13 = pnand %p6838_p11, %p6835_p5 }
  0x45   : > { %6843 = shalt.err (!%p6840_p13)
}
  0x46   : > { %s6844_s19 = scalar_lea.vmem %s171_s11, 16  ;;  %s6851_s25 = scalar_lea.vmem %s171_s11, 32 }
  0x47   : > { %p6845_p0 = scmp.ne.s32.totalorder %s171_s11, %s6844_s19  ;;  %p6852_p7 = scmp.lt.s32.totalorder %s171_s11, %s171_s11 }
  0x48   : > { %p6853_p4 = scmp.lt.s32.totalorder %s6851_s25, %s6844_s19 }
  0x49   : > { %p6847_p8 = pnand %p6845_p0, %p6833_p2 }
  0x4a   : > { %p6854_p12 = por %p6853_p4, %p6852_p7 }
  0x4b   : > { %p6848_p9 = pneg %p6847_p8 }
  0x4d   : > { %p6855_p6 = pnand %p6854_p12, %p6848_p9 }
  0x4f   : > { %6858 = shalt.err (!%p6855_p6)
}
  0x50   : > { %6009 = dma.hbm_to_vmem [thread:$0]  (!%p7134_p1), %s8019_s0, 16, %s171_s11, [#allocation4]  }
  0x51   : > { %s6859_s1 = scalar_lea.hbm %s7141_s26, 960  ;;  %p8040_p8 = scmp.ne.s32.totalorder %s8034_s29, 0 }
  0x52   : > { %p6860_p0 = scmp.ne.s32.totalorder %s7141_s26, %s6859_s1  ;;  %s6864_s10 = scalar_lea.hbm %s8021_s2, 3840 }
  0x53   : > { %p8041_p10 = pneg %p8040_p8  ;;  %p6865_p6 = scmp.lt.u32.totalorder %s7141_s26, %s8021_s2 }
  0x54   : > { %p6866_p4 = scmp.lt.u32.totalorder %s6864_s10, %s6859_s1  ;;  %p6868_p9 = scmp.lt.u32.totalorder %s6859_s1, %s7141_s26 }
  0x55   : > { %p6862_p2 = pnand %p6860_p0, %p8041_p10 }
  0x56   : > { %p6867_p7 = por %p6866_p4, %p6865_p6 }
  0x57   : > { %p6863_p3 = pneg %p6862_p2 }
  0x58   : > { %p6869_p12 = por %p6868_p9, %p6867_p7 }
  0x5a   : > { %p6870_p5 = pnand %p6869_p12, %p6863_p3 }
  0x5c   : > { %6873 = shalt.err (!%p6870_p5)
}
  0x5d   : > { %s6874_s11 = scalar_lea.vmem %s7143_s21, 960  ;;  %p8042_p11 = pmov %p8041_p10 }
  0x5e   : > { %p6875_p1 = scmp.ne.s32.totalorder %s7143_s21, %s6874_s11  ;;  %s6982_s20 = smov [#allocation8]  }
  0x5f   : > { %s6879_s19 = sshll.u32 %s6982_s20, 4  ;;  %s6880_s19 = int_to_ptr.vmem [resolvable:$false] %s6879_s19 }
  0x60   : > { %p6877_p13 = pnand %p6875_p1, %p8042_p11  ;;  %s6881_s25 = scalar_lea.vmem %s6880_s19, 1920 }
  0x61   : > { %p6882_p10 = scmp.lt.s32.totalorder %s7143_s21, %s6880_s19  ;;  %p6883_p2 = scmp.lt.s32.totalorder %s6881_s25, %s6874_s11 }
  0x62   : > { %p6878_p0 = pneg %p6877_p13 }
  0x63   : > { %p6884_p6 = por %p6883_p2, %p6882_p10 }
  0x65   : > { %p6885_p4 = pnand %p6884_p6, %p6878_p0 }
  0x67   : > { %6888 = shalt.err (!%p6885_p4)
}
  0x68   : > { %6016 = dma.hbm_to_vmem [thread:$0]  (!%p8040_p8), %s7141_s26, 960, %s7143_s21, %s7068_s5  }
  0x69   : > { %p8043_p3 = scmp.ne.s32.totalorder %s8038_s9, 0 }
  0x6a   : > { %p8044_p7 = scmp.eq.s32.totalorder (!%p8043_p3), %s7097_s30, 0 }
  0x6b   : > { %226 = sbr.rel (%p8043_p3) target bundleno = 837 (0x345), region = 32 }
  0x72   : > { %6942 = dma.done.wait (%p8044_p7), [#allocation4], 16   ;;  %p8045_p9 = pmov %p8044_p7 }
  0x73   : > { %s232_s22 = sand.u32 1, %s7097_s30   ;;  %s7193_s27 = sand.u32 1, %s6959_s13  }
  0x74   : > { %6944 = vsyncadd (%p8045_p9), [#allocation4], 4294967280  ;;  %s5993_s29 = smul.u32 3840, %s7193_s27  ;;  %s233_s1 = scalar_lea.sflag [#allocation7], %s232_s22 }
  0x75   : > { %p8046_p8 = scmp.ne.s32.totalorder %s8035_s7, 0 }
  0x76   : > { %s7196_s18 = scalar_lea.vmem [#allocation6], %s5993_s29 }
  0x77   : > { %6946 = dma.done.wait (%p8046_p8), %s233_s1, 62400  }
  0x78   : > { %6948 = vsyncadd (%p8046_p8), %s233_s1, 4294904896  ;;  %v6983_v0 = vmov 0   ;;  %v6079_v1 = vld [vmem:[%s7196_s18 + $0x4] ss:$240 sps:$4 sm:$0xff]   ;;  %v6081_v2 = vld [vmem:[%s7196_s18 + $0xc] ss:$240 sps:$4 sm:$0xff]  }
  0x79   : > { %3225 = vmatprep.mubr.bf16.mxu0 %v6983_v0  ;;  %3266 = vmatprep.mubr.bf16.mxu1 %v6983_v0  ;;  %v6083_v3 = vld [vmem:[%s7196_s18] ss:$240 sps:$4 sm:$0xff]   ;;  %v6084_v4 = vld [vmem:[%s7196_s18 + $0x8] ss:$240 sps:$4 sm:$0xff]   ;;  %v6085_v5 = vld [vmem:[%s7196_s18 + $0x1e4] ss:$240 sps:$4 sm:$0xff]  }
  0x7a   : > { %3193 = vmatprep.subr.bf16.mxu0 %v6079_v1  ;;  %3234 = vmatprep.subr.bf16.mxu1 %v6081_v2  ;;  %v6087_v6 = vld [vmem:[%s7196_s18 + $0x1ec] ss:$240 sps:$4 sm:$0xff]   ;;  %v6089_v7 = vld [vmem:[%s7196_s18 + $0x1e0] ss:$240 sps:$4 sm:$0xff]   ;;  %v6090_v8 = vld [vmem:[%s7196_s18 + $0x1e8] ss:$240 sps:$4 sm:$0xff]  }
  0x7b   : > { %3194 = vmatpush1.bf16.msra.mxu0 %v6083_v3  ;;  %3235 = vmatpush1.bf16.msra.mxu1 %v6084_v4  ;;  %v6091_v9 = vld [vmem:[%s7196_s18 + $0x3c4] ss:$240 sps:$4 sm:$0xff]   ;;  %v6093_v10 = vld [vmem:[%s7196_s18 + $0x3cc] ss:$240 sps:$4 sm:$0xff]   ;;  %v6095_v11 = vld [vmem:[%s7196_s18 + $0x3c0] ss:$240 sps:$4 sm:$0xff]  }
  0x7c   : > { %3195 = vmatprep.subr.bf16.mxu0 %v6085_v5  ;;  %3236 = vmatprep.subr.bf16.mxu1 %v6087_v6  ;;  %v6096_v12 = vld [vmem:[%s7196_s18 + $0x3c8] ss:$240 sps:$4 sm:$0xff]   ;;  %v6097_v13 = vld [vmem:[%s7196_s18 + $0x5a4] ss:$240 sps:$4 sm:$0xff]   ;;  %v6099_v14 = vld [vmem:[%s7196_s18 + $0x5ac] ss:$240 sps:$4 sm:$0xff]  }
  0x7d   : > { %v6101_v15 = vld [vmem:[%s7196_s18 + $0x5a0] ss:$240 sps:$4 sm:$0xff]   ;;  %v6102_v16 = vld [vmem:[%s7196_s18 + $0x5a8] ss:$240 sps:$4 sm:$0xff]   ;;  %v6103_v17 = vld [vmem:[%s7196_s18 + $0x784] ss:$240 sps:$4 sm:$0xff]  }
  0x7e   : > { %v6105_v18 = vld [vmem:[%s7196_s18 + $0x78c] ss:$240 sps:$4 sm:$0xff]   ;;  %v6107_v19 = vld [vmem:[%s7196_s18 + $0x780] ss:$240 sps:$4 sm:$0xff]   ;;  %v6108_v20 = vld [vmem:[%s7196_s18 + $0x788] ss:$240 sps:$4 sm:$0xff]  }
  0x7f   : > { %3196 = vmatpush1.bf16.msra.mxu0 %v6089_v7  ;;  %3237 = vmatpush1.bf16.msra.mxu1 %v6090_v8  ;;  %v6109_v21 = vld [vmem:[%s7196_s18 + $0x964] ss:$240 sps:$4 sm:$0xff]   ;;  %v6111_v22 = vld [vmem:[%s7196_s18 + $0x96c] ss:$240 sps:$4 sm:$0xff]   ;;  %v6113_v23 = vld [vmem:[%s7196_s18 + $0x960] ss:$240 sps:$4 sm:$0xff]  }
  0x80   : > { %3197 = vmatprep.subr.bf16.mxu0 %v6091_v9  ;;  %3238 = vmatprep.subr.bf16.mxu1 %v6093_v10  ;;  %v6114_v24 = vld [vmem:[%s7196_s18 + $0x968] ss:$240 sps:$4 sm:$0xff]   ;;  %v6115_v25 = vld [vmem:[%s7196_s18 + $0xb44] ss:$240 sps:$4 sm:$0xff]   ;;  %v6117_v26 = vld [vmem:[%s7196_s18 + $0xb4c] ss:$240 sps:$4 sm:$0xff]  }
  0x81   : > { %v6119_v27 = vld [vmem:[%s7196_s18 + $0xb40] ss:$240 sps:$4 sm:$0xff]   ;;  %v6120_v28 = vld [vmem:[%s7196_s18 + $0xb48] ss:$240 sps:$4 sm:$0xff]   ;;  %v6121_v29 = vld [vmem:[%s7196_s18 + $0xd24] ss:$240 sps:$4 sm:$0xff]  }
  0x82   : > { %v6123_v30 = vld [vmem:[%s7196_s18 + $0xd2c] ss:$240 sps:$4 sm:$0xff]   ;;  %v6125_v31 = vld [vmem:[%s7196_s18 + $0xd20] ss:$240 sps:$4 sm:$0xff]   ;;  %v6126_v32 = vld [vmem:[%s7196_s18 + $0xd28] ss:$240 sps:$4 sm:$0xff]  }
  0x83   : > { %3198 = vmatpush1.bf16.msra.mxu0 %v6095_v11  ;;  %3239 = vmatpush1.bf16.msra.mxu1 %v6096_v12  ;;  %v6129_v33 = vld [vmem:[%s7196_s18 + $0x14] ss:$240 sps:$4 sm:$0xff]   ;;  %v6132_v34 = vld [vmem:[%s7196_s18 + $0x1c] ss:$240 sps:$4 sm:$0xff]   ;;  %v6127_v36 = vld [vmem:[%s7196_s18 + $0x10] ss:$240 sps:$4 sm:$0xff]  }
  0x84   : > { %3199 = vmatprep.subr.bf16.mxu0 %v6097_v13  ;;  %3240 = vmatprep.subr.bf16.mxu1 %v6099_v14  ;;  %v7238_v35 = vld [vmem:[#allocation3] sm:$0x1]  ;;  %v6130_v37 = vld [vmem:[%s7196_s18 + $0x18] ss:$240 sps:$4 sm:$0xff]   ;;  %v6135_v38 = vld [vmem:[%s7196_s18 + $0x1f4] ss:$240 sps:$4 sm:$0xff]  }
  0x85   : > { %v6138_v39 = vld [vmem:[%s7196_s18 + $0x1fc] ss:$240 sps:$4 sm:$0xff]   ;;  %v6133_v40 = vld [vmem:[%s7196_s18 + $0x1f0] ss:$240 sps:$4 sm:$0xff]   ;;  %v6136_v41 = vld [vmem:[%s7196_s18 + $0x1f8] ss:$240 sps:$4 sm:$0xff]  }
  0x86   : > { %v6141_v42 = vld [vmem:[%s7196_s18 + $0x3d4] ss:$240 sps:$4 sm:$0xff]   ;;  %v6144_v43 = vld [vmem:[%s7196_s18 + $0x3dc] ss:$240 sps:$4 sm:$0xff]   ;;  %v6139_v44 = vld [vmem:[%s7196_s18 + $0x3d0] ss:$240 sps:$4 sm:$0xff]  }
  0x87   : > { %3200 = vmatpush1.bf16.msra.mxu0 %v6101_v15  ;;  %3241 = vmatpush1.bf16.msra.mxu1 %v6102_v16  ;;  %v6142_v45 = vld [vmem:[%s7196_s18 + $0x3d8] ss:$240 sps:$4 sm:$0xff]   ;;  %v6147_v46 = vld [vmem:[%s7196_s18 + $0x5b4] ss:$240 sps:$4 sm:$0xff]   ;;  %v6150_v47 = vld [vmem:[%s7196_s18 + $0x5bc] ss:$240 sps:$4 sm:$0xff]  }
  0x88   : > { %3201 = vmatprep.subr.bf16.mxu0 %v6103_v17  ;;  %3242 = vmatprep.subr.bf16.mxu1 %v6105_v18  ;;  %v6145_v48 = vld [vmem:[%s7196_s18 + $0x5b0] ss:$240 sps:$4 sm:$0xff]   ;;  %v6148_v49 = vld [vmem:[%s7196_s18 + $0x5b8] ss:$240 sps:$4 sm:$0xff]   ;;  %v6153_v50 = vld [vmem:[%s7196_s18 + $0x794] ss:$240 sps:$4 sm:$0xff]  }
  0x89   : > { %v6156_v51 = vld [vmem:[%s7196_s18 + $0x79c] ss:$240 sps:$4 sm:$0xff]   ;;  %v6151_v52 = vld [vmem:[%s7196_s18 + $0x790] ss:$240 sps:$4 sm:$0xff]   ;;  %v6154_v53 = vld [vmem:[%s7196_s18 + $0x798] ss:$240 sps:$4 sm:$0xff]  }
  0x8a   : > { %v6159_v54 = vld [vmem:[%s7196_s18 + $0x974] ss:$240 sps:$4 sm:$0xff]   ;;  %v6162_v55 = vld [vmem:[%s7196_s18 + $0x97c] ss:$240 sps:$4 sm:$0xff]   ;;  %v6157_v56 = vld [vmem:[%s7196_s18 + $0x970] ss:$240 sps:$4 sm:$0xff]  }
  0x8b   : > { %3202 = vmatpush1.bf16.msra.mxu0 %v6107_v19  ;;  %3243 = vmatpush1.bf16.msra.mxu1 %v6108_v20  ;;  %v6160_v57 = vld [vmem:[%s7196_s18 + $0x978] ss:$240 sps:$4 sm:$0xff]   ;;  %v6165_v58 = vld [vmem:[%s7196_s18 + $0xb54] ss:$240 sps:$4 sm:$0xff]   ;;  %v6168_v59 = vld [vmem:[%s7196_s18 + $0xb5c] ss:$240 sps:$4 sm:$0xff]  }
  0x8c   : > { %3203 = vmatprep.subr.bf16.mxu0 %v6109_v21  ;;  %3244 = vmatprep.subr.bf16.mxu1 %v6111_v22  ;;  %v6163_v60 = vld [vmem:[%s7196_s18 + $0xb50] ss:$240 sps:$4 sm:$0xff]   ;;  %v6166_v61 = vld [vmem:[%s7196_s18 + $0xb58] ss:$240 sps:$4 sm:$0xff]   ;;  %v6171_v62 = vld [vmem:[%s7196_s18 + $0xd34] ss:$240 sps:$4 sm:$0xff]  }
  0x8d   : > { %v6174_v63 = vld [vmem:[%s7196_s18 + $0xd3c] ss:$240 sps:$4 sm:$0xff]   ;;  %v6169_v1 = vld [vmem:[%s7196_s18 + $0xd30] ss:$240 sps:$4 sm:$0xff]   ;;  %v6172_v2 = vld [vmem:[%s7196_s18 + $0xd38] ss:$240 sps:$4 sm:$0xff]  }
  0x8e   : > { %v6177_v3 = vld [vmem:[%s7196_s18 + $0x24] ss:$240 sps:$4 sm:$0xff]   ;;  %v6180_v4 = vld [vmem:[%s7196_s18 + $0x2c] ss:$240 sps:$4 sm:$0xff]   ;;  %v6175_v5 = vld [vmem:[%s7196_s18 + $0x20] ss:$240 sps:$4 sm:$0xff]  }
  0x8f   : > { %3204 = vmatpush1.bf16.msra.mxu0 %v6113_v23  ;;  %3245 = vmatpush1.bf16.msra.mxu1 %v6114_v24  ;;  %v6178_v6 = vld [vmem:[%s7196_s18 + $0x28] ss:$240 sps:$4 sm:$0xff]   ;;  %v6183_v7 = vld [vmem:[%s7196_s18 + $0x204] ss:$240 sps:$4 sm:$0xff]   ;;  %v6186_v8 = vld [vmem:[%s7196_s18 + $0x20c] ss:$240 sps:$4 sm:$0xff]  }
  0x90   : > { %3205 = vmatprep.subr.bf16.mxu0 %v6115_v25  ;;  %3246 = vmatprep.subr.bf16.mxu1 %v6117_v26  ;;  %v6181_v9 = vld [vmem:[%s7196_s18 + $0x200] ss:$240 sps:$4 sm:$0xff]   ;;  %v6184_v10 = vld [vmem:[%s7196_s18 + $0x208] ss:$240 sps:$4 sm:$0xff]   ;;  %v6189_v11 = vld [vmem:[%s7196_s18 + $0x3e4] ss:$240 sps:$4 sm:$0xff]  }
  0x91   : > { %v6192_v12 = vld [vmem:[%s7196_s18 + $0x3ec] ss:$240 sps:$4 sm:$0xff]   ;;  %v6187_v13 = vld [vmem:[%s7196_s18 + $0x3e0] ss:$240 sps:$4 sm:$0xff]   ;;  %v6190_v14 = vld [vmem:[%s7196_s18 + $0x3e8] ss:$240 sps:$4 sm:$0xff]  }
  0x92   : > { %v6195_v15 = vld [vmem:[%s7196_s18 + $0x5c4] ss:$240 sps:$4 sm:$0xff]   ;;  %v6198_v16 = vld [vmem:[%s7196_s18 + $0x5cc] ss:$240 sps:$4 sm:$0xff]   ;;  %v6193_v17 = vld [vmem:[%s7196_s18 + $0x5c0] ss:$240 sps:$4 sm:$0xff]  }
  0x93   : > { %3206 = vmatpush1.bf16.msra.mxu0 %v6119_v27  ;;  %3247 = vmatpush1.bf16.msra.mxu1 %v6120_v28  ;;  %v6196_v18 = vld [vmem:[%s7196_s18 + $0x5c8] ss:$240 sps:$4 sm:$0xff]   ;;  %v6201_v19 = vld [vmem:[%s7196_s18 + $0x7a4] ss:$240 sps:$4 sm:$0xff]   ;;  %v6204_v20 = vld [vmem:[%s7196_s18 + $0x7ac] ss:$240 sps:$4 sm:$0xff]  }
  0x94   : > { %3207 = vmatprep.subr.bf16.mxu0 %v6121_v29  ;;  %3248 = vmatprep.subr.bf16.mxu1 %v6123_v30  ;;  %v6199_v21 = vld [vmem:[%s7196_s18 + $0x7a0] ss:$240 sps:$4 sm:$0xff]   ;;  %v6202_v22 = vld [vmem:[%s7196_s18 + $0x7a8] ss:$240 sps:$4 sm:$0xff]   ;;  %v6207_v23 = vld [vmem:[%s7196_s18 + $0x984] ss:$240 sps:$4 sm:$0xff]  }
  0x95   : > { %v6210_v24 = vld [vmem:[%s7196_s18 + $0x98c] ss:$240 sps:$4 sm:$0xff]   ;;  %v6205_v25 = vld [vmem:[%s7196_s18 + $0x980] ss:$240 sps:$4 sm:$0xff]   ;;  %v6208_v26 = vld [vmem:[%s7196_s18 + $0x988] ss:$240 sps:$4 sm:$0xff]  }
  0x96   : > { %v6213_v27 = vld [vmem:[%s7196_s18 + $0xb64] ss:$240 sps:$4 sm:$0xff]   ;;  %v6216_v28 = vld [vmem:[%s7196_s18 + $0xb6c] ss:$240 sps:$4 sm:$0xff]   ;;  %v6211_v29 = vld [vmem:[%s7196_s18 + $0xb60] ss:$240 sps:$4 sm:$0xff]  }
  0x97   : > { %3208 = vmatpush1.bf16.msra.mxu0 %v6125_v31  ;;  %3249 = vmatpush1.bf16.msra.mxu1 %v6126_v32  ;;  %v6214_v30 = vld [vmem:[%s7196_s18 + $0xb68] ss:$240 sps:$4 sm:$0xff]   ;;  %v6219_v31 = vld [vmem:[%s7196_s18 + $0xd44] ss:$240 sps:$4 sm:$0xff]   ;;  %v6222_v32 = vld [vmem:[%s7196_s18 + $0xd4c] ss:$240 sps:$4 sm:$0xff]  }
  0x98   : > { %3275 = vmatprep.subr.bf16.mxu0 %v6129_v33  ;;  %3316 = vmatprep.subr.bf16.mxu1 %v6132_v34  ;;  %v6217_v33 = vld [vmem:[%s7196_s18 + $0xd40] ss:$240 sps:$4 sm:$0xff]   ;;  %v6220_v34 = vld [vmem:[%s7196_s18 + $0xd48] ss:$240 sps:$4 sm:$0xff]   ;;  %s5994_s5 = smul.u32 60, %s7193_s27  ;;  %s5358_s8 = scalar_lea.sflag [#allocation5], %s7193_s27 }
  0x99   : > { %s5995_s7 = smul.u32 120, %s7193_s27  ;;  %p8047_p5 = scmp.ne.s32.totalorder %s8036_s28, 0 }
  0x9a   : > { %3226 = vmatmul.mubr.bf16.vlgmr.msra.gmra.mrb[0].mxu0 %v7238_v35  ;;  %3267 = vmatmul.mubr.bf16.vlgmr.msra.gmra.mrb[0].mxu1 %v7238_v35  ;;  %s7490_s30 = scalar_lea.vmem [#allocation8], %s5994_s5  ;;  %s5990_s21 = smul.u32 1920, %s6967_s15 }
  0x9b   : > { %3276 = vmatpush1.bf16.msra.mxu0 %v6127_v36  ;;  %3317 = vmatpush1.bf16.msra.mxu1 %v6130_v37  ;;  %v6225_v36 = vld [vmem:[%s7196_s18 + $0x34] ss:$240 sps:$4 sm:$0xff]   ;;  %v6228_v37 = vld [vmem:[%s7196_s18 + $0x3c] ss:$240 sps:$4 sm:$0xff]   ;;  %s7531_s9 = scalar_lea.vmem [#allocation9], %s5995_s7  ;;  %s6985_s15 = smov [#allocation9]  }
  0x9c   : > { %3277 = vmatprep.subr.bf16.mxu0 %v6135_v38  ;;  %3318 = vmatprep.subr.bf16.mxu1 %v6138_v39  ;;  %v6223_v38 = vld [vmem:[%s7196_s18 + $0x30] ss:$240 sps:$4 sm:$0xff]   ;;  %v6226_v39 = vld [vmem:[%s7196_s18 + $0x38] ss:$240 sps:$4 sm:$0xff]   ;;  %s5374_s26 = sshll.u32 %s7531_s9, 4  ;;  %s7970_s23 = scalar_lea.hbm %s8022_s3, %s5990_s21  ;;  %s7972_s26 = int_to_ptr.vmem [resolvable:$true] %s5374_s26 }
  0x9d   : > { %3307 = vmatprep.mubr.bf16.mxu0 %v6983_v0  ;;  %3348 = vmatprep.mubr.bf16.mxu1 %v6983_v0  ;;  %s6889_s11 = scalar_lea.vmem %s7972_s26, 1920  ;;  %s6893_s20 = sshll.u32 %s6985_s15, 4  ;;  %s6894_s20 = int_to_ptr.vmem [resolvable:$false] %s6893_s20 }
  0x9e   : > { %p6890_p12 = scmp.ne.s32.totalorder %s7972_s26, %s6889_s11  ;;  %s6895_s19 = scalar_lea.vmem %s6894_s20, 3840 }
  0x9f   : > { %3278 = vmatpush1.bf16.msra.mxu0 %v6133_v40  ;;  %3319 = vmatpush1.bf16.msra.mxu1 %v6136_v41  ;;  %v6231_v40 = vld [vmem:[%s7196_s18 + $0x214] ss:$240 sps:$4 sm:$0xff]   ;;  %v6234_v41 = vld [vmem:[%s7196_s18 + $0x21c] ss:$240 sps:$4 sm:$0xff]   ;;  %p6896_p13 = scmp.lt.s32.totalorder %s7972_s26, %s6894_s20  ;;  %p6897_p0 = scmp.lt.s32.totalorder %s6895_s19, %s6889_s11 }
  0xa0   : > { %3279 = vmatprep.subr.bf16.mxu0 %v6141_v42  ;;  %3320 = vmatprep.subr.bf16.mxu1 %v6144_v43  ;;  %v6229_v42 = vld [vmem:[%s7196_s18 + $0x210] ss:$240 sps:$4 sm:$0xff]   ;;  %v6232_v43 = vld [vmem:[%s7196_s18 + $0x218] ss:$240 sps:$4 sm:$0xff]   ;;  %p6891_p1 = pnand %p6890_p12, %p8047_p5 }
  0xa1   : > { %p6898_p10 = por %p6897_p0, %p6896_p13 }
  0xa2   : > { %p6892_p11 = pneg %p6891_p1 }
  0xa3   : > { %3280 = vmatpush1.bf16.msra.mxu0 %v6139_v44  ;;  %3321 = vmatpush1.bf16.msra.mxu1 %v6142_v45  ;;  %v6237_v44 = vld [vmem:[%s7196_s18 + $0x3f4] ss:$240 sps:$4 sm:$0xff]   ;;  %v6240_v45 = vld [vmem:[%s7196_s18 + $0x3fc] ss:$240 sps:$4 sm:$0xff]  }
  0xa4   : > { %3281 = vmatprep.subr.bf16.mxu0 %v6147_v46  ;;  %3322 = vmatprep.subr.bf16.mxu1 %v6150_v47  ;;  %v6235_v46 = vld [vmem:[%s7196_s18 + $0x3f0] ss:$240 sps:$4 sm:$0xff]   ;;  %v6238_v47 = vld [vmem:[%s7196_s18 + $0x3f8] ss:$240 sps:$4 sm:$0xff]   ;;  %p6899_p2 = pnand %p6898_p10, %p6892_p11 }
  0xa7   : > { %3282 = vmatpush1.bf16.msra.mxu0 %v6145_v48  ;;  %3323 = vmatpush1.bf16.msra.mxu1 %v6148_v49  ;;  %v6243_v48 = vld [vmem:[%s7196_s18 + $0x5d4] ss:$240 sps:$4 sm:$0xff]   ;;  %v6246_v49 = vld [vmem:[%s7196_s18 + $0x5dc] ss:$240 sps:$4 sm:$0xff]  }
  0xa8   : > { %3283 = vmatprep.subr.bf16.mxu0 %v6153_v50  ;;  %3324 = vmatprep.subr.bf16.mxu1 %v6156_v51  ;;  %v6241_v50 = vld [vmem:[%s7196_s18 + $0x5d0] ss:$240 sps:$4 sm:$0xff]   ;;  %v6244_v51 = vld [vmem:[%s7196_s18 + $0x5d8] ss:$240 sps:$4 sm:$0xff]  }
  0xab   : > { %3284 = vmatpush1.bf16.msra.mxu0 %v6151_v52  ;;  %3325 = vmatpush1.bf16.msra.mxu1 %v6154_v53  ;;  %v6249_v52 = vld [vmem:[%s7196_s18 + $0x7b4] ss:$240 sps:$4 sm:$0xff]   ;;  %v6252_v53 = vld [vmem:[%s7196_s18 + $0x7bc] ss:$240 sps:$4 sm:$0xff]  }
  0xac   : > { %3285 = vmatprep.subr.bf16.mxu0 %v6159_v54  ;;  %3326 = vmatprep.subr.bf16.mxu1 %v6162_v55  ;;  %v6247_v54 = vld [vmem:[%s7196_s18 + $0x7b0] ss:$240 sps:$4 sm:$0xff]   ;;  %v6250_v55 = vld [vmem:[%s7196_s18 + $0x7b8] ss:$240 sps:$4 sm:$0xff]  }
  0xaf   : > { %3286 = vmatpush1.bf16.msra.mxu0 %v6157_v56  ;;  %3327 = vmatpush1.bf16.msra.mxu1 %v6160_v57  ;;  %v6255_v56 = vld [vmem:[%s7196_s18 + $0x994] ss:$240 sps:$4 sm:$0xff]   ;;  %v6258_v57 = vld [vmem:[%s7196_s18 + $0x99c] ss:$240 sps:$4 sm:$0xff]  }
  0xb0   : > { %3287 = vmatprep.subr.bf16.mxu0 %v6165_v58  ;;  %3328 = vmatprep.subr.bf16.mxu1 %v6168_v59  ;;  %v6253_v58 = vld [vmem:[%s7196_s18 + $0x990] ss:$240 sps:$4 sm:$0xff]   ;;  %v6256_v59 = vld [vmem:[%s7196_s18 + $0x998] ss:$240 sps:$4 sm:$0xff]  }
  0xb3   : > { %3288 = vmatpush1.bf16.msra.mxu0 %v6163_v60  ;;  %3329 = vmatpush1.bf16.msra.mxu1 %v6166_v61  ;;  %v6261_v60 = vld [vmem:[%s7196_s18 + $0xb74] ss:$240 sps:$4 sm:$0xff]   ;;  %v6264_v61 = vld [vmem:[%s7196_s18 + $0xb7c] ss:$240 sps:$4 sm:$0xff]  }
  0xb4   : > { %3289 = vmatprep.subr.bf16.mxu0 %v6171_v62  ;;  %3330 = vmatprep.subr.bf16.mxu1 %v6174_v63  ;;  %v6259_v62 = vld [vmem:[%s7196_s18 + $0xb70] ss:$240 sps:$4 sm:$0xff]   ;;  %v6262_v63 = vld [vmem:[%s7196_s18 + $0xb78] ss:$240 sps:$4 sm:$0xff]  }
  0xb7   : > { %3290 = vmatpush1.bf16.msra.mxu0 %v6169_v1  ;;  %3331 = vmatpush1.bf16.msra.mxu1 %v6172_v2  ;;  %v6267_v1 = vld [vmem:[%s7196_s18 + $0xd54] ss:$240 sps:$4 sm:$0xff]   ;;  %v6270_v2 = vld [vmem:[%s7196_s18 + $0xd5c] ss:$240 sps:$4 sm:$0xff]  }
  0xb8   : > { %3357 = vmatprep.subr.bf16.mxu0 %v6177_v3  ;;  %3398 = vmatprep.subr.bf16.mxu1 %v6180_v4  ;;  %v6265_v3 = vld [vmem:[%s7196_s18 + $0xd50] ss:$240 sps:$4 sm:$0xff]   ;;  %v6268_v4 = vld [vmem:[%s7196_s18 + $0xd58] ss:$240 sps:$4 sm:$0xff]  }
  0xba   : > { %3308 = vmatmul.mubr.bf16.vlgmr.msra.gmra.mrb[4].mxu0 %v7238_v35  ;;  %3349 = vmatmul.mubr.bf16.vlgmr.msra.gmra.mrb[4].mxu1 %v7238_v35 }
  0xbb   : > { %3358 = vmatpush1.bf16.msra.mxu0 %v6175_v5  ;;  %3399 = vmatpush1.bf16.msra.mxu1 %v6178_v6  ;;  %v6273_v5 = vld [vmem:[%s7196_s18 + $0x44] ss:$240 sps:$4 sm:$0xff]   ;;  %v6276_v6 = vld [vmem:[%s7196_s18 + $0x4c] ss:$240 sps:$4 sm:$0xff]  }
  0xbc   : > { %3359 = vmatprep.subr.bf16.mxu0 %v6183_v7  ;;  %3400 = vmatprep.subr.bf16.mxu1 %v6186_v8  ;;  %v6271_v7 = vld [vmem:[%s7196_s18 + $0x40] ss:$240 sps:$4 sm:$0xff]   ;;  %v6274_v8 = vld [vmem:[%s7196_s18 + $0x48] ss:$240 sps:$4 sm:$0xff]  }
  0xbd   : > { %3389 = vmatprep.mubr.bf16.mxu0 %v6983_v0  ;;  %3430 = vmatprep.mubr.bf16.mxu1 %v6983_v0 }
  0xbf   : > { %3360 = vmatpush1.bf16.msra.mxu0 %v6181_v9  ;;  %3401 = vmatpush1.bf16.msra.mxu1 %v6184_v10  ;;  %v6279_v9 = vld [vmem:[%s7196_s18 + $0x224] ss:$240 sps:$4 sm:$0xff]   ;;  %v6282_v10 = vld [vmem:[%s7196_s18 + $0x22c] ss:$240 sps:$4 sm:$0xff]  }
  0xc0   : > { %3361 = vmatprep.subr.bf16.mxu0 %v6189_v11  ;;  %3402 = vmatprep.subr.bf16.mxu1 %v6192_v12  ;;  %v6277_v11 = vld [vmem:[%s7196_s18 + $0x220] ss:$240 sps:$4 sm:$0xff]   ;;  %v6280_v12 = vld [vmem:[%s7196_s18 + $0x228] ss:$240 sps:$4 sm:$0xff]  }
  0xc3   : > { %3362 = vmatpush1.bf16.msra.mxu0 %v6187_v13  ;;  %3403 = vmatpush1.bf16.msra.mxu1 %v6190_v14  ;;  %v6285_v13 = vld [vmem:[%s7196_s18 + $0x404] ss:$240 sps:$4 sm:$0xff]   ;;  %v6288_v14 = vld [vmem:[%s7196_s18 + $0x40c] ss:$240 sps:$4 sm:$0xff]  }
  0xc4   : > { %3363 = vmatprep.subr.bf16.mxu0 %v6195_v15  ;;  %3404 = vmatprep.subr.bf16.mxu1 %v6198_v16  ;;  %v6283_v15 = vld [vmem:[%s7196_s18 + $0x400] ss:$240 sps:$4 sm:$0xff]   ;;  %v6286_v16 = vld [vmem:[%s7196_s18 + $0x408] ss:$240 sps:$4 sm:$0xff]  }
  0xc7   : > { %3364 = vmatpush1.bf16.msra.mxu0 %v6193_v17  ;;  %3405 = vmatpush1.bf16.msra.mxu1 %v6196_v18  ;;  %v6291_v17 = vld [vmem:[%s7196_s18 + $0x5e4] ss:$240 sps:$4 sm:$0xff]   ;;  %v6294_v18 = vld [vmem:[%s7196_s18 + $0x5ec] ss:$240 sps:$4 sm:$0xff]  }
  0xc8   : > { %3365 = vmatprep.subr.bf16.mxu0 %v6201_v19  ;;  %3406 = vmatprep.subr.bf16.mxu1 %v6204_v20  ;;  %v6289_v19 = vld [vmem:[%s7196_s18 + $0x5e0] ss:$240 sps:$4 sm:$0xff]   ;;  %v6292_v20 = vld [vmem:[%s7196_s18 + $0x5e8] ss:$240 sps:$4 sm:$0xff]  }
  0xcb   : > { %3366 = vmatpush1.bf16.msra.mxu0 %v6199_v21  ;;  %3407 = vmatpush1.bf16.msra.mxu1 %v6202_v22  ;;  %v6297_v21 = vld [vmem:[%s7196_s18 + $0x7c4] ss:$240 sps:$4 sm:$0xff]   ;;  %v6300_v22 = vld [vmem:[%s7196_s18 + $0x7cc] ss:$240 sps:$4 sm:$0xff]  }
  0xcc   : > { %3367 = vmatprep.subr.bf16.mxu0 %v6207_v23  ;;  %3408 = vmatprep.subr.bf16.mxu1 %v6210_v24  ;;  %v6295_v23 = vld [vmem:[%s7196_s18 + $0x7c0] ss:$240 sps:$4 sm:$0xff]   ;;  %v6298_v24 = vld [vmem:[%s7196_s18 + $0x7c8] ss:$240 sps:$4 sm:$0xff]  }
  0xcf   : > { %3368 = vmatpush1.bf16.msra.mxu0 %v6205_v25  ;;  %3409 = vmatpush1.bf16.msra.mxu1 %v6208_v26  ;;  %v6303_v25 = vld [vmem:[%s7196_s18 + $0x9a4] ss:$240 sps:$4 sm:$0xff]   ;;  %v6306_v26 = vld [vmem:[%s7196_s18 + $0x9ac] ss:$240 sps:$4 sm:$0xff]  }
  0xd0   : > { %3369 = vmatprep.subr.bf16.mxu0 %v6213_v27  ;;  %3410 = vmatprep.subr.bf16.mxu1 %v6216_v28  ;;  %v6301_v27 = vld [vmem:[%s7196_s18 + $0x9a0] ss:$240 sps:$4 sm:$0xff]   ;;  %v6304_v28 = vld [vmem:[%s7196_s18 + $0x9a8] ss:$240 sps:$4 sm:$0xff]  }
  0xd3   : > { %3370 = vmatpush1.bf16.msra.mxu0 %v6211_v29  ;;  %3411 = vmatpush1.bf16.msra.mxu1 %v6214_v30  ;;  %v6309_v29 = vld [vmem:[%s7196_s18 + $0xb84] ss:$240 sps:$4 sm:$0xff]   ;;  %v6312_v30 = vld [vmem:[%s7196_s18 + $0xb8c] ss:$240 sps:$4 sm:$0xff]  }
  0xd4   : > { %3371 = vmatprep.subr.bf16.mxu0 %v6219_v31  ;;  %3412 = vmatprep.subr.bf16.mxu1 %v6222_v32  ;;  %v6307_v31 = vld [vmem:[%s7196_s18 + $0xb80] ss:$240 sps:$4 sm:$0xff]   ;;  %v6310_v32 = vld [vmem:[%s7196_s18 + $0xb88] ss:$240 sps:$4 sm:$0xff]  }
  0xd7   : > { %3372 = vmatpush1.bf16.msra.mxu0 %v6217_v33  ;;  %3413 = vmatpush1.bf16.msra.mxu1 %v6220_v34  ;;  %v6315_v33 = vld [vmem:[%s7196_s18 + $0xd64] ss:$240 sps:$4 sm:$0xff]   ;;  %v6318_v34 = vld [vmem:[%s7196_s18 + $0xd6c] ss:$240 sps:$4 sm:$0xff]  }
  0xd8   : > { %3439 = vmatprep.subr.bf16.mxu0 %v6225_v36  ;;  %3480 = vmatprep.subr.bf16.mxu1 %v6228_v37  ;;  %v6313_v36 = vld [vmem:[%s7196_s18 + $0xd60] ss:$240 sps:$4 sm:$0xff]   ;;  %v6316_v37 = vld [vmem:[%s7196_s18 + $0xd68] ss:$240 sps:$4 sm:$0xff]  }
  0xda   : > { %3390 = vmatmul.mubr.bf16.vlgmr.msra.gmra.mrb[8].mxu0 %v7238_v35  ;;  %3431 = vmatmul.mubr.bf16.vlgmr.msra.gmra.mrb[8].mxu1 %v7238_v35 }
  0xdb   : > { %3440 = vmatpush1.bf16.msra.mxu0 %v6223_v38  ;;  %3481 = vmatpush1.bf16.msra.mxu1 %v6226_v39  ;;  %v6321_v38 = vld [vmem:[%s7196_s18 + $0x54] ss:$240 sps:$4 sm:$0xff]   ;;  %v6324_v39 = vld [vmem:[%s7196_s18 + $0x5c] ss:$240 sps:$4 sm:$0xff]  }
  0xdc   : > { %3441 = vmatprep.subr.bf16.mxu0 %v6231_v40  ;;  %3482 = vmatprep.subr.bf16.mxu1 %v6234_v41  ;;  %v6319_v40 = vld [vmem:[%s7196_s18 + $0x50] ss:$240 sps:$4 sm:$0xff]   ;;  %v6322_v41 = vld [vmem:[%s7196_s18 + $0x58] ss:$240 sps:$4 sm:$0xff]  }
  0xdd   : > { %3471 = vmatprep.mubr.bf16.mxu0 %v6983_v0  ;;  %3512 = vmatprep.mubr.bf16.mxu1 %v6983_v0 }
  0xdf   : > { %3442 = vmatpush1.bf16.msra.mxu0 %v6229_v42  ;;  %3483 = vmatpush1.bf16.msra.mxu1 %v6232_v43  ;;  %v6327_v42 = vld [vmem:[%s7196_s18 + $0x234] ss:$240 sps:$4 sm:$0xff]   ;;  %v6330_v43 = vld [vmem:[%s7196_s18 + $0x23c] ss:$240 sps:$4 sm:$0xff]  }
  0xe0   : > { %3443 = vmatprep.subr.bf16.mxu0 %v6237_v44  ;;  %3484 = vmatprep.subr.bf16.mxu1 %v6240_v45  ;;  %v6325_v44 = vld [vmem:[%s7196_s18 + $0x230] ss:$240 sps:$4 sm:$0xff]   ;;  %v6328_v45 = vld [vmem:[%s7196_s18 + $0x238] ss:$240 sps:$4 sm:$0xff]  }
  0xe3   : > { %3444 = vmatpush1.bf16.msra.mxu0 %v6235_v46  ;;  %3485 = vmatpush1.bf16.msra.mxu1 %v6238_v47  ;;  %v6333_v46 = vld [vmem:[%s7196_s18 + $0x414] ss:$240 sps:$4 sm:$0xff]   ;;  %v6336_v47 = vld [vmem:[%s7196_s18 + $0x41c] ss:$240 sps:$4 sm:$0xff]  }
  0xe4   : > { %3445 = vmatprep.subr.bf16.mxu0 %v6243_v48  ;;  %3486 = vmatprep.subr.bf16.mxu1 %v6246_v49  ;;  %v6334_v48 = vld [vmem:[%s7196_s18 + $0x418] ss:$240 sps:$4 sm:$0xff]   ;;  %v6339_v49 = vld [vmem:[%s7196_s18 + $0x5f4] ss:$240 sps:$4 sm:$0xff]  }
  0xe7   : > { %3446 = vmatpush1.bf16.msra.mxu0 %v6241_v50  ;;  %3487 = vmatpush1.bf16.msra.mxu1 %v6244_v51  ;;  %v6342_v50 = vld [vmem:[%s7196_s18 + $0x5fc] ss:$240 sps:$4 sm:$0xff]   ;;  %v6337_v51 = vld [vmem:[%s7196_s18 + $0x5f0] ss:$240 sps:$4 sm:$0xff]  }
  0xe8   : > { %3447 = vmatprep.subr.bf16.mxu0 %v6249_v52  ;;  %3488 = vmatprep.subr.bf16.mxu1 %v6252_v53  ;;  %v6340_v52 = vld [vmem:[%s7196_s18 + $0x5f8] ss:$240 sps:$4 sm:$0xff]   ;;  %v6345_v53 = vld [vmem:[%s7196_s18 + $0x7d4] ss:$240 sps:$4 sm:$0xff]  }
  0xeb   : > { %3448 = vmatpush1.bf16.msra.mxu0 %v6247_v54  ;;  %3489 = vmatpush1.bf16.msra.mxu1 %v6250_v55  ;;  %v6348_v54 = vld [vmem:[%s7196_s18 + $0x7dc] ss:$240 sps:$4 sm:$0xff]   ;;  %v6343_v55 = vld [vmem:[%s7196_s18 + $0x7d0] ss:$240 sps:$4 sm:$0xff]  }
  0xec   : > { %3449 = vmatprep.subr.bf16.mxu0 %v6255_v56  ;;  %3490 = vmatprep.subr.bf16.mxu1 %v6258_v57  ;;  %v6346_v56 = vld [vmem:[%s7196_s18 + $0x7d8] ss:$240 sps:$4 sm:$0xff]   ;;  %v6351_v57 = vld [vmem:[%s7196_s18 + $0x9b4] ss:$240 sps:$4 sm:$0xff]  }
  0xef   : > { %3450 = vmatpush1.bf16.msra.mxu0 %v6253_v58  ;;  %3491 = vmatpush1.bf16.msra.mxu1 %v6256_v59  ;;  %v6354_v58 = vld [vmem:[%s7196_s18 + $0x9bc] ss:$240 sps:$4 sm:$0xff]   ;;  %v6349_v59 = vld [vmem:[%s7196_s18 + $0x9b0] ss:$240 sps:$4 sm:$0xff]  }
  0xf0   : > { %3451 = vmatprep.subr.bf16.mxu0 %v6261_v60  ;;  %3492 = vmatprep.subr.bf16.mxu1 %v6264_v61  ;;  %v6352_v60 = vld [vmem:[%s7196_s18 + $0x9b8] ss:$240 sps:$4 sm:$0xff]   ;;  %v6357_v61 = vld [vmem:[%s7196_s18 + $0xb94] ss:$240 sps:$4 sm:$0xff]  }
  0xf3   : > { %3452 = vmatpush1.bf16.msra.mxu0 %v6259_v62  ;;  %3493 = vmatpush1.bf16.msra.mxu1 %v6262_v63  ;;  %v6360_v62 = vld [vmem:[%s7196_s18 + $0xb9c] ss:$240 sps:$4 sm:$0xff]   ;;  %v6355_v63 = vld [vmem:[%s7196_s18 + $0xb90] ss:$240 sps:$4 sm:$0xff]  }
  0xf4   : > { %3453 = vmatprep.subr.bf16.mxu0 %v6267_v1  ;;  %3494 = vmatprep.subr.bf16.mxu1 %v6270_v2  ;;  %v6358_v1 = vld [vmem:[%s7196_s18 + $0xb98] ss:$240 sps:$4 sm:$0xff]   ;;  %v6363_v2 = vld [vmem:[%s7196_s18 + $0xd74] ss:$240 sps:$4 sm:$0xff]  }
  0xf7   : > { %3454 = vmatpush1.bf16.msra.mxu0 %v6265_v3  ;;  %3495 = vmatpush1.bf16.msra.mxu1 %v6268_v4  ;;  %v6366_v3 = vld [vmem:[%s7196_s18 + $0xd7c] ss:$240 sps:$4 sm:$0xff]   ;;  %v6361_v4 = vld [vmem:[%s7196_s18 + $0xd70] ss:$240 sps:$4 sm:$0xff]  }
  0xf8   : > { %3521 = vmatprep.subr.bf16.mxu0 %v6273_v5  ;;  %3562 = vmatprep.subr.bf16.mxu1 %v6276_v6  ;;  %v6364_v5 = vld [vmem:[%s7196_s18 + $0xd78] ss:$240 sps:$4 sm:$0xff]   ;;  %v6369_v6 = vld [vmem:[%s7196_s18 + $0x64] ss:$240 sps:$4 sm:$0xff]  }
  0xfa   : > { %3472 = vmatmul.mubr.bf16.vlgmr.msra.gmra.mrb[12].mxu0 %v7238_v35  ;;  %3513 = vmatmul.mubr.bf16.vlgmr.msra.gmra.mrb[12].mxu1 %v7238_v35 }
  0xfb   : > { %3522 = vmatpush1.bf16.msra.mxu0 %v6271_v7  ;;  %3563 = vmatpush1.bf16.msra.mxu1 %v6274_v8  ;;  %v6372_v7 = vld [vmem:[%s7196_s18 + $0x6c] ss:$240 sps:$4 sm:$0xff]   ;;  %v6367_v8 = vld [vmem:[%s7196_s18 + $0x60] ss:$240 sps:$4 sm:$0xff]  }
  0xfc   : > { %3523 = vmatprep.subr.bf16.mxu0 %v6279_v9  ;;  %3564 = vmatprep.subr.bf16.mxu1 %v6282_v10  ;;  %v6370_v9 = vld [vmem:[%s7196_s18 + $0x68] ss:$240 sps:$4 sm:$0xff]   ;;  %v6375_v10 = vld [vmem:[%s7196_s18 + $0x244] ss:$240 sps:$4 sm:$0xff]  }
  0xfd   : > { %3553 = vmatprep.mubr.bf16.mxu0 %v6983_v0  ;;  %3594 = vmatprep.mubr.bf16.mxu1 %v6983_v0 }
  0xff   : > { %3524 = vmatpush1.bf16.msra.mxu0 %v6277_v11  ;;  %3565 = vmatpush1.bf16.msra.mxu1 %v6280_v12  ;;  %v6378_v11 = vld [vmem:[%s7196_s18 + $0x24c] ss:$240 sps:$4 sm:$0xff]  }
 0x100   : > { %3525 = vmatprep.subr.bf16.mxu0 %v6285_v13  ;;  %3566 = vmatprep.subr.bf16.mxu1 %v6288_v14  ;;  %v7424_v12 = vld [vmem:[#allocation3] sm:$0x1]  ;;  %v6373_v13 = vld [vmem:[%s7196_s18 + $0x240] ss:$240 sps:$4 sm:$0xff]   ;;  %v6376_v14 = vld [vmem:[%s7196_s18 + $0x248] ss:$240 sps:$4 sm:$0xff]  }
 0x103   : > { %3526 = vmatpush1.bf16.msra.mxu0 %v6283_v15  ;;  %3567 = vmatpush1.bf16.msra.mxu1 %v6286_v16  ;;  %v6381_v15 = vld [vmem:[%s7196_s18 + $0x424] ss:$240 sps:$4 sm:$0xff]   ;;  %v6384_v16 = vld [vmem:[%s7196_s18 + $0x42c] ss:$240 sps:$4 sm:$0xff]  }
 0x104   : > { %3527 = vmatprep.subr.bf16.mxu0 %v6291_v17  ;;  %3568 = vmatprep.subr.bf16.mxu1 %v6294_v18  ;;  %v6379_v17 = vld [vmem:[%s7196_s18 + $0x420] ss:$240 sps:$4 sm:$0xff]   ;;  %v6382_v18 = vld [vmem:[%s7196_s18 + $0x428] ss:$240 sps:$4 sm:$0xff]  }
 0x107   : > { %3528 = vmatpush1.bf16.msra.mxu0 %v6289_v19  ;;  %3569 = vmatpush1.bf16.msra.mxu1 %v6292_v20  ;;  %v6387_v19 = vld [vmem:[%s7196_s18 + $0x604] ss:$240 sps:$4 sm:$0xff]   ;;  %v6390_v20 = vld [vmem:[%s7196_s18 + $0x60c] ss:$240 sps:$4 sm:$0xff]  }
 0x108   : > { %3529 = vmatprep.subr.bf16.mxu0 %v6297_v21  ;;  %3570 = vmatprep.subr.bf16.mxu1 %v6300_v22  ;;  %v6385_v21 = vld [vmem:[%s7196_s18 + $0x600] ss:$240 sps:$4 sm:$0xff]   ;;  %v6388_v22 = vld [vmem:[%s7196_s18 + $0x608] ss:$240 sps:$4 sm:$0xff]  }
 0x10b   : > { %3530 = vmatpush1.bf16.msra.mxu0 %v6295_v23  ;;  %3571 = vmatpush1.bf16.msra.mxu1 %v6298_v24  ;;  %v6393_v23 = vld [vmem:[%s7196_s18 + $0x7e4] ss:$240 sps:$4 sm:$0xff]   ;;  %v6396_v24 = vld [vmem:[%s7196_s18 + $0x7ec] ss:$240 sps:$4 sm:$0xff]  }
 0x10c   : > { %3531 = vmatprep.subr.bf16.mxu0 %v6303_v25  ;;  %3572 = vmatprep.subr.bf16.mxu1 %v6306_v26  ;;  %v6391_v25 = vld [vmem:[%s7196_s18 + $0x7e0] ss:$240 sps:$4 sm:$0xff]   ;;  %v6394_v26 = vld [vmem:[%s7196_s18 + $0x7e8] ss:$240 sps:$4 sm:$0xff]  }
 0x10f   : > { %3532 = vmatpush1.bf16.msra.mxu0 %v6301_v27  ;;  %3573 = vmatpush1.bf16.msra.mxu1 %v6304_v28  ;;  %v6399_v27 = vld [vmem:[%s7196_s18 + $0x9c4] ss:$240 sps:$4 sm:$0xff]   ;;  %v6402_v28 = vld [vmem:[%s7196_s18 + $0x9cc] ss:$240 sps:$4 sm:$0xff]  }
 0x110   : > { %3533 = vmatprep.subr.bf16.mxu0 %v6309_v29  ;;  %3574 = vmatprep.subr.bf16.mxu1 %v6312_v30  ;;  %v6397_v29 = vld [vmem:[%s7196_s18 + $0x9c0] ss:$240 sps:$4 sm:$0xff]   ;;  %v6400_v30 = vld [vmem:[%s7196_s18 + $0x9c8] ss:$240 sps:$4 sm:$0xff]  }
 0x113   : > { %3534 = vmatpush1.bf16.msra.mxu0 %v6307_v31  ;;  %3575 = vmatpush1.bf16.msra.mxu1 %v6310_v32  ;;  %v6405_v31 = vld [vmem:[%s7196_s18 + $0xba4] ss:$240 sps:$4 sm:$0xff]   ;;  %v6408_v32 = vld [vmem:[%s7196_s18 + $0xbac] ss:$240 sps:$4 sm:$0xff]  }
 0x114   : > { %3535 = vmatprep.subr.bf16.mxu0 %v6315_v33  ;;  %3576 = vmatprep.subr.bf16.mxu1 %v6318_v34  ;;  %v6403_v33 = vld [vmem:[%s7196_s18 + $0xba0] ss:$240 sps:$4 sm:$0xff]   ;;  %v6406_v34 = vld [vmem:[%s7196_s18 + $0xba8] ss:$240 sps:$4 sm:$0xff]  }
 0x117   : > { %3536 = vmatpush1.bf16.msra.mxu0 %v6313_v36  ;;  %3577 = vmatpush1.bf16.msra.mxu1 %v6316_v37  ;;  %v6411_v36 = vld [vmem:[%s7196_s18 + $0xd84] ss:$240 sps:$4 sm:$0xff]   ;;  %v6414_v37 = vld [vmem:[%s7196_s18 + $0xd8c] ss:$240 sps:$4 sm:$0xff]  }
 0x118   : > { %3603 = vmatprep.subr.bf16.mxu0 %v6321_v38  ;;  %3644 = vmatprep.subr.bf16.mxu1 %v6324_v39  ;;  %v6409_v38 = vld [vmem:[%s7196_s18 + $0xd80] ss:$240 sps:$4 sm:$0xff]   ;;  %v6412_v39 = vld [vmem:[%s7196_s18 + $0xd88] ss:$240 sps:$4 sm:$0xff]  }
 0x11a   : > { %3554 = vmatmul.mubr.bf16.vlgmr.msra.gmra.mrb[16].mxu0 %v7238_v35  ;;  %3595 = vmatmul.mubr.bf16.vlgmr.msra.gmra.mrb[16].mxu1 %v7238_v35  ;;  %v6331_v35 = vld [vmem:[%s7196_s18 + $0x410] ss:$240 sps:$4 sm:$0xff]  }
 0x11b   : > { %3604 = vmatpush1.bf16.msra.mxu0 %v6319_v40  ;;  %3645 = vmatpush1.bf16.msra.mxu1 %v6322_v41  ;;  %v6417_v40 = vld [vmem:[%s7196_s18 + $0x74] ss:$240 sps:$4 sm:$0xff]   ;;  %v6420_v41 = vld [vmem:[%s7196_s18 + $0x7c] ss:$240 sps:$4 sm:$0xff]  }
 0x11c   : > { %3605 = vmatprep.subr.bf16.mxu0 %v6327_v42  ;;  %3646 = vmatprep.subr.bf16.mxu1 %v6330_v43  ;;  %v6415_v42 = vld [vmem:[%s7196_s18 + $0x70] ss:$240 sps:$4 sm:$0xff]   ;;  %v6418_v43 = vld [vmem:[%s7196_s18 + $0x78] ss:$240 sps:$4 sm:$0xff]  }
 0x11d   : > { %3635 = vmatprep.mubr.bf16.mxu0 %v6983_v0  ;;  %3676 = vmatprep.mubr.bf16.mxu1 %v6983_v0 }
 0x11f   : > { %3606 = vmatpush1.bf16.msra.mxu0 %v6325_v44  ;;  %3647 = vmatpush1.bf16.msra.mxu1 %v6328_v45  ;;  %v6423_v44 = vld [vmem:[%s7196_s18 + $0x254] ss:$240 sps:$4 sm:$0xff]   ;;  %v6426_v45 = vld [vmem:[%s7196_s18 + $0x25c] ss:$240 sps:$4 sm:$0xff]  }
 0x120   : > { %3607 = vmatprep.subr.bf16.mxu0 %v6333_v46  ;;  %3648 = vmatprep.subr.bf16.mxu1 %v6336_v47  ;;  %v4488_v46 = vlaneseq  ;;  %v6421_v47 = vld [vmem:[%s7196_s18 + $0x250] ss:$240 sps:$4 sm:$0xff]  }
 0x123   : > { %3608 = vmatpush1.bf16.msra.mxu0 %v6331_v35  ;;  %3649 = vmatpush1.bf16.msra.mxu1 %v6334_v48  ;;  %v6424_v35 = vld [vmem:[%s7196_s18 + $0x258] ss:$240 sps:$4 sm:$0xff]   ;;  %v6429_v48 = vld [vmem:[%s7196_s18 + $0x434] ss:$240 sps:$4 sm:$0xff]  }
 0x124   : > { %3609 = vmatprep.subr.bf16.mxu0 %v6339_v49  ;;  %3650 = vmatprep.subr.bf16.mxu1 %v6342_v50  ;;  %v6432_v49 = vld [vmem:[%s7196_s18 + $0x43c] ss:$240 sps:$4 sm:$0xff]   ;;  %v7469_v50 = vshrl.u32 %v4488_v46, 7  ;;  %v6463_v46 = vld [vmem:[%s7196_s18 + $0x80] ss:$240 sps:$4 sm:$0xff]  }
 0x127   : > { %3610 = vmatpush1.bf16.msra.mxu0 %v6337_v51  ;;  %3651 = vmatpush1.bf16.msra.mxu1 %v6340_v52  ;;  %v6427_v51 = vld [vmem:[%s7196_s18 + $0x430] ss:$240 sps:$4 sm:$0xff]   ;;  %v6430_v52 = vld [vmem:[%s7196_s18 + $0x438] ss:$240 sps:$4 sm:$0xff]  }
 0x128   : > { %3611 = vmatprep.subr.bf16.mxu0 %v6345_v53  ;;  %3652 = vmatprep.subr.bf16.mxu1 %v6348_v54  ;;  %v6435_v53 = vld [vmem:[%s7196_s18 + $0x614] ss:$240 sps:$4 sm:$0xff]   ;;  %v6438_v54 = vld [vmem:[%s7196_s18 + $0x61c] ss:$240 sps:$4 sm:$0xff]  }
 0x12b   : > { %3612 = vmatpush1.bf16.msra.mxu0 %v6343_v55  ;;  %3653 = vmatpush1.bf16.msra.mxu1 %v6346_v56  ;;  %v6984_v55 = vmov 1983009808  }
 0x12c   : > { %3613 = vmatprep.subr.bf16.mxu0 %v6351_v57  ;;  %3654 = vmatprep.subr.bf16.mxu1 %v6354_v58  ;;  %v4486_v56 = vunpack.c.l.s4 %v6984_v55  ;;  %v7478_v57 = vsub.s32 0, %v7469_v50  ;;  %v7481_v58 = vsub.s32 1, %v7469_v50  ;;  %v6478_v55 = vld [vmem:[%s7196_s18 + $0x448] ss:$240 sps:$4 sm:$0xff]  }
 0x12f   : > { %3614 = vmatpush1.bf16.msra.mxu0 %v6349_v59  ;;  %3655 = vmatpush1.bf16.msra.mxu1 %v6352_v60  ;;  %v7484_v59 = vsub.s32 2, %v7469_v50  ;;  %v7487_v60 = vsub.s32 3, %v7469_v50 }
 0x130   : > { %3615 = vmatprep.subr.bf16.mxu0 %v6357_v61  ;;  %3656 = vmatprep.subr.bf16.mxu1 %v6360_v62  ;;  %v6433_v61 = vld [vmem:[%s7196_s18 + $0x610] ss:$240 sps:$4 sm:$0xff]  }
 0x131   : > { %v7493_v62 = vld [vmem:[%s7490_s30] sm:$0xff] }
 0x133   : > { %3616 = vmatpush1.bf16.msra.mxu0 %v6355_v63  ;;  %3657 = vmatpush1.bf16.msra.mxu1 %v6358_v1  ;;  %v6436_v63 = vld [vmem:[%s7196_s18 + $0x618] ss:$240 sps:$4 sm:$0xff]   ;;  %v6441_v1 = vld [vmem:[%s7196_s18 + $0x7f4] ss:$240 sps:$4 sm:$0xff]  }
 0x134   : > { %3617 = vmatprep.subr.bf16.mxu0 %v6363_v2  ;;  %3658 = vmatprep.subr.bf16.mxu1 %v6366_v3  ;;  %v6444_v2 = vld [vmem:[%s7196_s18 + $0x7fc] ss:$240 sps:$4 sm:$0xff]   ;;  %v4487_v3 = vunpack.c.0.s8 %v4486_v56  ;;  %v6483_v56 = vld [vmem:[%s7196_s18 + $0x624] ss:$240 sps:$4 sm:$0xff]  }
 0x137   : > { %3618 = vmatpush1.bf16.msra.mxu0 %v6361_v4  ;;  %3659 = vmatpush1.bf16.msra.mxu1 %v6364_v5  ;;  %v4820_v4 = vrot.slane %v7493_v62, %v7478_v57  ;;  %v4824_v5 = vrot.slane %v7493_v62, %v7481_v58 }
 0x138   : > { %3685 = vmatprep.subr.bf16.mxu0 %v6369_v6  ;;  %3726 = vmatprep.subr.bf16.mxu1 %v6372_v7  ;;  %v4828_v6 = vrot.slane %v7493_v62, %v7484_v59  ;;  %v4832_v7 = vrot.slane %v7493_v62, %v7487_v60 }
 0x13a   : > { %3636 = vmatmul.mubr.bf16.vlgmr.msra.gmra.mrb[20].mxu0 %v7424_v12  ;;  %3677 = vmatmul.mubr.bf16.vlgmr.msra.gmra.mrb[20].mxu1 %v7424_v12 }
 0x13b   : > { %3686 = vmatpush1.bf16.msra.mxu0 %v6367_v8  ;;  %3727 = vmatpush1.bf16.msra.mxu1 %v6370_v9  ;;  %v6439_v8 = vld [vmem:[%s7196_s18 + $0x7f0] ss:$240 sps:$4 sm:$0xff]   ;;  %v6442_v9 = vld [vmem:[%s7196_s18 + $0x7f8] ss:$240 sps:$4 sm:$0xff]  }
 0x13c   : > { %3687 = vmatprep.subr.bf16.mxu0 %v6375_v10  ;;  %3728 = vmatprep.subr.bf16.mxu1 %v6378_v11  ;;  %v6447_v10 = vld [vmem:[%s7196_s18 + $0x9d4] ss:$240 sps:$4 sm:$0xff]   ;;  %v6450_v11 = vld [vmem:[%s7196_s18 + $0x9dc] ss:$240 sps:$4 sm:$0xff]  }
 0x13d   : > { %3717 = vmatprep.mubr.bf16.mxu0 %v6983_v0  ;;  %3758 = vmatprep.mubr.bf16.mxu1 %v6983_v0 }
 0x13f   : > { %3688 = vmatpush1.bf16.msra.mxu0 %v6373_v13  ;;  %3729 = vmatpush1.bf16.msra.mxu1 %v6376_v14  ;;  %v7511_v13 = vsub.s32 %v4487_v3, %v7469_v50  ;;  %v5057_v14 = vcombine.low %v4820_v4, %v4824_v5  ;;  %v7559_v3 = vsub.s32 7, %v7469_v50  ;;  %v6481_v4 = vld [vmem:[%s7196_s18 + $0x620] ss:$240 sps:$4 sm:$0xff]   ;;  %v6484_v5 = vld [vmem:[%s7196_s18 + $0x628] ss:$240 sps:$4 sm:$0xff]  }
 0x140   : > { %3689 = vmatprep.subr.bf16.mxu0 %v6381_v15  ;;  %3730 = vmatprep.subr.bf16.mxu1 %v6384_v16  ;;  %v5058_v15 = vcombine.low %v4828_v6, %v4832_v7  ;;  %v6445_v16 = vld [vmem:[%s7196_s18 + $0x9d0] ss:$240 sps:$4 sm:$0xff]   ;;  %v6489_v6 = vld [vmem:[%s7196_s18 + $0x804] ss:$240 sps:$4 sm:$0xff]   ;;  %v6492_v7 = vld [vmem:[%s7196_s18 + $0x80c] ss:$240 sps:$4 sm:$0xff]  }
 0x143   : > { %3690 = vmatpush1.bf16.msra.mxu0 %v6379_v17  ;;  %3731 = vmatpush1.bf16.msra.mxu1 %v6382_v18  ;;  %v6448_v17 = vld [vmem:[%s7196_s18 + $0x9d8] ss:$240 sps:$4 sm:$0xff]   ;;  %v6453_v18 = vld [vmem:[%s7196_s18 + $0xbb4] ss:$240 sps:$4 sm:$0xff]  }
 0x144   : > { %3691 = vmatprep.subr.bf16.mxu0 %v6387_v19  ;;  %3732 = vmatprep.subr.bf16.mxu1 %v6390_v20  ;;  %v6456_v19 = vld [vmem:[%s7196_s18 + $0xbbc] ss:$240 sps:$4 sm:$0xff]  }
 0x147   : > { %3692 = vmatpush1.bf16.msra.mxu0 %v6385_v21  ;;  %3733 = vmatpush1.bf16.msra.mxu1 %v6388_v22  ;;  %v5065_v22 = vrot.slane %v5057_v14, %v7511_v13  ;;  %v6490_v14 = vld [vmem:[%s7196_s18 + $0x808] ss:$240 sps:$4 sm:$0xff]  }
 0x148   : > { %3693 = vmatprep.subr.bf16.mxu0 %v6393_v23  ;;  %3734 = vmatprep.subr.bf16.mxu1 %v6396_v24  ;;  %v5072_v23 = vrot.slane %v5058_v15, %v7511_v13  ;;  %v6495_v15 = vld [vmem:[%s7196_s18 + $0x9e4] ss:$240 sps:$4 sm:$0xff]  }
 0x14b   : > { %3694 = vmatpush1.bf16.msra.mxu0 %v6391_v25  ;;  %3735 = vmatpush1.bf16.msra.mxu1 %v6394_v26  ;;  %v6451_v26 = vld [vmem:[%s7196_s18 + $0xbb0] ss:$240 sps:$4 sm:$0xff]  }
 0x14c   : > { %3695 = vmatprep.subr.bf16.mxu0 %v6399_v27  ;;  %3736 = vmatprep.subr.bf16.mxu1 %v6402_v28  ;;  %v6454_v27 = vld [vmem:[%s7196_s18 + $0xbb8] ss:$240 sps:$4 sm:$0xff]  }
 0x14f   : > { %3696 = vmatpush1.bf16.msra.mxu0 %v6397_v29  ;;  %3737 = vmatpush1.bf16.msra.mxu1 %v6400_v30 }
 0x150   : > { %3697 = vmatprep.subr.bf16.mxu0 %v6405_v31  ;;  %3738 = vmatprep.subr.bf16.mxu1 %v6408_v32  ;;  %v6459_v32 = vld [vmem:[%s7196_s18 + $0xd94] ss:$240 sps:$4 sm:$0xff]  }
 0x153   : > { %3698 = vmatpush1.bf16.msra.mxu0 %v6403_v33  ;;  %3739 = vmatpush1.bf16.msra.mxu1 %v6406_v34 }
 0x154   : > { %3699 = vmatprep.subr.bf16.mxu0 %v6411_v36  ;;  %3740 = vmatprep.subr.bf16.mxu1 %v6414_v37  ;;  %v6462_v36 = vld [vmem:[%s7196_s18 + $0xd9c] ss:$240 sps:$4 sm:$0xff]  }
 0x157   : > { %3700 = vmatpush1.bf16.msra.mxu0 %v6409_v38  ;;  %3741 = vmatpush1.bf16.msra.mxu1 %v6412_v39  ;;  %v5073_v39 = vcombine.low %v5065_v22, %v5072_v23 }
 0x158   : > { %3767 = vmatprep.subr.bf16.mxu0 %v6417_v40  ;;  %3808 = vmatprep.subr.bf16.mxu1 %v6420_v41  ;;  %v6457_v40 = vld [vmem:[%s7196_s18 + $0xd90] ss:$240 sps:$4 sm:$0xff]  }
 0x15a   : > { %3718 = vmatmul.mubr.bf16.vlgmr.msra.gmra.mrb[24].mxu0 %v7424_v12  ;;  %3759 = vmatmul.mubr.bf16.vlgmr.msra.gmra.mrb[24].mxu1 %v7424_v12 }
 0x15b   : > { %3768 = vmatpush1.bf16.msra.mxu0 %v6415_v42  ;;  %3809 = vmatpush1.bf16.msra.mxu1 %v6418_v43  ;;  %v6460_v42 = vld [vmem:[%s7196_s18 + $0xd98] ss:$240 sps:$4 sm:$0xff]   ;;  %v6465_v43 = vld [vmem:[%s7196_s18 + $0x84] ss:$240 sps:$4 sm:$0xff]  }
 0x15c   : > { %3769 = vmatprep.subr.bf16.mxu0 %v6423_v44  ;;  %3810 = vmatprep.subr.bf16.mxu1 %v6426_v45  ;;  %v6468_v44 = vld [vmem:[%s7196_s18 + $0x8c] ss:$240 sps:$4 sm:$0xff]  }
 0x15d   : > { %3799 = vmatprep.mubr.bf16.mxu0 %v6983_v0  ;;  %3840 = vmatprep.mubr.bf16.mxu1 %v6983_v0 }
 0x15f   : > { %3770 = vmatpush1.bf16.msra.mxu0 %v6421_v47  ;;  %3811 = vmatpush1.bf16.msra.mxu1 %v6424_v35  ;;  %v6466_v47 = vld [vmem:[%s7196_s18 + $0x88] ss:$240 sps:$4 sm:$0xff]   ;;  %v6471_v35 = vld [vmem:[%s7196_s18 + $0x264] ss:$240 sps:$4 sm:$0xff]  }
 0x160   : > { %3771 = vmatprep.subr.bf16.mxu0 %v6429_v48  ;;  %3812 = vmatprep.subr.bf16.mxu1 %v6432_v49  ;;  %v6474_v48 = vld [vmem:[%s7196_s18 + $0x26c] ss:$240 sps:$4 sm:$0xff]   ;;  %v6469_v49 = vld [vmem:[%s7196_s18 + $0x260] ss:$240 sps:$4 sm:$0xff]  }
 0x163   : > { %3772 = vmatpush1.bf16.msra.mxu0 %v6427_v51  ;;  %3813 = vmatpush1.bf16.msra.mxu1 %v6430_v52  ;;  %v6472_v51 = vld [vmem:[%s7196_s18 + $0x268] ss:$240 sps:$4 sm:$0xff]   ;;  %v6477_v52 = vld [vmem:[%s7196_s18 + $0x444] ss:$240 sps:$4 sm:$0xff]  }
 0x164   : > { %3773 = vmatprep.subr.bf16.mxu0 %v6435_v53  ;;  %3814 = vmatprep.subr.bf16.mxu1 %v6438_v54  ;;  %v6480_v53 = vld [vmem:[%s7196_s18 + $0x44c] ss:$240 sps:$4 sm:$0xff]   ;;  %v6475_v54 = vld [vmem:[%s7196_s18 + $0x440] ss:$240 sps:$4 sm:$0xff]  }
 0x167   : > { %3774 = vmatpush1.bf16.msra.mxu0 %v6433_v61  ;;  %3815 = vmatpush1.bf16.msra.mxu1 %v6436_v63  ;;  %v6486_v61 = vld [vmem:[%s7196_s18 + $0x62c] ss:$240 sps:$4 sm:$0xff]   ;;  %v7550_v63 = vsub.s32 4, %v7469_v50 }
 0x168   : > { %3775 = vmatprep.subr.bf16.mxu0 %v6441_v1  ;;  %3816 = vmatprep.subr.bf16.mxu1 %v6444_v2  ;;  %v7553_v1 = vsub.s32 5, %v7469_v50  ;;  %v7556_v2 = vsub.s32 6, %v7469_v50 }
 0x16a   : > { %v4840_v50 = vrot.slane %v7493_v62, %v7553_v1 }
 0x16b   : > { %3776 = vmatpush1.bf16.msra.mxu0 %v6439_v8  ;;  %3817 = vmatpush1.bf16.msra.mxu1 %v6442_v9  ;;  %v4836_v8 = vrot.slane %v7493_v62, %v7550_v63  ;;  %v4844_v9 = vrot.slane %v7493_v62, %v7556_v2 }
 0x16c   : > { %3777 = vmatprep.subr.bf16.mxu0 %v6447_v10  ;;  %3818 = vmatprep.subr.bf16.mxu1 %v6450_v11  ;;  %v4848_v10 = vrot.slane %v7493_v62, %v7559_v3  ;;  %v6487_v11 = vld [vmem:[%s7196_s18 + $0x800] ss:$240 sps:$4 sm:$0xff]   ;;  %v6501_v62 = vld [vmem:[%s7196_s18 + $0xbc4] ss:$240 sps:$4 sm:$0xff]  }
 0x16d   : > { %v3227_v20 = vpop.f32.mrb[0].mxu0  ;;  %v3268_v21 = vpop.f32.mrb[0].mxu1 }
 0x16e   : > { %v3229_v24 = vpop.f32.mrb[1].mxu0  ;;  %v3270_v25 = vpop.f32.mrb[1].mxu1 }
 0x16f   : > { %v4483_v28 = vcombine.low %v3227_v20, %v3229_v24  ;;  %v4484_v29 = vcombine.low %v3268_v21, %v3270_v25  ;;  %v3231_v30 = vpop.f32.mrb[2].mxu0  ;;  %v3272_v31 = vpop.f32.mrb[2].mxu1  ;;  %3778 = vmatpush1.bf16.msra.mxu0 %v6445_v16  ;;  %3819 = vmatpush1.bf16.msra.mxu1 %v6448_v17  ;;  %v6498_v16 = vld [vmem:[%s7196_s18 + $0x9ec] ss:$240 sps:$4 sm:$0xff]   ;;  %v5074_v17 = vcombine.low %v4836_v8, %v4840_v50  ;;  %v6496_v20 = vld [vmem:[%s7196_s18 + $0x9e8] ss:$240 sps:$4 sm:$0xff]  }
 0x170   : > { %v3232_v33 = vpop.f32.mrb[3].mxu0  ;;  %v3273_v34 = vpop.f32.mrb[3].mxu1  ;;  %3779 = vmatprep.subr.bf16.mxu0 %v6453_v18  ;;  %3820 = vmatprep.subr.bf16.mxu1 %v6456_v19  ;;  %v5075_v18 = vcombine.low %v4844_v9, %v4848_v10  ;;  %v6493_v19 = vld [vmem:[%s7196_s18 + $0x9e0] ss:$240 sps:$4 sm:$0xff]   ;;  %v6504_v21 = vld [vmem:[%s7196_s18 + $0xbcc] ss:$240 sps:$4 sm:$0xff]  }
 0x171   : > { %v4491_v37 = vrot.slane %v4483_v28, %v7511_v13  ;;  %v4498_v38 = vrot.slane %v4484_v29, %v7511_v13  ;;  %v5082_v24 = vrot.slane %v5074_v17, %v7511_v13  ;;  %v6537_v8 = vld [vmem:[%s7196_s18 + $0x814] ss:$240 sps:$4 sm:$0xff]   ;;  %v6540_v50 = vld [vmem:[%s7196_s18 + $0x81c] ss:$240 sps:$4 sm:$0xff]  }
 0x172   : > { %v5089_v25 = vrot.slane %v5075_v18, %v7511_v13  ;;  %v6543_v17 = vld [vmem:[%s7196_s18 + $0x9f4] ss:$240 sps:$4 sm:$0xff]   ;;  %v6546_v18 = vld [vmem:[%s7196_s18 + $0x9fc] ss:$240 sps:$4 sm:$0xff]  }
 0x173   : > { %v4499_v41 = vcombine.low %v4491_v37, %v4498_v38  ;;  %3780 = vmatpush1.bf16.msra.mxu0 %v6451_v26  ;;  %3821 = vmatpush1.bf16.msra.mxu1 %v6454_v27  ;;  %v6499_v26 = vld [vmem:[%s7196_s18 + $0xbc0] ss:$240 sps:$4 sm:$0xff]   ;;  %v6502_v27 = vld [vmem:[%s7196_s18 + $0xbc8] ss:$240 sps:$4 sm:$0xff]   ;;  %v6507_v37 = vld [vmem:[%s7196_s18 + $0xda4] ss:$240 sps:$4 sm:$0xff]  }
 0x174   : > { %3781 = vmatprep.subr.bf16.mxu0 %v6459_v32  ;;  %3822 = vmatprep.subr.bf16.mxu1 %v6462_v36  ;;  %v6510_v38 = vld [vmem:[%s7196_s18 + $0xdac] ss:$240 sps:$4 sm:$0xff]  }
 0x175   : > { %v5327_v45 = vadd.f32 %v5073_v39, %v4499_v41  ;;  %v5090_v41 = vcombine.low %v5082_v24, %v5089_v25 }
 0x177   : > { %5342 = vst [vmem:[%s7531_s9] sm:$0xff] %v5327_v45  ;;  %3782 = vmatpush1.bf16.msra.mxu0 %v6457_v40  ;;  %3823 = vmatpush1.bf16.msra.mxu1 %v6460_v42  ;;  %v6505_v42 = vld [vmem:[%s7196_s18 + $0xda0] ss:$240 sps:$4 sm:$0xff]   ;;  %v6513_v45 = vld [vmem:[%s7196_s18 + $0x94] ss:$240 sps:$4 sm:$0xff]  }
 0x178   : > { %3849 = vmatprep.subr.bf16.mxu0 %v6465_v43  ;;  %3890 = vmatprep.subr.bf16.mxu1 %v6468_v44  ;;  %v6508_v43 = vld [vmem:[%s7196_s18 + $0xda8] ss:$240 sps:$4 sm:$0xff]  }
 0x17a   : > { %3800 = vmatmul.mubr.bf16.vlgmr.msra.gmra.mrb[28].mxu0 %v7424_v12  ;;  %3841 = vmatmul.mubr.bf16.vlgmr.msra.gmra.mrb[28].mxu1 %v7424_v12 }
 0x17b   : > { %3850 = vmatpush1.bf16.msra.mxu0 %v6463_v46  ;;  %3891 = vmatpush1.bf16.msra.mxu1 %v6466_v47  ;;  %v6516_v46 = vld [vmem:[%s7196_s18 + $0x9c] ss:$240 sps:$4 sm:$0xff]  }
 0x17c   : > { %3851 = vmatprep.subr.bf16.mxu0 %v6471_v35  ;;  %3892 = vmatprep.subr.bf16.mxu1 %v6474_v48  ;;  %v6511_v35 = vld [vmem:[%s7196_s18 + $0x90] ss:$240 sps:$4 sm:$0xff]   ;;  %v6514_v48 = vld [vmem:[%s7196_s18 + $0x98] ss:$240 sps:$4 sm:$0xff]  }
 0x17d   : > { %3881 = vmatprep.mubr.bf16.mxu0 %v6983_v0  ;;  %3922 = vmatprep.mubr.bf16.mxu1 %v6983_v0 }
 0x17f   : > { %3852 = vmatpush1.bf16.msra.mxu0 %v6469_v49  ;;  %3893 = vmatpush1.bf16.msra.mxu1 %v6472_v51  ;;  %v6519_v49 = vld [vmem:[%s7196_s18 + $0x274] ss:$240 sps:$4 sm:$0xff]   ;;  %v6522_v51 = vld [vmem:[%s7196_s18 + $0x27c] ss:$240 sps:$4 sm:$0xff]  }
 0x180   : > { %3853 = vmatprep.subr.bf16.mxu0 %v6477_v52  ;;  %3894 = vmatprep.subr.bf16.mxu1 %v6480_v53  ;;  %v6517_v52 = vld [vmem:[%s7196_s18 + $0x270] ss:$240 sps:$4 sm:$0xff]   ;;  %v6520_v53 = vld [vmem:[%s7196_s18 + $0x278] ss:$240 sps:$4 sm:$0xff]  }
 0x183   : > { %3854 = vmatpush1.bf16.msra.mxu0 %v6475_v54  ;;  %3895 = vmatpush1.bf16.msra.mxu1 %v6478_v55  ;;  %v6525_v54 = vld [vmem:[%s7196_s18 + $0x454] ss:$240 sps:$4 sm:$0xff]   ;;  %v6528_v55 = vld [vmem:[%s7196_s18 + $0x45c] ss:$240 sps:$4 sm:$0xff]  }
 0x184   : > { %3855 = vmatprep.subr.bf16.mxu0 %v6483_v56  ;;  %3896 = vmatprep.subr.bf16.mxu1 %v6486_v61  ;;  %v6523_v56 = vld [vmem:[%s7196_s18 + $0x450] ss:$240 sps:$4 sm:$0xff]   ;;  %v6531_v61 = vld [vmem:[%s7196_s18 + $0x634] ss:$240 sps:$4 sm:$0xff]  }
 0x187   : > { %3856 = vmatpush1.bf16.msra.mxu0 %v6481_v4  ;;  %3897 = vmatpush1.bf16.msra.mxu1 %v6484_v5  ;;  %v6534_v4 = vld [vmem:[%s7196_s18 + $0x63c] ss:$240 sps:$4 sm:$0xff]  }
 0x188   : > { %3857 = vmatprep.subr.bf16.mxu0 %v6489_v6  ;;  %3898 = vmatprep.subr.bf16.mxu1 %v6492_v7  ;;  %v7611_v5 = vld [vmem:[%s7490_s30 + $0x8] sm:$0xff]  ;;  %v6529_v6 = vld [vmem:[%s7196_s18 + $0x630] ss:$240 sps:$4 sm:$0xff]  }
 0x189   : > { %v6532_v7 = vld [vmem:[%s7196_s18 + $0x638] ss:$240 sps:$4 sm:$0xff]   ;;  %v4852_v9 = vrot.slane %v7611_v5, %v7478_v57  ;;  %v4856_v10 = vrot.slane %v7611_v5, %v7481_v58 }
 0x18b   : > { %3858 = vmatpush1.bf16.msra.mxu0 %v6487_v11  ;;  %3899 = vmatpush1.bf16.msra.mxu1 %v6490_v14  ;;  %v4860_v11 = vrot.slane %v7611_v5, %v7484_v59  ;;  %v4864_v14 = vrot.slane %v7611_v5, %v7487_v60 }
 0x18c   : > { %3859 = vmatprep.subr.bf16.mxu0 %v6495_v15  ;;  %3900 = vmatprep.subr.bf16.mxu1 %v6498_v16  ;;  %v6535_v15 = vld [vmem:[%s7196_s18 + $0x810] ss:$240 sps:$4 sm:$0xff]   ;;  %v6538_v16 = vld [vmem:[%s7196_s18 + $0x818] ss:$240 sps:$4 sm:$0xff]  }
 0x18d   : > { %v3309_v22 = vpop.f32.mrb[4].mxu0  ;;  %v3350_v23 = vpop.f32.mrb[4].mxu1 }
 0x18e   : > { %v3311_v28 = vpop.f32.mrb[5].mxu0  ;;  %v3352_v29 = vpop.f32.mrb[5].mxu1 }
 0x18f   : > { %v4500_v30 = vcombine.low %v3309_v22, %v3311_v28  ;;  %v4501_v31 = vcombine.low %v3350_v23, %v3352_v29  ;;  %v3313_v32 = vpop.f32.mrb[6].mxu0  ;;  %v3354_v33 = vpop.f32.mrb[6].mxu1  ;;  %3860 = vmatpush1.bf16.msra.mxu0 %v6493_v19  ;;  %3901 = vmatpush1.bf16.msra.mxu1 %v6496_v20  ;;  %v5091_v19 = vcombine.low %v4852_v9, %v4856_v10  ;;  %v6549_v22 = vld [vmem:[%s7196_s18 + $0xbd4] ss:$240 sps:$4 sm:$0xff]   ;;  %v6552_v23 = vld [vmem:[%s7196_s18 + $0xbdc] ss:$240 sps:$4 sm:$0xff]  }
 0x190   : > { %v3314_v34 = vpop.f32.mrb[7].mxu0  ;;  %v3355_v36 = vpop.f32.mrb[7].mxu1  ;;  %3861 = vmatprep.subr.bf16.mxu0 %v6501_v62  ;;  %3902 = vmatprep.subr.bf16.mxu1 %v6504_v21  ;;  %v5092_v20 = vcombine.low %v4860_v11, %v4864_v14  ;;  %v6541_v62 = vld [vmem:[%s7196_s18 + $0x9f0] ss:$240 sps:$4 sm:$0xff]   ;;  %v6544_v21 = vld [vmem:[%s7196_s18 + $0x9f8] ss:$240 sps:$4 sm:$0xff]   ;;  %v4868_v14 = vrot.slane %v7611_v5, %v7550_v63 }
 0x191   : > { %v4508_v39 = vrot.slane %v4500_v30, %v7511_v13  ;;  %v4515_v40 = vrot.slane %v4501_v31, %v7511_v13  ;;  %v6547_v34 = vld [vmem:[%s7196_s18 + $0xbd0] ss:$240 sps:$4 sm:$0xff]   ;;  %v6550_v36 = vld [vmem:[%s7196_s18 + $0xbd8] ss:$240 sps:$4 sm:$0xff]   ;;  %v6585_v10 = vld [vmem:[%s7196_s18 + $0x824] ss:$240 sps:$4 sm:$0xff]  }
 0x192   : > { %v6580_v9 = vld [vmem:[%s7196_s18 + $0x648] ss:$240 sps:$4 sm:$0xff]   ;;  %v6588_v11 = vld [vmem:[%s7196_s18 + $0x82c] ss:$240 sps:$4 sm:$0xff]  }
 0x193   : > { %v4516_v44 = vcombine.low %v4508_v39, %v4515_v40  ;;  %3862 = vmatpush1.bf16.msra.mxu0 %v6499_v26  ;;  %3903 = vmatpush1.bf16.msra.mxu1 %v6502_v27  ;;  %v5099_v26 = vrot.slane %v5091_v19, %v7511_v13  ;;  %v5106_v27 = vrot.slane %v5092_v20, %v7511_v13  ;;  %v6555_v39 = vld [vmem:[%s7196_s18 + $0xdb4] ss:$240 sps:$4 sm:$0xff]   ;;  %v6558_v40 = vld [vmem:[%s7196_s18 + $0xdbc] ss:$240 sps:$4 sm:$0xff]   ;;  %v6586_v19 = vld [vmem:[%s7196_s18 + $0x828] ss:$240 sps:$4 sm:$0xff]  }
 0x194   : > { %3863 = vmatprep.subr.bf16.mxu0 %v6507_v37  ;;  %3904 = vmatprep.subr.bf16.mxu1 %v6510_v38  ;;  %v6591_v20 = vld [vmem:[%s7196_s18 + $0xa04] ss:$240 sps:$4 sm:$0xff]  }
 0x195   : > { %v5328_v47 = vadd.f32 %v5090_v41, %v4516_v44 }
 0x197   : > { %5343 = vst [vmem:[%s7531_s9 + $0x8] sm:$0xff] %v5328_v47  ;;  %3864 = vmatpush1.bf16.msra.mxu0 %v6505_v42  ;;  %3905 = vmatpush1.bf16.msra.mxu1 %v6508_v43  ;;  %v5107_v43 = vcombine.low %v5099_v26, %v5106_v27  ;;  %v6561_v47 = vld [vmem:[%s7196_s18 + $0xa4] ss:$240 sps:$4 sm:$0xff]  }
 0x198   : > { %3931 = vmatprep.subr.bf16.mxu0 %v6513_v45  ;;  %3972 = vmatprep.subr.bf16.mxu1 %v6516_v46  ;;  %v6553_v45 = vld [vmem:[%s7196_s18 + $0xdb0] ss:$240 sps:$4 sm:$0xff]   ;;  %v6556_v46 = vld [vmem:[%s7196_s18 + $0xdb8] ss:$240 sps:$4 sm:$0xff]  }
 0x19a   : > { %3882 = vmatmul.mubr.bf16.vlgmr.msra.gmra.mrb[32].mxu0 %v7424_v12  ;;  %3923 = vmatmul.mubr.bf16.vlgmr.msra.gmra.mrb[32].mxu1 %v7424_v12  ;;  %v6526_v12 = vld [vmem:[%s7196_s18 + $0x458] ss:$240 sps:$4 sm:$0xff]  }
 0x19b   : > { %3932 = vmatpush1.bf16.msra.mxu0 %v6511_v35  ;;  %3973 = vmatpush1.bf16.msra.mxu1 %v6514_v48  ;;  %v6564_v35 = vld [vmem:[%s7196_s18 + $0xac] ss:$240 sps:$4 sm:$0xff]  }
 0x19c   : > { %3933 = vmatprep.subr.bf16.mxu0 %v6519_v49  ;;  %3974 = vmatprep.subr.bf16.mxu1 %v6522_v51  ;;  %v6559_v49 = vld [vmem:[%s7196_s18 + $0xa0] ss:$240 sps:$4 sm:$0xff]   ;;  %v6562_v51 = vld [vmem:[%s7196_s18 + $0xa8] ss:$240 sps:$4 sm:$0xff]  }
 0x19d   : > { %3963 = vmatprep.mubr.bf16.mxu0 %v6983_v0  ;;  %4004 = vmatprep.mubr.bf16.mxu1 %v6983_v0 }
 0x19f   : > { %3934 = vmatpush1.bf16.msra.mxu0 %v6517_v52  ;;  %3975 = vmatpush1.bf16.msra.mxu1 %v6520_v53  ;;  %v6567_v52 = vld [vmem:[%s7196_s18 + $0x284] ss:$240 sps:$4 sm:$0xff]   ;;  %v6570_v53 = vld [vmem:[%s7196_s18 + $0x28c] ss:$240 sps:$4 sm:$0xff]  }
 0x1a0   : > { %3935 = vmatprep.subr.bf16.mxu0 %v6525_v54  ;;  %3976 = vmatprep.subr.bf16.mxu1 %v6528_v55  ;;  %v7650_v54 = vld [vmem:[#allocation3] sm:$0x1]  ;;  %v6565_v55 = vld [vmem:[%s7196_s18 + $0x280] ss:$240 sps:$4 sm:$0xff]  }
 0x1a3   : > { %3936 = vmatpush1.bf16.msra.mxu0 %v6523_v56  ;;  %3977 = vmatpush1.bf16.msra.mxu1 %v6526_v12  ;;  %v6568_v56 = vld [vmem:[%s7196_s18 + $0x288] ss:$240 sps:$4 sm:$0xff]   ;;  %v6573_v12 = vld [vmem:[%s7196_s18 + $0x464] ss:$240 sps:$4 sm:$0xff]  }
 0x1a4   : > { %3937 = vmatprep.subr.bf16.mxu0 %v6531_v61  ;;  %3978 = vmatprep.subr.bf16.mxu1 %v6534_v4  ;;  %v6576_v61 = vld [vmem:[%s7196_s18 + $0x46c] ss:$240 sps:$4 sm:$0xff]   ;;  %v6571_v4 = vld [vmem:[%s7196_s18 + $0x460] ss:$240 sps:$4 sm:$0xff]  }
 0x1a7   : > { %3938 = vmatpush1.bf16.msra.mxu0 %v6529_v6  ;;  %3979 = vmatpush1.bf16.msra.mxu1 %v6532_v7  ;;  %v6574_v6 = vld [vmem:[%s7196_s18 + $0x468] ss:$240 sps:$4 sm:$0xff]   ;;  %v6579_v7 = vld [vmem:[%s7196_s18 + $0x644] ss:$240 sps:$4 sm:$0xff]  }
 0x1a8   : > { %3939 = vmatprep.subr.bf16.mxu0 %v6537_v8  ;;  %3980 = vmatprep.subr.bf16.mxu1 %v6540_v50  ;;  %v6582_v8 = vld [vmem:[%s7196_s18 + $0x64c] ss:$240 sps:$4 sm:$0xff]   ;;  %v6577_v50 = vld [vmem:[%s7196_s18 + $0x640] ss:$240 sps:$4 sm:$0xff]  }
 0x1ab   : > { %3940 = vmatpush1.bf16.msra.mxu0 %v6535_v15  ;;  %3981 = vmatpush1.bf16.msra.mxu1 %v6538_v16  ;;  %v4872_v15 = vrot.slane %v7611_v5, %v7553_v1  ;;  %v4876_v16 = vrot.slane %v7611_v5, %v7556_v2 }
 0x1ac   : > { %3941 = vmatprep.subr.bf16.mxu0 %v6543_v17  ;;  %3982 = vmatprep.subr.bf16.mxu1 %v6546_v18  ;;  %v4880_v17 = vrot.slane %v7611_v5, %v7559_v3  ;;  %v6583_v18 = vld [vmem:[%s7196_s18 + $0x820] ss:$240 sps:$4 sm:$0xff]   ;;  %v6597_v5 = vld [vmem:[%s7196_s18 + $0xbe4] ss:$240 sps:$4 sm:$0xff]  }
 0x1ad   : > { %v3391_v24 = vpop.f32.mrb[8].mxu0  ;;  %v3432_v25 = vpop.f32.mrb[8].mxu1 }
 0x1ae   : > { %v3393_v28 = vpop.f32.mrb[9].mxu0  ;;  %v3434_v29 = vpop.f32.mrb[9].mxu1 }
 0x1af   : > { %v4517_v30 = vcombine.low %v3391_v24, %v3393_v28  ;;  %v4518_v31 = vcombine.low %v3432_v25, %v3434_v29  ;;  %v3395_v32 = vpop.f32.mrb[10].mxu0  ;;  %v3436_v33 = vpop.f32.mrb[10].mxu1  ;;  %3942 = vmatpush1.bf16.msra.mxu0 %v6541_v62  ;;  %3983 = vmatpush1.bf16.msra.mxu1 %v6544_v21  ;;  %v6594_v62 = vld [vmem:[%s7196_s18 + $0xa0c] ss:$240 sps:$4 sm:$0xff]   ;;  %v5108_v21 = vcombine.low %v4868_v14, %v4872_v15  ;;  %v6592_v24 = vld [vmem:[%s7196_s18 + $0xa08] ss:$240 sps:$4 sm:$0xff]  }
 0x1b0   : > { %v3396_v37 = vpop.f32.mrb[11].mxu0  ;;  %v3437_v38 = vpop.f32.mrb[11].mxu1  ;;  %3943 = vmatprep.subr.bf16.mxu0 %v6549_v22  ;;  %3984 = vmatprep.subr.bf16.mxu1 %v6552_v23  ;;  %v5109_v22 = vcombine.low %v4876_v16, %v4880_v17  ;;  %v6589_v23 = vld [vmem:[%s7196_s18 + $0xa00] ss:$240 sps:$4 sm:$0xff]   ;;  %v6600_v25 = vld [vmem:[%s7196_s18 + $0xbec] ss:$240 sps:$4 sm:$0xff]  }
 0x1b1   : > { %v4525_v41 = vrot.slane %v4517_v30, %v7511_v13  ;;  %v4532_v42 = vrot.slane %v4518_v31, %v7511_v13  ;;  %v5116_v28 = vrot.slane %v5108_v21, %v7511_v13  ;;  %v6595_v37 = vld [vmem:[%s7196_s18 + $0xbe0] ss:$240 sps:$4 sm:$0xff]   ;;  %v6598_v38 = vld [vmem:[%s7196_s18 + $0xbe8] ss:$240 sps:$4 sm:$0xff]   ;;  %v6633_v15 = vld [vmem:[%s7196_s18 + $0x834] ss:$240 sps:$4 sm:$0xff]  }
 0x1b2   : > { %v5123_v29 = vrot.slane %v5109_v22, %v7511_v13  ;;  %v6628_v14 = vld [vmem:[%s7196_s18 + $0x658] ss:$240 sps:$4 sm:$0xff]   ;;  %v6636_v16 = vld [vmem:[%s7196_s18 + $0x83c] ss:$240 sps:$4 sm:$0xff]   ;;  %v6639_v22 = vld [vmem:[%s7196_s18 + $0xa14] ss:$240 sps:$4 sm:$0xff]  }
 0x1b3   : > { %v4533_v44 = vcombine.low %v4525_v41, %v4532_v42  ;;  %3944 = vmatpush1.bf16.msra.mxu0 %v6547_v34  ;;  %3985 = vmatpush1.bf16.msra.mxu1 %v6550_v36  ;;  %v6603_v41 = vld [vmem:[%s7196_s18 + $0xdc4] ss:$240 sps:$4 sm:$0xff]   ;;  %v6606_v42 = vld [vmem:[%s7196_s18 + $0xdcc] ss:$240 sps:$4 sm:$0xff]   ;;  %v6634_v21 = vld [vmem:[%s7196_s18 + $0x838] ss:$240 sps:$4 sm:$0xff]  }
 0x1b4   : > { %3945 = vmatprep.subr.bf16.mxu0 %v6555_v39  ;;  %3986 = vmatprep.subr.bf16.mxu1 %v6558_v40 }
 0x1b5   : > { %v5329_v48 = vadd.f32 %v5107_v43, %v4533_v44 }
 0x1b7   : > { %5344 = vst [vmem:[%s7531_s9 + $0x10] sm:$0xff] %v5329_v48  ;;  %3946 = vmatpush1.bf16.msra.mxu0 %v6553_v45  ;;  %3987 = vmatpush1.bf16.msra.mxu1 %v6556_v46  ;;  %v5124_v45 = vcombine.low %v5116_v28, %v5123_v29  ;;  %v6609_v48 = vld [vmem:[%s7196_s18 + $0xb4] ss:$240 sps:$4 sm:$0xff]   ;;  %v6648_v28 = vld [vmem:[%s7196_s18 + $0xbfc] ss:$240 sps:$4 sm:$0xff]  }
 0x1b8   : > { %4013 = vmatprep.subr.bf16.mxu0 %v6561_v47  ;;  %4054 = vmatprep.subr.bf16.mxu1 %v6564_v35  ;;  %v6601_v47 = vld [vmem:[%s7196_s18 + $0xdc0] ss:$240 sps:$4 sm:$0xff]   ;;  %v6604_v35 = vld [vmem:[%s7196_s18 + $0xdc8] ss:$240 sps:$4 sm:$0xff]  }
 0x1ba   : > { %3964 = vmatmul.mubr.bf16.vlgmr.msra.gmra.mrb[36].mxu0 %v7650_v54  ;;  %4005 = vmatmul.mubr.bf16.vlgmr.msra.gmra.mrb[36].mxu1 %v7650_v54 }
 0x1bb   : > { %4014 = vmatpush1.bf16.msra.mxu0 %v6559_v49  ;;  %4055 = vmatpush1.bf16.msra.mxu1 %v6562_v51  ;;  %v6612_v49 = vld [vmem:[%s7196_s18 + $0xbc] ss:$240 sps:$4 sm:$0xff]  }
 0x1bc   : > { %4015 = vmatprep.subr.bf16.mxu0 %v6567_v52  ;;  %4056 = vmatprep.subr.bf16.mxu1 %v6570_v53  ;;  %v6607_v52 = vld [vmem:[%s7196_s18 + $0xb0] ss:$240 sps:$4 sm:$0xff]   ;;  %v6610_v53 = vld [vmem:[%s7196_s18 + $0xb8] ss:$240 sps:$4 sm:$0xff]  }
 0x1bd   : > { %4045 = vmatprep.mubr.bf16.mxu0 %v6983_v0  ;;  %4086 = vmatprep.mubr.bf16.mxu1 %v6983_v0 }
 0x1bf   : > { %4016 = vmatpush1.bf16.msra.mxu0 %v6565_v55  ;;  %4057 = vmatpush1.bf16.msra.mxu1 %v6568_v56  ;;  %v6615_v55 = vld [vmem:[%s7196_s18 + $0x294] ss:$240 sps:$4 sm:$0xff]   ;;  %v6618_v56 = vld [vmem:[%s7196_s18 + $0x29c] ss:$240 sps:$4 sm:$0xff]  }
 0x1c0   : > { %4017 = vmatprep.subr.bf16.mxu0 %v6573_v12  ;;  %4058 = vmatprep.subr.bf16.mxu1 %v6576_v61  ;;  %v6613_v12 = vld [vmem:[%s7196_s18 + $0x290] ss:$240 sps:$4 sm:$0xff]   ;;  %v6616_v61 = vld [vmem:[%s7196_s18 + $0x298] ss:$240 sps:$4 sm:$0xff]  }
 0x1c3   : > { %4018 = vmatpush1.bf16.msra.mxu0 %v6571_v4  ;;  %4059 = vmatpush1.bf16.msra.mxu1 %v6574_v6  ;;  %v6621_v4 = vld [vmem:[%s7196_s18 + $0x474] ss:$240 sps:$4 sm:$0xff]   ;;  %v6624_v6 = vld [vmem:[%s7196_s18 + $0x47c] ss:$240 sps:$4 sm:$0xff]  }
 0x1c4   : > { %4019 = vmatprep.subr.bf16.mxu0 %v6579_v7  ;;  %4060 = vmatprep.subr.bf16.mxu1 %v6582_v8  ;;  %v6619_v7 = vld [vmem:[%s7196_s18 + $0x470] ss:$240 sps:$4 sm:$0xff]   ;;  %v6622_v8 = vld [vmem:[%s7196_s18 + $0x478] ss:$240 sps:$4 sm:$0xff]  }
 0x1c7   : > { %4020 = vmatpush1.bf16.msra.mxu0 %v6577_v50  ;;  %4061 = vmatpush1.bf16.msra.mxu1 %v6580_v9  ;;  %v6627_v50 = vld [vmem:[%s7196_s18 + $0x654] ss:$240 sps:$4 sm:$0xff]   ;;  %v6630_v9 = vld [vmem:[%s7196_s18 + $0x65c] ss:$240 sps:$4 sm:$0xff]  }
 0x1c8   : > { %4021 = vmatprep.subr.bf16.mxu0 %v6585_v10  ;;  %4062 = vmatprep.subr.bf16.mxu1 %v6588_v11  ;;  %v7714_v10 = vld [vmem:[%s7490_s30 + $0x10] sm:$0xff] }
 0x1c9   : > { %v6625_v11 = vld [vmem:[%s7196_s18 + $0x650] ss:$240 sps:$4 sm:$0xff]   ;;  %v4884_v17 = vrot.slane %v7714_v10, %v7478_v57 }
 0x1cb   : > { %4022 = vmatpush1.bf16.msra.mxu0 %v6583_v18  ;;  %4063 = vmatpush1.bf16.msra.mxu1 %v6586_v19  ;;  %v4888_v18 = vrot.slane %v7714_v10, %v7481_v58  ;;  %v4892_v19 = vrot.slane %v7714_v10, %v7484_v59 }
 0x1cc   : > { %4023 = vmatprep.subr.bf16.mxu0 %v6591_v20  ;;  %4064 = vmatprep.subr.bf16.mxu1 %v6594_v62  ;;  %v4896_v20 = vrot.slane %v7714_v10, %v7487_v60  ;;  %v6631_v62 = vld [vmem:[%s7196_s18 + $0x830] ss:$240 sps:$4 sm:$0xff]  }
 0x1cd   : > { %v3473_v26 = vpop.f32.mrb[12].mxu0  ;;  %v3514_v27 = vpop.f32.mrb[12].mxu1 }
 0x1ce   : > { %v3475_v30 = vpop.f32.mrb[13].mxu0  ;;  %v3516_v31 = vpop.f32.mrb[13].mxu1 }
 0x1cf   : > { %v4534_v32 = vcombine.low %v3473_v26, %v3475_v30  ;;  %v4535_v33 = vcombine.low %v3514_v27, %v3516_v31  ;;  %v3477_v34 = vpop.f32.mrb[14].mxu0  ;;  %v3518_v36 = vpop.f32.mrb[14].mxu1  ;;  %4024 = vmatpush1.bf16.msra.mxu0 %v6589_v23  ;;  %4065 = vmatpush1.bf16.msra.mxu1 %v6592_v24  ;;  %v6642_v23 = vld [vmem:[%s7196_s18 + $0xa1c] ss:$240 sps:$4 sm:$0xff]   ;;  %v5125_v24 = vcombine.low %v4884_v17, %v4888_v18  ;;  %v6640_v26 = vld [vmem:[%s7196_s18 + $0xa18] ss:$240 sps:$4 sm:$0xff]  }
 0x1d0   : > { %v3478_v39 = vpop.f32.mrb[15].mxu0  ;;  %v3519_v40 = vpop.f32.mrb[15].mxu1  ;;  %4025 = vmatprep.subr.bf16.mxu0 %v6597_v5  ;;  %4066 = vmatprep.subr.bf16.mxu1 %v6600_v25  ;;  %v5126_v5 = vcombine.low %v4892_v19, %v4896_v20  ;;  %v6637_v25 = vld [vmem:[%s7196_s18 + $0xa10] ss:$240 sps:$4 sm:$0xff]   ;;  %v6645_v27 = vld [vmem:[%s7196_s18 + $0xbf4] ss:$240 sps:$4 sm:$0xff]   ;;  %v4900_v20 = vrot.slane %v7714_v10, %v7550_v63 }
 0x1d1   : > { %v4542_v43 = vrot.slane %v4534_v32, %v7511_v13  ;;  %v4549_v44 = vrot.slane %v4535_v33, %v7511_v13  ;;  %v5133_v31 = vrot.slane %v5125_v24, %v7511_v13  ;;  %v6643_v40 = vld [vmem:[%s7196_s18 + $0xbf0] ss:$240 sps:$4 sm:$0xff]   ;;  %v6676_v17 = vld [vmem:[%s7196_s18 + $0x668] ss:$240 sps:$4 sm:$0xff]   ;;  %v6681_v18 = vld [vmem:[%s7196_s18 + $0x844] ss:$240 sps:$4 sm:$0xff]  }
 0x1d2   : > { %v5140_v32 = vrot.slane %v5126_v5, %v7511_v13  ;;  %v6684_v19 = vld [vmem:[%s7196_s18 + $0x84c] ss:$240 sps:$4 sm:$0xff]   ;;  %v6682_v24 = vld [vmem:[%s7196_s18 + $0x848] ss:$240 sps:$4 sm:$0xff]   ;;  %v6687_v5 = vld [vmem:[%s7196_s18 + $0xa24] ss:$240 sps:$4 sm:$0xff]  }
 0x1d3   : > { %v4550_v46 = vcombine.low %v4542_v43, %v4549_v44  ;;  %4026 = vmatpush1.bf16.msra.mxu0 %v6595_v37  ;;  %4067 = vmatpush1.bf16.msra.mxu1 %v6598_v38  ;;  %v6651_v44 = vld [vmem:[%s7196_s18 + $0xdd4] ss:$240 sps:$4 sm:$0xff]  }
 0x1d4   : > { %4027 = vmatprep.subr.bf16.mxu0 %v6603_v41  ;;  %4068 = vmatprep.subr.bf16.mxu1 %v6606_v42  ;;  %v6646_v41 = vld [vmem:[%s7196_s18 + $0xbf8] ss:$240 sps:$4 sm:$0xff]  }
 0x1d5   : > { %v5330_v51 = vadd.f32 %v5124_v45, %v4550_v46  ;;  %v6654_v45 = vld [vmem:[%s7196_s18 + $0xddc] ss:$240 sps:$4 sm:$0xff]  }
 0x1d7   : > { %5345 = vst [vmem:[%s7531_s9 + $0x18] sm:$0xff] %v5330_v51  ;;  %4028 = vmatpush1.bf16.msra.mxu0 %v6601_v47  ;;  %4069 = vmatpush1.bf16.msra.mxu1 %v6604_v35  ;;  %v5141_v35 = vcombine.low %v5133_v31, %v5140_v32  ;;  %v6652_v51 = vld [vmem:[%s7196_s18 + $0xdd8] ss:$240 sps:$4 sm:$0xff]  }
 0x1d8   : > { %4095 = vmatprep.subr.bf16.mxu0 %v6609_v48  ;;  %4136 = vmatprep.subr.bf16.mxu1 %v6612_v49  ;;  %v6649_v49 = vld [vmem:[%s7196_s18 + $0xdd0] ss:$240 sps:$4 sm:$0xff]  }
 0x1da   : > { %4046 = vmatmul.mubr.bf16.vlgmr.msra.gmra.mrb[40].mxu0 %v7650_v54  ;;  %4087 = vmatmul.mubr.bf16.vlgmr.msra.gmra.mrb[40].mxu1 %v7650_v54 }
 0x1db   : > { %4096 = vmatpush1.bf16.msra.mxu0 %v6607_v52  ;;  %4137 = vmatpush1.bf16.msra.mxu1 %v6610_v53  ;;  %v6657_v52 = vld [vmem:[%s7196_s18 + $0xc4] ss:$240 sps:$4 sm:$0xff]   ;;  %v6660_v53 = vld [vmem:[%s7196_s18 + $0xcc] ss:$240 sps:$4 sm:$0xff]  }
 0x1dc   : > { %4097 = vmatprep.subr.bf16.mxu0 %v6615_v55  ;;  %4138 = vmatprep.subr.bf16.mxu1 %v6618_v56  ;;  %v6655_v56 = vld [vmem:[%s7196_s18 + $0xc0] ss:$240 sps:$4 sm:$0xff]  }
 0x1dd   : > { %4127 = vmatprep.mubr.bf16.mxu0 %v6983_v0  ;;  %4168 = vmatprep.mubr.bf16.mxu1 %v6983_v0 }
 0x1df   : > { %4098 = vmatpush1.bf16.msra.mxu0 %v6613_v12  ;;  %4139 = vmatpush1.bf16.msra.mxu1 %v6616_v61  ;;  %v6658_v12 = vld [vmem:[%s7196_s18 + $0xc8] ss:$240 sps:$4 sm:$0xff]   ;;  %v6663_v61 = vld [vmem:[%s7196_s18 + $0x2a4] ss:$240 sps:$4 sm:$0xff]  }
 0x1e0   : > { %4099 = vmatprep.subr.bf16.mxu0 %v6621_v4  ;;  %4140 = vmatprep.subr.bf16.mxu1 %v6624_v6  ;;  %v6666_v4 = vld [vmem:[%s7196_s18 + $0x2ac] ss:$240 sps:$4 sm:$0xff]   ;;  %v6661_v6 = vld [vmem:[%s7196_s18 + $0x2a0] ss:$240 sps:$4 sm:$0xff]  }
 0x1e3   : > { %4100 = vmatpush1.bf16.msra.mxu0 %v6619_v7  ;;  %4141 = vmatpush1.bf16.msra.mxu1 %v6622_v8  ;;  %v6664_v7 = vld [vmem:[%s7196_s18 + $0x2a8] ss:$240 sps:$4 sm:$0xff]   ;;  %v6669_v8 = vld [vmem:[%s7196_s18 + $0x484] ss:$240 sps:$4 sm:$0xff]  }
 0x1e4   : > { %4101 = vmatprep.subr.bf16.mxu0 %v6627_v50  ;;  %4142 = vmatprep.subr.bf16.mxu1 %v6630_v9  ;;  %v6672_v50 = vld [vmem:[%s7196_s18 + $0x48c] ss:$240 sps:$4 sm:$0xff]   ;;  %v6667_v9 = vld [vmem:[%s7196_s18 + $0x480] ss:$240 sps:$4 sm:$0xff]  }
 0x1e7   : > { %4102 = vmatpush1.bf16.msra.mxu0 %v6625_v11  ;;  %4143 = vmatpush1.bf16.msra.mxu1 %v6628_v14  ;;  %v6670_v11 = vld [vmem:[%s7196_s18 + $0x488] ss:$240 sps:$4 sm:$0xff]   ;;  %v6675_v14 = vld [vmem:[%s7196_s18 + $0x664] ss:$240 sps:$4 sm:$0xff]  }
 0x1e8   : > { %4103 = vmatprep.subr.bf16.mxu0 %v6633_v15  ;;  %4144 = vmatprep.subr.bf16.mxu1 %v6636_v16  ;;  %v6678_v15 = vld [vmem:[%s7196_s18 + $0x66c] ss:$240 sps:$4 sm:$0xff]   ;;  %v6673_v16 = vld [vmem:[%s7196_s18 + $0x660] ss:$240 sps:$4 sm:$0xff]  }
 0x1eb   : > { %4104 = vmatpush1.bf16.msra.mxu0 %v6631_v62  ;;  %4145 = vmatpush1.bf16.msra.mxu1 %v6634_v21  ;;  %v4904_v62 = vrot.slane %v7714_v10, %v7553_v1  ;;  %v4908_v21 = vrot.slane %v7714_v10, %v7556_v2 }
 0x1ec   : > { %4105 = vmatprep.subr.bf16.mxu0 %v6639_v22  ;;  %4146 = vmatprep.subr.bf16.mxu1 %v6642_v23  ;;  %v4912_v22 = vrot.slane %v7714_v10, %v7559_v3  ;;  %v6679_v23 = vld [vmem:[%s7196_s18 + $0x840] ss:$240 sps:$4 sm:$0xff]   ;;  %v6693_v10 = vld [vmem:[%s7196_s18 + $0xc04] ss:$240 sps:$4 sm:$0xff]  }
 0x1ed   : > { %v3555_v29 = vpop.f32.mrb[16].mxu0  ;;  %v3596_v30 = vpop.f32.mrb[16].mxu1 }
 0x1ee   : > { %v3557_v33 = vpop.f32.mrb[17].mxu0  ;;  %v3598_v34 = vpop.f32.mrb[17].mxu1 }
 0x1ef   : > { %v4551_v36 = vcombine.low %v3555_v29, %v3557_v33  ;;  %v4552_v37 = vcombine.low %v3596_v30, %v3598_v34  ;;  %v3559_v38 = vpop.f32.mrb[18].mxu0  ;;  %v3600_v39 = vpop.f32.mrb[18].mxu1  ;;  %4106 = vmatpush1.bf16.msra.mxu0 %v6637_v25  ;;  %4147 = vmatpush1.bf16.msra.mxu1 %v6640_v26  ;;  %v6690_v25 = vld [vmem:[%s7196_s18 + $0xa2c] ss:$240 sps:$4 sm:$0xff]   ;;  %v5142_v26 = vcombine.low %v4900_v20, %v4904_v62  ;;  %v6688_v29 = vld [vmem:[%s7196_s18 + $0xa28] ss:$240 sps:$4 sm:$0xff]  }
 0x1f0   : > { %v3560_v42 = vpop.f32.mrb[19].mxu0  ;;  %v3601_v43 = vpop.f32.mrb[19].mxu1  ;;  %4107 = vmatprep.subr.bf16.mxu0 %v6645_v27  ;;  %4148 = vmatprep.subr.bf16.mxu1 %v6648_v28  ;;  %v5143_v27 = vcombine.low %v4908_v21, %v4912_v22  ;;  %v6685_v28 = vld [vmem:[%s7196_s18 + $0xa20] ss:$240 sps:$4 sm:$0xff]   ;;  %v6696_v30 = vld [vmem:[%s7196_s18 + $0xc0c] ss:$240 sps:$4 sm:$0xff]  }
 0x1f1   : > { %v4559_v46 = vrot.slane %v4551_v36, %v7511_v13  ;;  %v4566_v47 = vrot.slane %v4552_v37, %v7511_v13  ;;  %v5150_v33 = vrot.slane %v5142_v26, %v7511_v13  ;;  %v6691_v42 = vld [vmem:[%s7196_s18 + $0xc00] ss:$240 sps:$4 sm:$0xff]   ;;  %v6694_v43 = vld [vmem:[%s7196_s18 + $0xc08] ss:$240 sps:$4 sm:$0xff]   ;;  %v6729_v62 = vld [vmem:[%s7196_s18 + $0x854] ss:$240 sps:$4 sm:$0xff]  }
 0x1f2   : > { %v5157_v34 = vrot.slane %v5143_v27, %v7511_v13  ;;  %v6724_v20 = vld [vmem:[%s7196_s18 + $0x678] ss:$240 sps:$4 sm:$0xff]   ;;  %v6732_v21 = vld [vmem:[%s7196_s18 + $0x85c] ss:$240 sps:$4 sm:$0xff]   ;;  %v6735_v27 = vld [vmem:[%s7196_s18 + $0xa34] ss:$240 sps:$4 sm:$0xff]  }
 0x1f3   : > { %v4567_v48 = vcombine.low %v4559_v46, %v4566_v47  ;;  %4108 = vmatpush1.bf16.msra.mxu0 %v6643_v40  ;;  %4149 = vmatpush1.bf16.msra.mxu1 %v6646_v41  ;;  %v6699_v46 = vld [vmem:[%s7196_s18 + $0xde4] ss:$240 sps:$4 sm:$0xff]   ;;  %v6702_v47 = vld [vmem:[%s7196_s18 + $0xdec] ss:$240 sps:$4 sm:$0xff]   ;;  %v6730_v26 = vld [vmem:[%s7196_s18 + $0x858] ss:$240 sps:$4 sm:$0xff]  }
 0x1f4   : > { %4109 = vmatprep.subr.bf16.mxu0 %v6651_v44  ;;  %4150 = vmatprep.subr.bf16.mxu1 %v6654_v45 }
 0x1f5   : > { %v5331_v55 = vadd.f32 %v5141_v35, %v4567_v48 }
 0x1f7   : > { %5346 = vst [vmem:[%s7531_s9 + $0x20] sm:$0xff] %v5331_v55  ;;  %4110 = vmatpush1.bf16.msra.mxu0 %v6649_v49  ;;  %4151 = vmatpush1.bf16.msra.mxu1 %v6652_v51  ;;  %v5158_v49 = vcombine.low %v5150_v33, %v5157_v34  ;;  %v6705_v55 = vld [vmem:[%s7196_s18 + $0xd4] ss:$240 sps:$4 sm:$0xff]   ;;  %v6744_v33 = vld [vmem:[%s7196_s18 + $0xc1c] ss:$240 sps:$4 sm:$0xff]  }
 0x1f8   : > { %4177 = vmatprep.subr.bf16.mxu0 %v6657_v52  ;;  %4218 = vmatprep.subr.bf16.mxu1 %v6660_v53  ;;  %v6697_v52 = vld [vmem:[%s7196_s18 + $0xde0] ss:$240 sps:$4 sm:$0xff]   ;;  %v6700_v53 = vld [vmem:[%s7196_s18 + $0xde8] ss:$240 sps:$4 sm:$0xff]  }
 0x1fa   : > { %4128 = vmatmul.mubr.bf16.vlgmr.msra.gmra.mrb[44].mxu0 %v7650_v54  ;;  %4169 = vmatmul.mubr.bf16.vlgmr.msra.gmra.mrb[44].mxu1 %v7650_v54 }
 0x1fb   : > { %4178 = vmatpush1.bf16.msra.mxu0 %v6655_v56  ;;  %4219 = vmatpush1.bf16.msra.mxu1 %v6658_v12  ;;  %v6708_v56 = vld [vmem:[%s7196_s18 + $0xdc] ss:$240 sps:$4 sm:$0xff]  }
 0x1fc   : > { %4179 = vmatprep.subr.bf16.mxu0 %v6663_v61  ;;  %4220 = vmatprep.subr.bf16.mxu1 %v6666_v4  ;;  %v6703_v61 = vld [vmem:[%s7196_s18 + $0xd0] ss:$240 sps:$4 sm:$0xff]   ;;  %v6706_v4 = vld [vmem:[%s7196_s18 + $0xd8] ss:$240 sps:$4 sm:$0xff]  }
 0x1fd   : > { %4209 = vmatprep.mubr.bf16.mxu0 %v6983_v0  ;;  %4250 = vmatprep.mubr.bf16.mxu1 %v6983_v0 }
 0x1ff   : > { %4180 = vmatpush1.bf16.msra.mxu0 %v6661_v6  ;;  %4221 = vmatpush1.bf16.msra.mxu1 %v6664_v7  ;;  %v6711_v6 = vld [vmem:[%s7196_s18 + $0x2b4] ss:$240 sps:$4 sm:$0xff]   ;;  %v6714_v7 = vld [vmem:[%s7196_s18 + $0x2bc] ss:$240 sps:$4 sm:$0xff]  }
 0x200   : > { %4181 = vmatprep.subr.bf16.mxu0 %v6669_v8  ;;  %4222 = vmatprep.subr.bf16.mxu1 %v6672_v50  ;;  %v6709_v8 = vld [vmem:[%s7196_s18 + $0x2b0] ss:$240 sps:$4 sm:$0xff]   ;;  %v6712_v50 = vld [vmem:[%s7196_s18 + $0x2b8] ss:$240 sps:$4 sm:$0xff]  }
 0x203   : > { %4182 = vmatpush1.bf16.msra.mxu0 %v6667_v9  ;;  %4223 = vmatpush1.bf16.msra.mxu1 %v6670_v11  ;;  %v6717_v9 = vld [vmem:[%s7196_s18 + $0x494] ss:$240 sps:$4 sm:$0xff]   ;;  %v6720_v11 = vld [vmem:[%s7196_s18 + $0x49c] ss:$240 sps:$4 sm:$0xff]  }
 0x204   : > { %4183 = vmatprep.subr.bf16.mxu0 %v6675_v14  ;;  %4224 = vmatprep.subr.bf16.mxu1 %v6678_v15  ;;  %v6715_v14 = vld [vmem:[%s7196_s18 + $0x490] ss:$240 sps:$4 sm:$0xff]   ;;  %v6718_v15 = vld [vmem:[%s7196_s18 + $0x498] ss:$240 sps:$4 sm:$0xff]  }
 0x207   : > { %4184 = vmatpush1.bf16.msra.mxu0 %v6673_v16  ;;  %4225 = vmatpush1.bf16.msra.mxu1 %v6676_v17  ;;  %v6723_v16 = vld [vmem:[%s7196_s18 + $0x674] ss:$240 sps:$4 sm:$0xff]   ;;  %v6726_v17 = vld [vmem:[%s7196_s18 + $0x67c] ss:$240 sps:$4 sm:$0xff]  }
 0x208   : > { %4185 = vmatprep.subr.bf16.mxu0 %v6681_v18  ;;  %4226 = vmatprep.subr.bf16.mxu1 %v6684_v19  ;;  %v7815_v18 = vld [vmem:[%s7490_s30 + $0x18] sm:$0xff]  ;;  %v6721_v19 = vld [vmem:[%s7196_s18 + $0x670] ss:$240 sps:$4 sm:$0xff]  }
 0x209   : > { %v4916_v22 = vrot.slane %v7815_v18, %v7478_v57 }
 0x20b   : > { %4186 = vmatpush1.bf16.msra.mxu0 %v6679_v23  ;;  %4227 = vmatpush1.bf16.msra.mxu1 %v6682_v24  ;;  %v4920_v23 = vrot.slane %v7815_v18, %v7481_v58  ;;  %v4924_v24 = vrot.slane %v7815_v18, %v7484_v59 }
 0x20c   : > { %4187 = vmatprep.subr.bf16.mxu0 %v6687_v5  ;;  %4228 = vmatprep.subr.bf16.mxu1 %v6690_v25  ;;  %v4928_v5 = vrot.slane %v7815_v18, %v7487_v60  ;;  %v6727_v25 = vld [vmem:[%s7196_s18 + $0x850] ss:$240 sps:$4 sm:$0xff]  }
 0x20d   : > { %v3637_v31 = vpop.f32.mrb[20].mxu0  ;;  %v3678_v32 = vpop.f32.mrb[20].mxu1 }
 0x20e   : > { %v3639_v36 = vpop.f32.mrb[21].mxu0  ;;  %v3680_v37 = vpop.f32.mrb[21].mxu1 }
 0x20f   : > { %v4568_v38 = vcombine.low %v3637_v31, %v3639_v36  ;;  %v4569_v39 = vcombine.low %v3678_v32, %v3680_v37  ;;  %v3641_v40 = vpop.f32.mrb[22].mxu0  ;;  %v3682_v41 = vpop.f32.mrb[22].mxu1  ;;  %4188 = vmatpush1.bf16.msra.mxu0 %v6685_v28  ;;  %4229 = vmatpush1.bf16.msra.mxu1 %v6688_v29  ;;  %v6738_v28 = vld [vmem:[%s7196_s18 + $0xa3c] ss:$240 sps:$4 sm:$0xff]   ;;  %v5159_v29 = vcombine.low %v4916_v22, %v4920_v23  ;;  %v6736_v31 = vld [vmem:[%s7196_s18 + $0xa38] ss:$240 sps:$4 sm:$0xff]  }
 0x210   : > { %v3642_v44 = vpop.f32.mrb[23].mxu0  ;;  %v3683_v45 = vpop.f32.mrb[23].mxu1  ;;  %4189 = vmatprep.subr.bf16.mxu0 %v6693_v10  ;;  %4230 = vmatprep.subr.bf16.mxu1 %v6696_v30  ;;  %v5160_v10 = vcombine.low %v4924_v24, %v4928_v5  ;;  %v6733_v30 = vld [vmem:[%s7196_s18 + $0xa30] ss:$240 sps:$4 sm:$0xff]   ;;  %v6741_v32 = vld [vmem:[%s7196_s18 + $0xc14] ss:$240 sps:$4 sm:$0xff]   ;;  %v4932_v24 = vrot.slane %v7815_v18, %v7550_v63  ;;  %v4936_v5 = vrot.slane %v7815_v18, %v7553_v1 }
 0x211   : > { %v4576_v35 = vrot.slane %v4568_v38, %v7511_v13  ;;  %v4583_v48 = vrot.slane %v4569_v39, %v7511_v13  ;;  %v5167_v37 = vrot.slane %v5159_v29, %v7511_v13  ;;  %v6739_v45 = vld [vmem:[%s7196_s18 + $0xc10] ss:$240 sps:$4 sm:$0xff]   ;;  %v6772_v22 = vld [vmem:[%s7196_s18 + $0x688] ss:$240 sps:$4 sm:$0xff]   ;;  %v6780_v23 = vld [vmem:[%s7196_s18 + $0x86c] ss:$240 sps:$4 sm:$0xff]  }
 0x212   : > { %v5174_v38 = vrot.slane %v5160_v10, %v7511_v13  ;;  %v6783_v29 = vld [vmem:[%s7196_s18 + $0xa44] ss:$240 sps:$4 sm:$0xff]   ;;  %v6786_v10 = vld [vmem:[%s7196_s18 + $0xa4c] ss:$240 sps:$4 sm:$0xff]  }
 0x213   : > { %v4584_v51 = vcombine.low %v4576_v35, %v4583_v48  ;;  %4190 = vmatpush1.bf16.msra.mxu0 %v6691_v42  ;;  %4231 = vmatpush1.bf16.msra.mxu1 %v6694_v43  ;;  %v6747_v48 = vld [vmem:[%s7196_s18 + $0xdf4] ss:$240 sps:$4 sm:$0xff]  }
 0x214   : > { %4191 = vmatprep.subr.bf16.mxu0 %v6699_v46  ;;  %4232 = vmatprep.subr.bf16.mxu1 %v6702_v47  ;;  %v6742_v46 = vld [vmem:[%s7196_s18 + $0xc18] ss:$240 sps:$4 sm:$0xff]  }
 0x215   : > { %v5332_v12 = vadd.f32 %v5158_v49, %v4584_v51  ;;  %v6750_v49 = vld [vmem:[%s7196_s18 + $0xdfc] ss:$240 sps:$4 sm:$0xff]  }
 0x217   : > { %5347 = vst [vmem:[%s7531_s9 + $0x28] sm:$0xff] %v5332_v12  ;;  %4192 = vmatpush1.bf16.msra.mxu0 %v6697_v52  ;;  %4233 = vmatpush1.bf16.msra.mxu1 %v6700_v53  ;;  %v5175_v53 = vcombine.low %v5167_v37, %v5174_v38  ;;  %v6748_v12 = vld [vmem:[%s7196_s18 + $0xdf8] ss:$240 sps:$4 sm:$0xff]  }
 0x218   : > { %4259 = vmatprep.subr.bf16.mxu0 %v6705_v55  ;;  %4300 = vmatprep.subr.bf16.mxu1 %v6708_v56  ;;  %v6745_v56 = vld [vmem:[%s7196_s18 + $0xdf0] ss:$240 sps:$4 sm:$0xff]  }
 0x21a   : > { %4210 = vmatmul.mubr.bf16.vlgmr.msra.gmra.mrb[48].mxu0 %v7650_v54  ;;  %4251 = vmatmul.mubr.bf16.vlgmr.msra.gmra.mrb[48].mxu1 %v7650_v54 }
 0x21b   : > { %4260 = vmatpush1.bf16.msra.mxu0 %v6703_v61  ;;  %4301 = vmatpush1.bf16.msra.mxu1 %v6706_v4  ;;  %v6753_v61 = vld [vmem:[%s7196_s18 + $0xe4] ss:$240 sps:$4 sm:$0xff]   ;;  %v6756_v4 = vld [vmem:[%s7196_s18 + $0xec] ss:$240 sps:$4 sm:$0xff]  }
 0x21c   : > { %4261 = vmatprep.subr.bf16.mxu0 %v6711_v6  ;;  %4302 = vmatprep.subr.bf16.mxu1 %v6714_v7  ;;  %v6751_v7 = vld [vmem:[%s7196_s18 + $0xe0] ss:$240 sps:$4 sm:$0xff]  }
 0x21d   : > { %4291 = vmatprep.mubr.bf16.mxu0 %v6983_v0  ;;  %4332 = vmatprep.mubr.bf16.mxu1 %v6983_v0 }
 0x21f   : > { %4262 = vmatpush1.bf16.msra.mxu0 %v6709_v8  ;;  %4303 = vmatpush1.bf16.msra.mxu1 %v6712_v50  ;;  %v6754_v8 = vld [vmem:[%s7196_s18 + $0xe8] ss:$240 sps:$4 sm:$0xff]   ;;  %v6759_v50 = vld [vmem:[%s7196_s18 + $0x2c4] ss:$240 sps:$4 sm:$0xff]  }
 0x220   : > { %4263 = vmatprep.subr.bf16.mxu0 %v6717_v9  ;;  %4304 = vmatprep.subr.bf16.mxu1 %v6720_v11  ;;  %v6762_v9 = vld [vmem:[%s7196_s18 + $0x2cc] ss:$240 sps:$4 sm:$0xff]   ;;  %v6757_v11 = vld [vmem:[%s7196_s18 + $0x2c0] ss:$240 sps:$4 sm:$0xff]  }
 0x223   : > { %4264 = vmatpush1.bf16.msra.mxu0 %v6715_v14  ;;  %4305 = vmatpush1.bf16.msra.mxu1 %v6718_v15  ;;  %v6760_v14 = vld [vmem:[%s7196_s18 + $0x2c8] ss:$240 sps:$4 sm:$0xff]   ;;  %v6765_v15 = vld [vmem:[%s7196_s18 + $0x4a4] ss:$240 sps:$4 sm:$0xff]  }
 0x224   : > { %4265 = vmatprep.subr.bf16.mxu0 %v6723_v16  ;;  %4306 = vmatprep.subr.bf16.mxu1 %v6726_v17  ;;  %v6768_v16 = vld [vmem:[%s7196_s18 + $0x4ac] ss:$240 sps:$4 sm:$0xff]   ;;  %v6763_v17 = vld [vmem:[%s7196_s18 + $0x4a0] ss:$240 sps:$4 sm:$0xff]  }
 0x227   : > { %4266 = vmatpush1.bf16.msra.mxu0 %v6721_v19  ;;  %4307 = vmatpush1.bf16.msra.mxu1 %v6724_v20  ;;  %v6766_v19 = vld [vmem:[%s7196_s18 + $0x4a8] ss:$240 sps:$4 sm:$0xff]   ;;  %v6771_v20 = vld [vmem:[%s7196_s18 + $0x684] ss:$240 sps:$4 sm:$0xff]  }
 0x228   : > { %4267 = vmatprep.subr.bf16.mxu0 %v6729_v62  ;;  %4308 = vmatprep.subr.bf16.mxu1 %v6732_v21  ;;  %v6774_v62 = vld [vmem:[%s7196_s18 + $0x68c] ss:$240 sps:$4 sm:$0xff]   ;;  %v6769_v21 = vld [vmem:[%s7196_s18 + $0x680] ss:$240 sps:$4 sm:$0xff]  }
 0x22b   : > { %4268 = vmatpush1.bf16.msra.mxu0 %v6727_v25  ;;  %4309 = vmatpush1.bf16.msra.mxu1 %v6730_v26  ;;  %v4940_v25 = vrot.slane %v7815_v18, %v7556_v2  ;;  %v4944_v26 = vrot.slane %v7815_v18, %v7559_v3  ;;  %v6789_v18 = vld [vmem:[%s7196_s18 + $0xc24] ss:$240 sps:$4 sm:$0xff]  }
 0x22c   : > { %4269 = vmatprep.subr.bf16.mxu0 %v6735_v27  ;;  %4310 = vmatprep.subr.bf16.mxu1 %v6738_v28  ;;  %v6775_v27 = vld [vmem:[%s7196_s18 + $0x860] ss:$240 sps:$4 sm:$0xff]   ;;  %v6778_v28 = vld [vmem:[%s7196_s18 + $0x868] ss:$240 sps:$4 sm:$0xff]  }
 0x22d   : > { %v3719_v34 = vpop.f32.mrb[24].mxu0  ;;  %v3760_v36 = vpop.f32.mrb[24].mxu1 }
 0x22e   : > { %v3721_v39 = vpop.f32.mrb[25].mxu0  ;;  %v3762_v40 = vpop.f32.mrb[25].mxu1 }
 0x22f   : > { %v4585_v41 = vcombine.low %v3719_v34, %v3721_v39  ;;  %v4586_v42 = vcombine.low %v3760_v36, %v3762_v40  ;;  %v3723_v43 = vpop.f32.mrb[26].mxu0  ;;  %v3764_v44 = vpop.f32.mrb[26].mxu1  ;;  %4270 = vmatpush1.bf16.msra.mxu0 %v6733_v30  ;;  %4311 = vmatpush1.bf16.msra.mxu1 %v6736_v31  ;;  %v5176_v30 = vcombine.low %v4932_v24, %v4936_v5  ;;  %v6792_v34 = vld [vmem:[%s7196_s18 + $0xc2c] ss:$240 sps:$4 sm:$0xff]  }
 0x230   : > { %v3724_v47 = vpop.f32.mrb[27].mxu0  ;;  %v3765_v35 = vpop.f32.mrb[27].mxu1  ;;  %4271 = vmatprep.subr.bf16.mxu0 %v6741_v32  ;;  %4312 = vmatprep.subr.bf16.mxu1 %v6744_v33  ;;  %v5177_v31 = vcombine.low %v4940_v25, %v4944_v26  ;;  %v6781_v32 = vld [vmem:[%s7196_s18 + $0xa40] ss:$240 sps:$4 sm:$0xff]   ;;  %v6784_v33 = vld [vmem:[%s7196_s18 + $0xa48] ss:$240 sps:$4 sm:$0xff]  }
 0x231   : > { %v4593_v51 = vrot.slane %v4585_v41, %v7511_v13  ;;  %v4600_v52 = vrot.slane %v4586_v42, %v7511_v13  ;;  %v5184_v38 = vrot.slane %v5176_v30, %v7511_v13  ;;  %v6790_v47 = vld [vmem:[%s7196_s18 + $0xc28] ss:$240 sps:$4 sm:$0xff]  }
 0x232   : > { %v5191_v39 = vrot.slane %v5177_v31, %v7511_v13 }
 0x233   : > { %v4601_v55 = vcombine.low %v4593_v51, %v4600_v52  ;;  %4272 = vmatpush1.bf16.msra.mxu0 %v6739_v45  ;;  %4313 = vmatpush1.bf16.msra.mxu1 %v6742_v46  ;;  %v6787_v46 = vld [vmem:[%s7196_s18 + $0xc20] ss:$240 sps:$4 sm:$0xff]   ;;  %v6798_v51 = vld [vmem:[%s7196_s18 + $0xe0c] ss:$240 sps:$4 sm:$0xff]  }
 0x234   : > { %4273 = vmatprep.subr.bf16.mxu0 %v6747_v48  ;;  %4314 = vmatprep.subr.bf16.mxu1 %v6750_v49  ;;  %v6795_v49 = vld [vmem:[%s7196_s18 + $0xe04] ss:$240 sps:$4 sm:$0xff]  }
 0x235   : > { %v5333_v6 = vadd.f32 %v5175_v53, %v4601_v55  ;;  %v5192_v55 = vcombine.low %v5184_v38, %v5191_v39 }
 0x237   : > { %5348 = vst [vmem:[%s7531_s9 + $0x30] sm:$0xff] %v5333_v6  ;;  %4274 = vmatpush1.bf16.msra.mxu0 %v6745_v56  ;;  %4315 = vmatpush1.bf16.msra.mxu1 %v6748_v12  ;;  %v6793_v12 = vld [vmem:[%s7196_s18 + $0xe00] ss:$240 sps:$4 sm:$0xff]  }
 0x238   : > { %4341 = vmatprep.subr.bf16.mxu0 %v6753_v61  ;;  %4382 = vmatprep.subr.bf16.mxu1 %v6756_v4  ;;  %v6796_v61 = vld [vmem:[%s7196_s18 + $0xe08] ss:$240 sps:$4 sm:$0xff]   ;;  %v4805_v6 = vld [vmem:[%s7490_s30 + $0x20] sm:$0xff] }
 0x239   : > { %v4972_v30 = vrot.slane %v4805_v6, %v7556_v2  ;;  %v4976_v31 = vrot.slane %v4805_v6, %v7559_v3 }
 0x23a   : > { %4292 = vmatmul.mubr.bf16.vlgmr.msra.gmra.mrb[52].mxu0 %v7650_v54  ;;  %4333 = vmatmul.mubr.bf16.vlgmr.msra.gmra.mrb[52].mxu1 %v7650_v54 }
 0x23b   : > { %4342 = vmatpush1.bf16.msra.mxu0 %v6751_v7  ;;  %4383 = vmatpush1.bf16.msra.mxu1 %v6754_v8  ;;  %v4948_v7 = vrot.slane %v4805_v6, %v7478_v57  ;;  %v4952_v8 = vrot.slane %v4805_v6, %v7481_v58 }
 0x23c   : > { %4343 = vmatprep.subr.bf16.mxu0 %v6759_v50  ;;  %4384 = vmatprep.subr.bf16.mxu1 %v6762_v9  ;;  %v4956_v50 = vrot.slane %v4805_v6, %v7484_v59  ;;  %v4960_v9 = vrot.slane %v4805_v6, %v7487_v60 }
 0x23d   : > { %4373 = vmatprep.mubr.bf16.mxu0 %v6983_v0  ;;  %4414 = vmatprep.mubr.bf16.mxu1 %v6983_v0  ;;  %v6777_v0 = vld [vmem:[%s7196_s18 + $0x864] ss:$240 sps:$4 sm:$0xff]  }
 0x23f   : > { %4344 = vmatpush1.bf16.msra.mxu0 %v6757_v11  ;;  %4385 = vmatpush1.bf16.msra.mxu1 %v6760_v14  ;;  %v5193_v11 = vcombine.low %v4948_v7, %v4952_v8  ;;  %v5194_v14 = vcombine.low %v4956_v50, %v4960_v9 }
 0x240   : > { %4345 = vmatprep.subr.bf16.mxu0 %v6765_v15  ;;  %4386 = vmatprep.subr.bf16.mxu1 %v6768_v16 }
 0x243   : > { %4346 = vmatpush1.bf16.msra.mxu0 %v6763_v17  ;;  %4387 = vmatpush1.bf16.msra.mxu1 %v6766_v19  ;;  %v5201_v17 = vrot.slane %v5193_v11, %v7511_v13  ;;  %v5208_v19 = vrot.slane %v5194_v14, %v7511_v13 }
 0x244   : > { %4347 = vmatprep.subr.bf16.mxu0 %v6771_v20  ;;  %4388 = vmatprep.subr.bf16.mxu1 %v6774_v62 }
 0x245   : > { %v5209_v26 = vcombine.low %v5201_v17, %v5208_v19 }
 0x247   : > { %4348 = vmatpush1.bf16.msra.mxu0 %v6769_v21  ;;  %4389 = vmatpush1.bf16.msra.mxu1 %v6772_v22 }
 0x248   : > { %4349 = vmatprep.subr.bf16.mxu0 %v6777_v0  ;;  %4390 = vmatprep.subr.bf16.mxu1 %v6780_v23 }
 0x24b   : > { %4350 = vmatpush1.bf16.msra.mxu0 %v6775_v27  ;;  %4391 = vmatpush1.bf16.msra.mxu1 %v6778_v28 }
 0x24c   : > { %4351 = vmatprep.subr.bf16.mxu0 %v6783_v29  ;;  %4392 = vmatprep.subr.bf16.mxu1 %v6786_v10  ;;  %v4964_v29 = vrot.slane %v4805_v6, %v7550_v63  ;;  %v4968_v10 = vrot.slane %v4805_v6, %v7553_v1 }
 0x24d   : > { %v3801_v36 = vpop.f32.mrb[28].mxu0  ;;  %v3842_v37 = vpop.f32.mrb[28].mxu1 }
 0x24e   : > { %v3803_v40 = vpop.f32.mrb[29].mxu0  ;;  %v3844_v41 = vpop.f32.mrb[29].mxu1 }
 0x24f   : > { %v4602_v42 = vcombine.low %v3801_v36, %v3803_v40  ;;  %v4603_v43 = vcombine.low %v3842_v37, %v3844_v41  ;;  %v3805_v44 = vpop.f32.mrb[30].mxu0  ;;  %v3846_v45 = vpop.f32.mrb[30].mxu1  ;;  %4352 = vmatpush1.bf16.msra.mxu0 %v6781_v32  ;;  %4393 = vmatpush1.bf16.msra.mxu1 %v6784_v33  ;;  %v5210_v32 = vcombine.low %v4964_v29, %v4968_v10 }
 0x250   : > { %v3806_v35 = vpop.f32.mrb[31].mxu0  ;;  %v3847_v48 = vpop.f32.mrb[31].mxu1  ;;  %4353 = vmatprep.subr.bf16.mxu0 %v6789_v18  ;;  %4394 = vmatprep.subr.bf16.mxu1 %v6792_v34  ;;  %v5211_v33 = vcombine.low %v4972_v30, %v4976_v31 }
 0x251   : > { %v4610_v52 = vrot.slane %v4602_v42, %v7511_v13  ;;  %v4617_v53 = vrot.slane %v4603_v43, %v7511_v13  ;;  %v5218_v36 = vrot.slane %v5210_v32, %v7511_v13 }
 0x252   : > { %v5225_v37 = vrot.slane %v5211_v33, %v7511_v13 }
 0x253   : > { %v4618_v56 = vcombine.low %v4610_v52, %v4617_v53  ;;  %4354 = vmatpush1.bf16.msra.mxu0 %v6787_v46  ;;  %4395 = vmatpush1.bf16.msra.mxu1 %v6790_v47 }
 0x254   : > { %4355 = vmatprep.subr.bf16.mxu0 %v6795_v49  ;;  %4396 = vmatprep.subr.bf16.mxu1 %v6798_v51  ;;  %v5226_v35 = vcombine.low %v5218_v36, %v5225_v37  ;;  %v4806_v51 = vld [vmem:[%s7490_s30 + $0x28] sm:$0xff] }
 0x255   : > { %v5334_v4 = vadd.f32 %v5192_v55, %v4618_v56  ;;  %v4980_v52 = vrot.slane %v4806_v51, %v7478_v57  ;;  %v4984_v53 = vrot.slane %v4806_v51, %v7481_v58  ;;  %v4988_v55 = vrot.slane %v4806_v51, %v7484_v59 }
 0x256   : > { %v4992_v56 = vrot.slane %v4806_v51, %v7487_v60 }
 0x257   : > { %5349 = vst [vmem:[%s7531_s9 + $0x38] sm:$0xff] %v5334_v4  ;;  %4356 = vmatpush1.bf16.msra.mxu0 %v6793_v12  ;;  %4397 = vmatpush1.bf16.msra.mxu1 %v6796_v61  ;;  %v5227_v12 = vcombine.low %v4980_v52, %v4984_v53 }
 0x258   : > { %v5228_v61 = vcombine.low %v4988_v55, %v4992_v56 }
 0x259   : > { %v5235_v7 = vrot.slane %v5227_v12, %v7511_v13 }
 0x25a   : > { %4374 = vmatmul.mubr.bf16.vlgmr.msra.gmra.mrb[56].mxu0 %v7650_v54  ;;  %4415 = vmatmul.mubr.bf16.vlgmr.msra.gmra.mrb[56].mxu1 %v7650_v54  ;;  %v5242_v8 = vrot.slane %v5228_v61, %v7511_v13 }
 0x26d   : > { %v3883_v15 = vpop.f32.mrb[32].mxu0  ;;  %v3924_v16 = vpop.f32.mrb[32].mxu1 }
 0x26e   : > { %v3885_v20 = vpop.f32.mrb[33].mxu0  ;;  %v3926_v54 = vpop.f32.mrb[33].mxu1 }
 0x26f   : > { %v4619_v62 = vcombine.low %v3883_v15, %v3885_v20  ;;  %v4620_v21 = vcombine.low %v3924_v16, %v3926_v54  ;;  %v3887_v22 = vpop.f32.mrb[34].mxu0  ;;  %v3928_v0 = vpop.f32.mrb[34].mxu1 }
 0x270   : > { %v3888_v23 = vpop.f32.mrb[35].mxu0  ;;  %v3929_v24 = vpop.f32.mrb[35].mxu1  ;;  %v4996_v0 = vrot.slane %v4806_v51, %v7550_v63 }
 0x271   : > { %v4627_v5 = vrot.slane %v4619_v62, %v7511_v13  ;;  %v4634_v25 = vrot.slane %v4620_v21, %v7511_v13  ;;  %v5243_v62 = vcombine.low %v5235_v7, %v5242_v8  ;;  %v5000_v23 = vrot.slane %v4806_v51, %v7553_v1 }
 0x272   : > { %v5004_v24 = vrot.slane %v4806_v51, %v7556_v2 }
 0x273   : > { %v4635_v27 = vcombine.low %v4627_v5, %v4634_v25  ;;  %v5008_v5 = vrot.slane %v4806_v51, %v7559_v3  ;;  %v5244_v25 = vcombine.low %v4996_v0, %v5000_v23 }
 0x275   : > { %v5335_v28 = vadd.f32 %v5209_v26, %v4635_v27  ;;  %v5245_v26 = vcombine.low %v5004_v24, %v5008_v5  ;;  %v5252_v29 = vrot.slane %v5244_v25, %v7511_v13 }
 0x277   : > { %5350 = vst [vmem:[%s7531_s9 + $0x40] sm:$0xff] %v5335_v28  ;;  %v5259_v10 = vrot.slane %v5245_v26, %v7511_v13 }
 0x28d   : > { %v3965_v18 = vpop.f32.mrb[36].mxu0  ;;  %v4006_v34 = vpop.f32.mrb[36].mxu1 }
 0x28e   : > { %v3967_v38 = vpop.f32.mrb[37].mxu0  ;;  %v4008_v39 = vpop.f32.mrb[37].mxu1 }
 0x28f   : > { %v4636_v40 = vcombine.low %v3965_v18, %v3967_v38  ;;  %v4637_v41 = vcombine.low %v4006_v34, %v4008_v39  ;;  %v3969_v42 = vpop.f32.mrb[38].mxu0  ;;  %v4010_v43 = vpop.f32.mrb[38].mxu1 }
 0x290   : > { %v3970_v44 = vpop.f32.mrb[39].mxu0  ;;  %v4011_v45 = vpop.f32.mrb[39].mxu1  ;;  %v4807_v43 = vld [vmem:[%s7490_s30 + $0x30] sm:$0xff] }
 0x291   : > { %v4644_v46 = vrot.slane %v4636_v40, %v7511_v13  ;;  %v4651_v47 = vrot.slane %v4637_v41, %v7511_v13  ;;  %v5260_v40 = vcombine.low %v5252_v29, %v5259_v10  ;;  %v5012_v44 = vrot.slane %v4807_v43, %v7478_v57 }
 0x292   : > { %v5016_v45 = vrot.slane %v4807_v43, %v7481_v58 }
 0x293   : > { %v4652_v48 = vcombine.low %v4644_v46, %v4651_v47  ;;  %v5020_v46 = vrot.slane %v4807_v43, %v7484_v59  ;;  %v5024_v47 = vrot.slane %v4807_v43, %v7487_v60 }
 0x295   : > { %v5336_v49 = vadd.f32 %v5226_v35, %v4652_v48  ;;  %v5261_v35 = vcombine.low %v5012_v44, %v5016_v45  ;;  %v5262_v48 = vcombine.low %v5020_v46, %v5024_v47 }
 0x297   : > { %5351 = vst [vmem:[%s7531_s9 + $0x48] sm:$0xff] %v5336_v49  ;;  %v5269_v52 = vrot.slane %v5261_v35, %v7511_v13  ;;  %v5276_v53 = vrot.slane %v5262_v48, %v7511_v13 }
 0x2ad   : > { %v4047_v4 = vpop.f32.mrb[40].mxu0  ;;  %v4088_v6 = vpop.f32.mrb[40].mxu1 }
 0x2ae   : > { %v4049_v50 = vpop.f32.mrb[41].mxu0  ;;  %v4090_v9 = vpop.f32.mrb[41].mxu1 }
 0x2af   : > { %v4653_v11 = vcombine.low %v4047_v4, %v4049_v50  ;;  %v4654_v14 = vcombine.low %v4088_v6, %v4090_v9  ;;  %v4051_v15 = vpop.f32.mrb[42].mxu0  ;;  %v4092_v16 = vpop.f32.mrb[42].mxu1 }
 0x2b0   : > { %v4052_v17 = vpop.f32.mrb[43].mxu0  ;;  %v4093_v19 = vpop.f32.mrb[43].mxu1  ;;  %v5028_v16 = vrot.slane %v4807_v43, %v7550_v63 }
 0x2b1   : > { %v4661_v20 = vrot.slane %v4653_v11, %v7511_v13  ;;  %v4668_v54 = vrot.slane %v4654_v14, %v7511_v13  ;;  %v5277_v11 = vcombine.low %v5269_v52, %v5276_v53  ;;  %v5032_v17 = vrot.slane %v4807_v43, %v7553_v1 }
 0x2b2   : > { %v5036_v19 = vrot.slane %v4807_v43, %v7556_v2 }
 0x2b3   : > { %v4669_v21 = vcombine.low %v4661_v20, %v4668_v54  ;;  %v5040_v20 = vrot.slane %v4807_v43, %v7559_v3  ;;  %v5278_v54 = vcombine.low %v5028_v16, %v5032_v17 }
 0x2b5   : > { %v5337_v22 = vadd.f32 %v5243_v62, %v4669_v21  ;;  %v5279_v62 = vcombine.low %v5036_v19, %v5040_v20  ;;  %v5286_v0 = vrot.slane %v5278_v54, %v7511_v13 }
 0x2b7   : > { %5352 = vst [vmem:[%s7531_s9 + $0x50] sm:$0xff] %v5337_v22  ;;  %v5293_v23 = vrot.slane %v5279_v62, %v7511_v13 }
 0x2b9   : > { %v5294_v29 = vcombine.low %v5286_v0, %v5293_v23 }
 0x2cd   : > { %v4129_v27 = vpop.f32.mrb[44].mxu0  ;;  %v4170_v28 = vpop.f32.mrb[44].mxu1 }
 0x2ce   : > { %v4131_v30 = vpop.f32.mrb[45].mxu0  ;;  %v4172_v31 = vpop.f32.mrb[45].mxu1 }
 0x2cf   : > { %v4670_v32 = vcombine.low %v4129_v27, %v4131_v30  ;;  %v4671_v33 = vcombine.low %v4170_v28, %v4172_v31  ;;  %v4133_v18 = vpop.f32.mrb[46].mxu0  ;;  %v4174_v34 = vpop.f32.mrb[46].mxu1  ;;  %v4808_v31 = vld [vmem:[%s7490_s30 + $0x38] sm:$0xf] }
 0x2d0   : > { %v4134_v36 = vpop.f32.mrb[47].mxu0  ;;  %v4175_v37 = vpop.f32.mrb[47].mxu1  ;;  %v5052_v18 = vrot.slane %v4808_v31, %v7484_v59  ;;  %v5056_v34 = vrot.slane %v4808_v31, %v7487_v60 }
 0x2d1   : > { %v4678_v38 = vrot.slane %v4670_v32, %v7511_v13  ;;  %v4685_v39 = vrot.slane %v4671_v33, %v7511_v13  ;;  %v5044_v32 = vrot.slane %v4808_v31, %v7478_v57  ;;  %v5048_v33 = vrot.slane %v4808_v31, %v7481_v58 }
 0x2d2   : > { %v5296_v37 = vcombine.low %v5052_v18, %v5056_v34 }
 0x2d3   : > { %v4686_v41 = vcombine.low %v4678_v38, %v4685_v39  ;;  %v5295_v36 = vcombine.low %v5044_v32, %v5048_v33 }
 0x2d5   : > { %v5338_v42 = vadd.f32 %v5260_v40, %v4686_v41  ;;  %v5303_v40 = vrot.slane %v5295_v36, %v7511_v13  ;;  %v5310_v41 = vrot.slane %v5296_v37, %v7511_v13 }
 0x2d7   : > { %5353 = vst [vmem:[%s7531_s9 + $0x58] sm:$0xff] %v5338_v42  ;;  %v5311_v35 = vcombine.low %v5303_v40, %v5310_v41 }
 0x2ed   : > { %v4211_v49 = vpop.f32.mrb[48].mxu0  ;;  %v4252_v51 = vpop.f32.mrb[48].mxu1 }
 0x2ee   : > { %v4213_v55 = vpop.f32.mrb[49].mxu0  ;;  %v4254_v56 = vpop.f32.mrb[49].mxu1 }
 0x2ef   : > { %v4687_v12 = vcombine.low %v4211_v49, %v4213_v55  ;;  %v4688_v61 = vcombine.low %v4252_v51, %v4254_v56  ;;  %v4215_v4 = vpop.f32.mrb[50].mxu0  ;;  %v4256_v6 = vpop.f32.mrb[50].mxu1 }
 0x2f0   : > { %v4216_v7 = vpop.f32.mrb[51].mxu0  ;;  %v4257_v8 = vpop.f32.mrb[51].mxu1 }
 0x2f1   : > { %v4695_v50 = vrot.slane %v4687_v12, %v7511_v13  ;;  %v4702_v9 = vrot.slane %v4688_v61, %v7511_v13 }
 0x2f3   : > { %v4703_v14 = vcombine.low %v4695_v50, %v4702_v9 }
 0x2f5   : > { %v5339_v15 = vadd.f32 %v5277_v11, %v4703_v14 }
 0x2f7   : > { %5354 = vst [vmem:[%s7531_s9 + $0x60] sm:$0xff] %v5339_v15 }
 0x30d   : > { %v4293_v21 = vpop.f32.mrb[52].mxu0  ;;  %v4334_v22 = vpop.f32.mrb[52].mxu1 }
 0x30e   : > { %v4295_v24 = vpop.f32.mrb[53].mxu0  ;;  %v4336_v5 = vpop.f32.mrb[53].mxu1 }
 0x30f   : > { %v4704_v25 = vcombine.low %v4293_v21, %v4295_v24  ;;  %v4705_v63 = vcombine.low %v4334_v22, %v4336_v5  ;;  %v4297_v26 = vpop.f32.mrb[54].mxu0  ;;  %v4338_v1 = vpop.f32.mrb[54].mxu1 }
 0x310   : > { %v4298_v27 = vpop.f32.mrb[55].mxu0  ;;  %v4339_v2 = vpop.f32.mrb[55].mxu1 }
 0x311   : > { %v4712_v3 = vrot.slane %v4704_v25, %v7511_v13  ;;  %v4719_v28 = vrot.slane %v4705_v63, %v7511_v13 }
 0x313   : > { %v4720_v10 = vcombine.low %v4712_v3, %v4719_v28 }
 0x315   : > { %v5340_v30 = vadd.f32 %v5294_v29, %v4720_v10 }
 0x317   : > { %5355 = vst [vmem:[%s7531_s9 + $0x68] sm:$0xff] %v5340_v30 }
 0x32d   : > { %v4375_v38 = vpop.f32.mrb[56].mxu0  ;;  %v4416_v39 = vpop.f32.mrb[56].mxu1 }
 0x32e   : > { %v4377_v42 = vpop.f32.mrb[57].mxu0  ;;  %v4418_v43 = vpop.f32.mrb[57].mxu1 }
 0x32f   : > { %v4721_v57 = vcombine.low %v4375_v38, %v4377_v42  ;;  %v4722_v58 = vcombine.low %v4416_v39, %v4418_v43  ;;  %v4379_v44 = vpop.f32.mrb[58].mxu0  ;;  %v4420_v59 = vpop.f32.mrb[58].mxu1 }
 0x330   : > { %v4380_v60 = vpop.f32.mrb[59].mxu0  ;;  %v4421_v45 = vpop.f32.mrb[59].mxu1 }
 0x331   : > { %v4729_v46 = vrot.slane %v4721_v57, %v7511_v13  ;;  %v4736_v47 = vrot.slane %v4722_v58, %v7511_v13 }
 0x333   : > { %v4737_v48 = vcombine.low %v4729_v46, %v4736_v47 }
 0x335   : > { %v5341_v49 = vadd.f32 %v5311_v35, %v4737_v48 }
 0x337   : > { %5356 = vst [vmem:[%s7531_s9 + $0x70] sm:$0xff] %v5341_v49 }
 0x338   : > { %6902 = shalt.err (!%p6899_p2)
}
 0x339   : > { %s6903_s25 = scalar_lea.hbm %s7970_s23, 1920  ;;  %s6907_s29 = scalar_lea.hbm %s8022_s3, 7680 }
 0x33a   : > { %p6904_p6 = scmp.ne.s32.totalorder %s7970_s23, %s6903_s25  ;;  %p6908_p7 = scmp.lt.u32.totalorder %s7970_s23, %s8022_s3 }
 0x33b   : > { %p6909_p9 = scmp.lt.u32.totalorder %s6907_s29, %s6903_s25  ;;  %p6911_p12 = scmp.lt.u32.totalorder %s6903_s25, %s7970_s23 }
 0x33c   : > { %p6905_p4 = pnand %p6904_p6, %p8047_p5 }
 0x33d   : > { %p6910_p8 = por %p6909_p9, %p6908_p7 }
 0x33e   : > { %p6906_p3 = pneg %p6905_p4 }
 0x33f   : > { %p6912_p1 = por %p6911_p12, %p6910_p8 }
 0x341   : > { %p6913_p11 = pnand %p6912_p1, %p6906_p3 }
 0x343   : > { %6916 = shalt.err (!%p6913_p11)
}
 0x344   : > { %6004 = dma.vmem_to_hbm [thread:$0]  (%p8047_p5), %s7972_s26, 1920, %s7970_s23, %s5358_s8  }
 0x345 PF: > { %p6024_p13 = scmp.ge.s32.totalorder %s6975_s17, 2  ;;  %s5386_s5 = sand.u32 1, %s6955_s12  }
 0x346   : > { %p8048_p0 = scmp.ne.s32.totalorder %s8037_s4, 0  ;;  %s5387_s30 = scalar_lea.sflag [#allocation5], %s5386_s5 }
 0x348   : > { %p6018_p10 = pnand %p6024_p13, %p8048_p0 }
 0x34a   : > { %6950 = dma.done.wait (!%p6018_p10), %s5387_s30, 1920  }
 0x34b   : > { %6952 = vsyncadd (!%p6018_p10), %s5387_s30, 4294965376  ;;  %s20_s17 = sadd.s32 1, %s6975_s17   ;;  %s8049_s28 = sld [smem:[#allocation13_spill]] }
 0x34c   : > { %p17_p2 = scmp.ge.s32.totalorder %s20_s17, 6   ;;  %s8050_s12 = smov %s6959_s13 }
 0x34d   : > { %s8051_s13 = smov %s6963_s14  ;;  %s8052_s14 = smov %s7053_s24 }
 0x34e   : > { %s8053_s15 = smov %s6971_s16  ;;  %19 = sbr.rel (!%p17_p2) target bundleno = 9 (0x9), region = 102 }
 0x351   : > { %s8054_s16 = smov %s8049_s28 }
 0x355   :  { %5392 = vsyncpa [#allocation4], 1 }
 0x356   :  { %5394 = vsyncpa [#allocation4 + $0x1], 1 }
 0x357   :  { %5395 = vsyncpa [#allocation7], 1 }
 0x358   :  { %5397 = vsyncpa [#allocation7 + $0x1], 1 }
 0x359   :  { %5398 = vsyncpa [#allocation5], 1 }
 0x35a   :  { %5400 = vsyncpa [#allocation5 + $0x1], 1 }

</bundles_post_ra>
